<compile_context>
chip_gen: v7x
topology: tpu7x:2x2x1
jax: 0.10.0
libtpu: 0.0.40
codegen_flags: <defaults>
</compile_context>

<pallas_src>
import jax
import jax.numpy as jnp
from jax.experimental import pallas as pl
from jax.experimental.pallas import tpu as pltpu

EPS = 1e-05
COUT_BLOCK = 176   # 8-multiple; 344 -> grid of 2 tiles (176 + ragged 168)


def conv_bn_kernel(w_ref, x_ref, gb_ref, o_ref):
    # w_ref:  (blk, Cin) bf16   -- this grid step's slice of the 1x1 conv weight
    # x_ref:  (Cin, M)   f32    -- full activation, resident across grid steps
    # gb_ref: (blk, 2)   f32    -- [:, 0] = gamma, [:, 1] = beta
    # o_ref:  (blk, M)   f32
    x = x_ref[...].astype(jnp.bfloat16)   # in-kernel cast: no extra HBM traffic
    w = w_ref[...]

    # 1x1 conv == plain matmul on the MXU (bf16 operands, f32 accumulation).
    y = jnp.dot(w, x, preferred_element_type=jnp.float32)        # (blk, M)

    # Training-mode BatchNorm2d: biased batch stats over N*H*W == the M (lane) axis.
    # Two-pass variance (y is already resident) + clamp: robust to non-zero means.
    m = jnp.float32(y.shape[1])
    mean = jnp.sum(y, axis=1, keepdims=True) / m                 # (blk, 1)
    centered = y - mean
    var = jnp.sum(centered * centered, axis=1, keepdims=True) / m
    var = jnp.maximum(var, 0.0)
    inv_std = jax.lax.rsqrt(var + jnp.float32(EPS))              # (blk, 1)

    gamma = gb_ref[:, 0:1]
    beta = gb_ref[:, 1:2]
    o_ref[...] = (centered * (gamma * inv_std) + beta).astype(o_ref.dtype)


@jax.jit
def conv_bn_forward(x_nchw, weight, gamma, beta):
    """x_nchw: (N, Cin, H, W) f32; weight: (Cout, Cin, 1, 1) (f32 or pre-cast bf16);
    gamma/beta: (Cout,).  Returns (N, Cout, H, W) f32."""
    N, Cin, H, W = x_nchw.shape
    Cout = weight.shape[0]
    M = N * H * W

    # NCHW -> (Cin, M).  Free reshape when N == 1 (the module's case).
    if N == 1:
        x2d = x_nchw.reshape(Cin, M)
    else:
        # N > 1: batch axis must sit next to the spatial axes so BN reduces over all
        # of N*H*W; this general path needs one transpose.
        x2d = jnp.transpose(x_nchw, (1, 0, 2, 3)).reshape(Cin, M)

    w2d = weight.reshape(Cout, Cin).astype(jnp.bfloat16)   # no-op if pre-cast to bf16
    gb = jnp.stack([gamma.astype(jnp.float32), beta.astype(jnp.float32)], axis=1)

    blk = COUT_BLOCK if Cout > COUT_BLOCK else Cout
    grid = (pl.cdiv(Cout, blk),)

    out2d = pl.pallas_call(
        conv_bn_kernel,
        out_shape=jax.ShapeDtypeStruct((Cout, M), jnp.float32),
        grid=grid,
        in_specs=[
            pl.BlockSpec((blk, Cin), lambda i: (i, 0)),   # weight tile per grid step
            pl.BlockSpec((Cin, M), lambda i: (0, 0)),     # x: full-resident block
            pl.BlockSpec((blk, 2), lambda i: (i, 0)),     # gamma/beta tile
        ],
        out_specs=pl.BlockSpec((blk, M), lambda i: (i, 0)),
        compiler_params=pltpu.CompilerParams(
            dimension_semantics=("parallel",),            # megacore on v7x; harmless on 1-TC
            vmem_limit_bytes=16 << 20,
        ),
    )(w2d, x2d, gb)

    # (Cout, M) -> NCHW.  Free reshape when N == 1.
    if N == 1:
        return out2d.reshape(1, Cout, H, W)
    return jnp.transpose(out2d.reshape(Cout, N, H, W), (1, 0, 2, 3))


def reference_forward(x_nchw, weight, gamma, beta, operand_dtype=jnp.float32):
    """Pure-JAX reference (conv 1x1 + training-mode BN).  `operand_dtype` picks the
    matmul operand precision (f32 = exact module semantics, bf16 = matched precision
    with the kernel); accumulation and BN math are always f32."""
    N, Cin, H, W = x_nchw.shape
    Cout = weight.shape[0]
    x2d = jnp.transpose(x_nchw, (0, 2, 3, 1)).reshape(-1, Cin).astype(operand_dtype)
    w2d = weight.reshape(Cout, Cin).T.astype(operand_dtype)
    y = jnp.dot(x2d, w2d, preferred_element_type=jnp.float32)
    mean = jnp.mean(y, axis=0, keepdims=True)
    var = jnp.mean((y - mean) ** 2, axis=0, keepdims=True)
    out = (y - mean) / jnp.sqrt(var + EPS) * gamma[None, :].astype(jnp.float32) \
        + beta[None, :].astype(jnp.float32)
    return jnp.transpose(out.reshape(N, H, W, Cout), (0, 3, 1, 2))


if __name__ == "__main__":
    # Shapes implied by the module's forward: x483 = torch.randn(1, 2064, 7, 7)
    N, Cin, H, W, Cout = 1, 2064, 7, 7, 344

    key = jax.random.PRNGKey(0)
    kx, kw, kg, kb = jax.random.split(key, 4)
    x = jax.random.normal(kx, (N, Cin, H, W), dtype=jnp.float32)
    weight = jax.random.normal(kw, (Cout, Cin, 1, 1), dtype=jnp.float32) * 0.02
    gamma = 1.0 + 0.1 * jax.random.normal(kg, (Cout,), dtype=jnp.float32)
    beta = 0.1 * jax.random.normal(kb, (Cout,), dtype=jnp.float32)

    # Pre-cast the conv weight to bf16 once, outside the hot path, so the kernel's
    # dominant HBM load is halved (the astype inside conv_bn_forward is then a no-op).
    weight_bf16 = weight.astype(jnp.bfloat16)

    out = jax.block_until_ready(conv_bn_forward(x, weight_bf16, gamma, beta))
    assert out.shape == (N, Cout, H, W), out.shape

    # (1) Tight check vs a matched-precision reference (bf16 matmul operands,
    #     f32 accumulation) -- validates the fused kernel math itself.
    ref_bf16 = jax.block_until_ready(
        reference_forward(x, weight, gamma, beta, operand_dtype=jnp.bfloat16))
    assert jnp.allclose(out, ref_bf16, atol=1e-3, rtol=1e-3), "mismatch vs bf16-operand reference"

    # (2) Looser check vs the full-f32 reference (PyTorch module semantics);
    #     tolerance only reflects bf16 matmul-operand rounding.
    ref_f32 = jax.block_until_ready(reference_forward(x, weight, gamma, beta))
    assert jnp.allclose(out, ref_f32, atol=2e-2, rtol=2e-2), "mismatch vs f32 reference"

    print("KERNEL_OK")
</pallas_src>

<mosaic_0001>
module attributes {stable_mosaic.version = 11 : i64} {
  func.func @conv_bn_kernel(%arg0: i32, %arg1: memref<176x2064xbf16, #tpu.memory_space<vmem>>, %arg2: memref<2064x49xf32, #tpu.memory_space<vmem>>, %arg3: memref<176x2xf32, #tpu.memory_space<vmem>>, %arg4: memref<176x49xf32, #tpu.memory_space<vmem>>) attributes {dimension_semantics = [#tpu.dimension_semantics<parallel>], iteration_bounds = array<i64: 2>, scalar_prefetch = 0 : i64, scratch_operands = 0 : i64, tpu.core_type = #tpu.core_type<tc>, window_params = [{transform_indices = @transform_0, window_bounds = array<i64: 176, 2064>}, {pipeline_mode = #tpu.pipeline_mode<synchronous>, transform_indices = @transform_1, window_bounds = array<i64: 2064, 49>}, {transform_indices = @transform_2, window_bounds = array<i64: 176, 2>}, {transform_indices = @transform_3, window_bounds = array<i64: 176, 49>}]} {
    %c0 = arith.constant 0 : index
    %c0_0 = arith.constant 0 : index
    %0 = vector.load %arg2[%c0, %c0_0] : memref<2064x49xf32, #tpu.memory_space<vmem>>, vector<2064x49xf32>
    %1 = arith.truncf %0 : vector<2064x49xf32> to vector<2064x49xbf16>
    %c0_1 = arith.constant 0 : index
    %c0_2 = arith.constant 0 : index
    %2 = vector.load %arg1[%c0_1, %c0_2] : memref<176x2064xbf16, #tpu.memory_space<vmem>>, vector<176x2064xbf16>
    %cst = arith.constant dense<0.000000e+00> : vector<176x49xf32>
    %3 = tpu.matmul %2, %1, %cst {dimension_numbers = #tpu.dot_dimension_numbers<[1], [0], [0], [1], [0, 0, 1, 1], [], []>} : vector<176x2064xbf16>, vector<2064x49xbf16>, vector<176x49xf32> -> vector<176x49xf32>
    %cst_3 = arith.constant dense<0.000000e+00> : vector<176xf32>
    %4 = vector.multi_reduction <add>, %3, %cst_3 [1] : vector<176x49xf32> to vector<176xf32>
    %5 = vector.shape_cast %4 : vector<176xf32> to vector<176x1xf32>
    %cst_4 = arith.constant 4.900000e+01 : f32
    %6 = vector.broadcast %cst_4 : f32 to vector<176x1xf32>
    %7 = arith.divf %5, %6 : vector<176x1xf32>
    %8 = vector.broadcast %7 : vector<176x1xf32> to vector<176x49xf32>
    %9 = arith.subf %3, %8 : vector<176x49xf32>
    %10 = arith.mulf %9, %9 : vector<176x49xf32>
    %cst_5 = arith.constant dense<0.000000e+00> : vector<176xf32>
    %11 = vector.multi_reduction <add>, %10, %cst_5 [1] : vector<176x49xf32> to vector<176xf32>
    %12 = vector.shape_cast %11 : vector<176xf32> to vector<176x1xf32>
    %cst_6 = arith.constant 4.900000e+01 : f32
    %13 = vector.broadcast %cst_6 : f32 to vector<176x1xf32>
    %14 = arith.divf %12, %13 : vector<176x1xf32>
    %cst_7 = arith.constant 0.000000e+00 : f32
    %15 = vector.broadcast %cst_7 : f32 to vector<176x1xf32>
    %16 = arith.maximumf %14, %15 : vector<176x1xf32>
    %cst_8 = arith.constant 9.99999974E-6 : f32
    %17 = vector.broadcast %cst_8 : f32 to vector<176x1xf32>
    %18 = arith.addf %16, %17 : vector<176x1xf32>
    %19 = math.rsqrt %18 : vector<176x1xf32>
    %c0_9 = arith.constant 0 : index
    %c0_10 = arith.constant 0 : index
    %20 = vector.load %arg3[%c0_9, %c0_10] : memref<176x2xf32, #tpu.memory_space<vmem>>, vector<176x1xf32>
    %c0_11 = arith.constant 0 : index
    %c1 = arith.constant 1 : index
    %21 = vector.load %arg3[%c0_11, %c1] : memref<176x2xf32, #tpu.memory_space<vmem>>, vector<176x1xf32>
    %22 = arith.mulf %20, %19 : vector<176x1xf32>
    %23 = vector.broadcast %22 : vector<176x1xf32> to vector<176x49xf32>
    %24 = arith.mulf %9, %23 : vector<176x49xf32>
    %25 = vector.broadcast %21 : vector<176x1xf32> to vector<176x49xf32>
    %26 = arith.addf %24, %25 : vector<176x49xf32>
    %c0_12 = arith.constant 0 : index
    %c0_13 = arith.constant 0 : index
    %27 = vector.load %arg4[%c0_12, %c0_13] : memref<176x49xf32, #tpu.memory_space<vmem>>, vector<176x49xf32>
    tpu.vector_store %arg4[%c0_12, %c0_13], %26 {strides = array<i32>} : memref<176x49xf32, #tpu.memory_space<vmem>>, vector<176x49xf32>,
    return
  }
  func.func @transform_0(%arg0: i32) -> (i32, i32) {
    %c0_i32 = arith.constant 0 : i32
    %c0_i32_0 = arith.constant 0 : i32
    return %arg0, %c0_i32 : i32, i32
  }
  func.func @transform_1(%arg0: i32) -> (i32, i32) {
    %c0_i32 = arith.constant 0 : i32
    %c0_i32_0 = arith.constant 0 : i32
    %c0_i32_1 = arith.constant 0 : i32
    return %c0_i32, %c0_i32_0 : i32, i32
  }
  func.func @transform_2(%arg0: i32) -> (i32, i32) {
    %c0_i32 = arith.constant 0 : i32
    %c0_i32_0 = arith.constant 0 : i32
    return %arg0, %c0_i32 : i32, i32
  }
  func.func @transform_3(%arg0: i32) -> (i32, i32) {
    %c0_i32 = arith.constant 0 : i32
    %c0_i32_0 = arith.constant 0 : i32
    return %arg0, %c0_i32 : i32, i32
  }
}

</mosaic_0001>

<bundles_post_ra>
// kernel: conv_bn_forward.1
= control target key start
LH: loop header
LB: loop body
LE: loop exit
PB: predicated region body
PF: predicated region fallthrough
CT: control target
= control target key end

     0   :  { %s5306_s12 = smov 0   ;;  %s5308_s13 = smov 0   ;;  %s7155_s0 = inlined_call_operand.vmem [shape: bf16[344,2064], index: 0, kind: input, shape index: {}]   ;;  %s7156_s1 = inlined_call_operand.vmem [shape: f32[2064,49], index: 1, kind: input, shape index: {}]   ;;  %s7157_s2 = inlined_call_operand.vmem [shape: f32[344,2], index: 2, kind: input, shape index: {}]   ;;  %s7158_s3 = inlined_call_operand.vmem [shape: f32[344,49], index: 3, kind: output, shape index: {}]  }
   0x1   :  { %s5310_s14 = smov 0  }
   0x2 LB: > { %s5319_s15 = sadd.s32 4294967295, %s5248_s14   ;;  %s5321_s16 = sadd.s32 1, %s5248_s14   ;;  %s5248_s14 = sphi %s5310_s14, %s7166_s14   ;;  %s5244_s13 = sphi %s5308_s13, %s7165_s13   ;;  %s5240_s12 = sphi %s5306_s12, %s7164_s12  }
   0x3   : > { %s90_s17 = ssub.s32 %s5248_s14, %s5321_s16  ;;  %s93_s18 = sadd.s32 1, %s5244_s13 }
   0x4   : > { %p91_p0 = scmp.eq.s32.totalorder %s90_s17, 0  ;;  %p103_p1 = scmp.ne.s32.totalorder %s5244_s13, %s5240_s12 }
   0x5   : > { %p104_p2 = scmp.eq.s32.totalorder %s5319_s15, 1  ;;  %p3820_p3 = scmp.ge.s32.totalorder %s5248_s14, 1 }
   0x6   : > { %s5329_s19 = scalar_select %p91_p0, %s5244_s13, %s93_s18  }
   0x7   : > { %p5331_p4 = por %p104_p2, %p103_p1  ;;  %p168_p5 = scmp.lt.s32.totalorder %s5248_s14, 3 }
   0x9   : > { %p169_p6 = pnand %p3820_p3, %p168_p5 }
   0xa   : > { %v259_v0 = vld [vmem:[%s7156_s1 + $0x80] sm:$0xff] (!%p169_p6)  ;;  %v260_v1 = vld [vmem:[%s7156_s1 + $0x88] sm:$0xff] (!%p169_p6)  ;;  %s5345_s27 = smul.u32 (!%p169_p6), 22, %s5319_s15  ;;  %v261_v5 = vld [vmem:[%s7156_s1 + $0x90] sm:$0xff] (!%p169_p6)  ;;  %vm5283_vm0 = vmmov (!%p169_p6), 0   ;;  %vm1763_vm1 = vcmask (!%p169_p6), 130048  }
   0xb   : > { %172 = sbr.rel (%p169_p6) target bundleno = 1224 (0x4c8), region = 32  ;;  %v243_v2 = vld [vmem:[%s7156_s1] sm:$0xff] (!%p169_p6)  ;;  %v509_v3 = vpack.c.bf16 (!%p169_p6), %v260_v1, %v259_v0  ;;  %v244_v4 = vld [vmem:[%s7156_s1 + $0x8] sm:$0xff] (!%p169_p6)  ;;  %v262_v6 = vld [vmem:[%s7156_s1 + $0x98] sm:$0xff] (!%p169_p6)  ;;  %vm2886_vm2 = vcmask (!%p169_p6), 400384  }
   0xc   : > { %v501_v7 = vpack.c.bf16 (!%p169_p6), %v244_v4, %v243_v2  ;;  %v510_v8 = vpack.c.bf16 (!%p169_p6), %v262_v6, %v261_v5  ;;  %v245_v9 = vld [vmem:[%s7156_s1 + $0x10] sm:$0xff] (!%p169_p6)  ;;  %v246_v10 = vld [vmem:[%s7156_s1 + $0x18] sm:$0xff] (!%p169_p6)  ;;  %v263_v11 = vld [vmem:[%s7156_s1 + $0xa0] sm:$0xff] (!%p169_p6)  ;;  %p212_p7 = scmp.lt.s32.totalorder (!%p169_p6), %s5345_s27, 42 }
   0xd   : > { %4034 = vmatprep.subr.bf16.mxu0 (!%p169_p6), %v509_v3  ;;  %4748 = vmatprep.subr.bf16.mxu1 (!%p169_p6), %v509_v3  ;;  %v264_v12 = vld [vmem:[%s7156_s1 + $0xa8] sm:$0xff] (!%p169_p6)  ;;  %v502_v13 = vpack.c.bf16 (!%p169_p6), %v246_v10, %v245_v9  ;;  %v247_v15 = vld [vmem:[%s7156_s1 + $0x20] sm:$0xff] (!%p169_p6)  ;;  %v265_v17 = vld [vmem:[%s7156_s1 + $0xb0] sm:$0xff] (!%p169_p6) }
   0xe   : > { %4035 = vmatpush3.bf16.msra.mxu0 (!%p169_p6), %v501_v7  ;;  %4756 = vmatpush3.bf16.msra.mxu1 (!%p169_p6), %v501_v7  ;;  %v511_v14 = vpack.c.bf16 (!%p169_p6), %v264_v12, %v263_v11  ;;  %v248_v16 = vld [vmem:[%s7156_s1 + $0x28] sm:$0xff] (!%p169_p6)  ;;  %v266_v18 = vld [vmem:[%s7156_s1 + $0xb8] sm:$0xff] (!%p169_p6)  ;;  %v249_v21 = vld [vmem:[%s7156_s1 + $0x30] sm:$0xff] (!%p169_p6) }
   0xf   : > { %4036 = vmatprep.subr.bf16.mxu0 (!%p169_p6), %v510_v8  ;;  %4749 = vmatprep.subr.bf16.mxu1 (!%p169_p6), %v510_v8  ;;  %v503_v19 = vpack.c.bf16 (!%p169_p6), %v248_v16, %v247_v15  ;;  %v512_v20 = vpack.c.bf16 (!%p169_p6), %v266_v18, %v265_v17  ;;  %v250_v22 = vld [vmem:[%s7156_s1 + $0x38] sm:$0xff] (!%p169_p6)  ;;  %v267_v23 = vld [vmem:[%s7156_s1 + $0xc0] sm:$0xff] (!%p169_p6)  ;;  %v268_v24 = vld [vmem:[%s7156_s1 + $0xc8] sm:$0xff] (!%p169_p6) }
  0x10   : > { %v504_v26 = vpack.c.bf16 (!%p169_p6), %v250_v22, %v249_v21  ;;  %v513_v27 = vpack.c.bf16 (!%p169_p6), %v268_v24, %v267_v23  ;;  %v251_v28 = vld [vmem:[%s7156_s1 + $0x40] sm:$0xff] (!%p169_p6)  ;;  %v252_v29 = vld [vmem:[%s7156_s1 + $0x48] sm:$0xff] (!%p169_p6)  ;;  %v269_v31 = vld [vmem:[%s7156_s1 + $0xd0] sm:$0xff] (!%p169_p6) }
  0x11   : > { %v270_v32 = vld [vmem:[%s7156_s1 + $0xd8] sm:$0xff] (!%p169_p6)  ;;  %v505_v33 = vpack.c.bf16 (!%p169_p6), %v252_v29, %v251_v28  ;;  %v253_v34 = vld [vmem:[%s7156_s1 + $0x50] sm:$0xff] (!%p169_p6)  ;;  %v271_v37 = vld [vmem:[%s7156_s1 + $0xe0] sm:$0xff] (!%p169_p6) }
  0x12   : > { %s5370_s21 = scalar_select %p212_p7, %s5345_s27, 42  ;;  %4037 = vmatpush3.bf16.msra.mxu0 %v502_v13  ;;  %4757 = vmatpush3.bf16.msra.mxu1 %v502_v13  ;;  %v514_v35 = vpack.c.bf16 %v270_v32, %v269_v31  ;;  %v254_v36 = vld [vmem:[%s7156_s1 + $0x58] sm:$0xff]  ;;  %v272_v38 = vld [vmem:[%s7156_s1 + $0xe8] sm:$0xff]  ;;  %v255_v41 = vld [vmem:[%s7156_s1 + $0x60] sm:$0xff] }
  0x13   : > { %4038 = vmatprep.subr.bf16.mxu0 %v511_v14  ;;  %4750 = vmatprep.subr.bf16.mxu1 %v511_v14  ;;  %v506_v39 = vpack.c.bf16 %v254_v36, %v253_v34  ;;  %v515_v40 = vpack.c.bf16 %v272_v38, %v271_v37  ;;  %v256_v42 = vld [vmem:[%s7156_s1 + $0x68] sm:$0xff]  ;;  %v273_v43 = vld [vmem:[%s7156_s1 + $0xf0] sm:$0xff]  ;;  %v274_v44 = vld [vmem:[%s7156_s1 + $0xf8] sm:$0xff]  ;;  %s4033_s22 = smul.u32 (%p5331_p4), 176, %s5319_s15 }
  0x14   : > { %s4765_s4 = smul.u32 68, %s5370_s21  ;;  %v257_v45 = vld [vmem:[%s7156_s1 + $0x70] sm:$0xff]  ;;  %v507_v46 = vpack.c.bf16 %v256_v42, %v255_v41  ;;  %v258_v47 = vld [vmem:[%s7156_s1 + $0x78] sm:$0xff]  ;;  %v516_v48 = vpack.c.bf16 %v274_v44, %v273_v43  ;;  %v323_v49 = vld [vmem:[%s7156_s1 + $0x280] sm:$0xff]  ;;  %s3822_s10 = sshll.u32 %s5370_s21, 3 }
  0x15   : > { %v324_v50 = vld [vmem:[%s7156_s1 + $0x288] sm:$0xff]  ;;  %v291_v51 = vld [vmem:[%s7156_s1 + $0x180] sm:$0xff]  ;;  %v508_v54 = vpack.c.bf16 %v258_v47, %v257_v45  ;;  %v325_v62 = vld [vmem:[%s7156_s1 + $0x290] sm:$0xff]  ;;  %s6443_s17 = scalar_lea.vmem %s7157_s2, %s3822_s10  ;;  %s203_s21 = sand.u32 1, %s5240_s12  }
  0x16   : > { %s5388_s7 = scalar_lea.vmem %s7155_s0, %s4765_s4  ;;  %4039 = vmatpush3.bf16.msra.mxu0 %v503_v19  ;;  %4758 = vmatpush3.bf16.msra.mxu1 %v503_v19  ;;  %v292_v52 = vld [vmem:[%s7156_s1 + $0x188] sm:$0xff]  ;;  %v307_v53 = vld [vmem:[%s7156_s1 + $0x200] sm:$0xff]  ;;  %v541_v60 = vpack.c.bf16 %v324_v50, %v323_v49  ;;  %v326_v63 = vld [vmem:[%s7156_s1 + $0x298] sm:$0xff]  ;;  %s3512_s12 = ssub.s32 (%p5331_p4), 43, %s5345_s27 }
  0x17   : > { %v4867_v25 = vld [vmem:[%s5388_s7 + $0x4] ss:$68 sps:$4 sm:$0xff]   ;;  %4040 = vmatprep.subr.bf16.mxu0 %v512_v20  ;;  %4751 = vmatprep.subr.bf16.mxu1 %v512_v20  ;;  %v4870_v30 = vld [vmem:[%s5388_s7 + $0x334] ss:$68 sps:$4 sm:$0xff]   ;;  %v525_v61 = vpack.c.bf16 %v292_v52, %v291_v51  ;;  %v4871_v0 = vld [vmem:[%s5388_s7 + $0x8c] ss:$68 sps:$4 sm:$0xff]   ;;  %v542_v8 = vpack.c.bf16 %v326_v63, %v325_v62  ;;  %s7051_s25 = scalar_lea.vmem (%p5331_p4), %s7158_s3, %s4033_s22  }
  0x18   : > { %1829 = vmatprep.mubr.bf16.mxu0 %v4867_v25  ;;  %1877 = vmatprep.mubr.bf16.mxu1 %v4870_v30  ;;  %v308_v55 = vld [vmem:[%s7156_s1 + $0x208] sm:$0xff]  ;;  %v275_v56 = vld [vmem:[%s7156_s1 + $0x100] sm:$0xff]  ;;  %v4868_v59 = vld [vmem:[%s5388_s7 + $0x330] ss:$68 sps:$4 sm:$0xff]   ;;  %p3513_p8 = scmp.lt.s32.totalorder (%p5331_p4), %s3512_s12, 22 }
  0x19   : > { %v276_v57 = vld [vmem:[%s7156_s1 + $0x108] sm:$0xff]  ;;  %v4865_v58 = vld [vmem:[%s5388_s7] ss:$68 sps:$4 sm:$0xff]   ;;  %v293_v1 = vld [vmem:[%s7156_s1 + $0x190] sm:$0xff]  ;;  %v533_v3 = vpack.c.bf16 %v308_v55, %v307_v53 }
  0x1a   : > { %4041 = vmatpush3.bf16.msra.mxu0 %v504_v26  ;;  %4759 = vmatpush3.bf16.msra.mxu1 %v504_v26  ;;  %v294_v2 = vld [vmem:[%s7156_s1 + $0x198] sm:$0xff]  ;;  %v517_v4 = vpack.c.bf16 %v276_v57, %v275_v56  ;;  %v309_v6 = vld [vmem:[%s7156_s1 + $0x210] sm:$0xff]  ;;  %v327_v11 = vld [vmem:[%s7156_s1 + $0x2a0] sm:$0xff] }
  0x1b   : > { %4042 = vmatprep.subr.bf16.mxu0 %v513_v27  ;;  %4752 = vmatprep.subr.bf16.mxu1 %v513_v27  ;;  %v4873_v5 = vld [vmem:[%s5388_s7 + $0x3bc] ss:$68 sps:$4 sm:$0xff]   ;;  %v277_v9 = vld [vmem:[%s7156_s1 + $0x110] sm:$0xff]  ;;  %v526_v12 = vpack.c.bf16 %v294_v2, %v293_v1  ;;  %v328_v13 = vld [vmem:[%s7156_s1 + $0x2a8] sm:$0xff] }
  0x1c   : > { %v310_v7 = vld [vmem:[%s7156_s1 + $0x218] sm:$0xff]  ;;  %v295_v14 = vld [vmem:[%s7156_s1 + $0x1a0] sm:$0xff]  ;;  %v296_v15 = vld [vmem:[%s7156_s1 + $0x1a8] sm:$0xff]  ;;  %v543_v22 = vpack.c.bf16 %v328_v13, %v327_v11 }
  0x1d   : > { %v278_v10 = vld [vmem:[%s7156_s1 + $0x118] sm:$0xff]  ;;  %v311_v16 = vld [vmem:[%s7156_s1 + $0x220] sm:$0xff]  ;;  %v534_v17 = vpack.c.bf16 %v310_v7, %v309_v6  ;;  %v312_v19 = vld [vmem:[%s7156_s1 + $0x228] sm:$0xff]  ;;  %v527_v23 = vpack.c.bf16 %v296_v15, %v295_v14 }
  0x1e   : > { %4043 = vmatpush3.bf16.msra.mxu0 %v505_v33  ;;  %4760 = vmatpush3.bf16.msra.mxu1 %v505_v33  ;;  %v518_v18 = vpack.c.bf16 %v278_v10, %v277_v9  ;;  %v279_v20 = vld [vmem:[%s7156_s1 + $0x120] sm:$0xff]  ;;  %v4875_v21 = vld [vmem:[%s5388_s7 + $0x88] ss:$68 sps:$4 sm:$0xff]   ;;  %v4876_v25 = vld [vmem:[%s5388_s7 + $0x3b8] ss:$68 sps:$4 sm:$0xff]   ;;  %v535_v31 = vpack.c.bf16 %v312_v19, %v311_v16 }
  0x1f   : > { %4044 = vmatprep.subr.bf16.mxu0 %v514_v35  ;;  %4753 = vmatprep.subr.bf16.mxu1 %v514_v35  ;;  %v280_v24 = vld [vmem:[%s7156_s1 + $0x128] sm:$0xff]  ;;  %v297_v26 = vld [vmem:[%s7156_s1 + $0x1b0] sm:$0xff]  ;;  %v298_v28 = vld [vmem:[%s7156_s1 + $0x1b8] sm:$0xff] }
  0x20   : > { %v4877_v27 = vld [vmem:[%s5388_s7 + $0x114] ss:$68 sps:$4 sm:$0xff]   ;;  %v519_v32 = vpack.c.bf16 %v280_v24, %v279_v20  ;;  %v4879_v33 = vld [vmem:[%s5388_s7 + $0x444] ss:$68 sps:$4 sm:$0xff]   ;;  %v4883_v52 = vld [vmem:[%s5388_s7 + $0x19c] ss:$68 sps:$4 sm:$0xff]  }
  0x21   : > { %v329_v29 = vld [vmem:[%s7156_s1 + $0x2b0] sm:$0xff]  ;;  %v330_v30 = vld [vmem:[%s7156_s1 + $0x2b8] sm:$0xff]  ;;  %v299_v38 = vld [vmem:[%s7156_s1 + $0x1c0] sm:$0xff] }
  0x22   : > { %4045 = vmatpush3.bf16.msra.mxu0 %v506_v39  ;;  %4761 = vmatpush3.bf16.msra.mxu1 %v506_v39  ;;  %v281_v34 = vld [vmem:[%s7156_s1 + $0x130] sm:$0xff]  ;;  %v282_v35 = vld [vmem:[%s7156_s1 + $0x138] sm:$0xff]  ;;  %v528_v39 = vpack.c.bf16 %v298_v28, %v297_v26  ;;  %v300_v41 = vld [vmem:[%s7156_s1 + $0x1c8] sm:$0xff] }
  0x23   : > { %4046 = vmatprep.subr.bf16.mxu0 %v515_v40  ;;  %4754 = vmatprep.subr.bf16.mxu1 %v515_v40  ;;  %v313_v36 = vld [vmem:[%s7156_s1 + $0x230] sm:$0xff]  ;;  %v314_v37 = vld [vmem:[%s7156_s1 + $0x238] sm:$0xff]  ;;  %v544_v40 = vpack.c.bf16 %v330_v30, %v329_v29  ;;  %v331_v42 = vld [vmem:[%s7156_s1 + $0x2c0] sm:$0xff]  ;;  %v520_v44 = vpack.c.bf16 %v282_v35, %v281_v34  ;;  %v529_v49 = vpack.c.bf16 %v300_v41, %v299_v38 }
  0x24   : > { %v332_v43 = vld [vmem:[%s7156_s1 + $0x2c8] sm:$0xff]  ;;  %v536_v45 = vpack.c.bf16 %v314_v37, %v313_v36  ;;  %v4881_v47 = vld [vmem:[%s5388_s7 + $0x110] ss:$68 sps:$4 sm:$0xff]   ;;  %v302_v57 = vld [vmem:[%s7156_s1 + $0x1d8] sm:$0xff] }
  0x25   : > { %v284_v50 = vld [vmem:[%s7156_s1 + $0x148] sm:$0xff]  ;;  %v545_v51 = vpack.c.bf16 %v332_v43, %v331_v42  ;;  %v301_v56 = vld [vmem:[%s7156_s1 + $0x1d0] sm:$0xff]  ;;  %v318_v1 = vld [vmem:[%s7156_s1 + $0x258] sm:$0xff] }
  0x26   : > { %4047 = vmatpush3.bf16.msra.mxu0 %v507_v46  ;;  %4762 = vmatpush3.bf16.msra.mxu1 %v507_v46  ;;  %v283_v46 = vld [vmem:[%s7156_s1 + $0x140] sm:$0xff]  ;;  %v4885_v53 = vld [vmem:[%s5388_s7 + $0x4cc] ss:$68 sps:$4 sm:$0xff]   ;;  %v530_v2 = vpack.c.bf16 %v302_v57, %v301_v56  ;;  %v4887_v10 = vld [vmem:[%s5388_s7 + $0x198] ss:$68 sps:$4 sm:$0xff]  }
  0x27   : > { %4048 = vmatprep.subr.bf16.mxu0 %v516_v48  ;;  %4755 = vmatprep.subr.bf16.mxu1 %v516_v48  ;;  %v4882_v48 = vld [vmem:[%s5388_s7 + $0x440] ss:$68 sps:$4 sm:$0xff]   ;;  %v316_v55 = vld [vmem:[%s7156_s1 + $0x248] sm:$0xff]  ;;  %v317_v62 = vld [vmem:[%s7156_s1 + $0x250] sm:$0xff]  ;;  %v521_v63 = vpack.c.bf16 %v284_v50, %v283_v46 }
  0x28   : > { %v335_v6 = vld [vmem:[%s7156_s1 + $0x2e0] sm:$0xff]  ;;  %v336_v7 = vld [vmem:[%s7156_s1 + $0x2e8] sm:$0xff]  ;;  %v538_v13 = vpack.c.bf16 %v318_v1, %v317_v62  ;;  %v305_v14 = vld [vmem:[%s7156_s1 + $0x1f0] sm:$0xff] }
  0x29   : > { %v288_v9 = vld [vmem:[%s7156_s1 + $0x168] sm:$0xff]  ;;  %v306_v15 = vld [vmem:[%s7156_s1 + $0x1f8] sm:$0xff]  ;;  %v319_v16 = vld [vmem:[%s7156_s1 + $0x260] sm:$0xff]  ;;  %v547_v20 = vpack.c.bf16 %v336_v7, %v335_v6 }
  0x2a   : > { %4049 = vmatpush3.bf16.msra.mxu0 %v508_v54  ;;  %4763 = vmatpush3.bf16.msra.mxu1 %v508_v54  ;;  %v315_v54 = vld [vmem:[%s7156_s1 + $0x240] sm:$0xff]  ;;  %v4888_v11 = vld [vmem:[%s5388_s7 + $0x4c8] ss:$68 sps:$4 sm:$0xff]   ;;  %v289_v24 = vld [vmem:[%s7156_s1 + $0x170] sm:$0xff] }
  0x2b   : > { %4198 = vmatprep.subr.bf16.mxu0 %v541_v60  ;;  %4116 = vmatprep.subr.bf16.mxu1 %v525_v61  ;;  %v285_v60 = vld [vmem:[%s7156_s1 + $0x150] sm:$0xff]  ;;  %v286_v61 = vld [vmem:[%s7156_s1 + $0x158] sm:$0xff]  ;;  %v355_v30 = vld [vmem:[%s7156_s1 + $0x380] sm:$0xff] }
  0x2c   : > { %v321_v28 = vld [vmem:[%s7156_s1 + $0x270] sm:$0xff]  ;;  %v322_v29 = vld [vmem:[%s7156_s1 + $0x278] sm:$0xff]  ;;  %v387_v34 = vld [vmem:[%s7156_s1 + $0x480] sm:$0xff] }
  0x2d   : > { %1830 = vmatmul.mubr.bf16.vlgmr.msra.gmra.mrb[0].mxu0 %v4865_v58  ;;  %1878 = vmatmul.mubr.bf16.vlgmr.msra.gmra.mrb[0].mxu1 %v4868_v59  ;;  %v333_v58 = vld [vmem:[%s7156_s1 + $0x2d0] sm:$0xff]  ;;  %v334_v59 = vld [vmem:[%s7156_s1 + $0x2d8] sm:$0xff]  ;;  %v388_v35 = vld [vmem:[%s7156_s1 + $0x488] sm:$0xff]  ;;  %v540_v37 = vpack.c.bf16 %v322_v29, %v321_v28 }
  0x2e   : > { %4199 = vmatpush3.bf16.msra.mxu0 %v533_v3  ;;  %4117 = vmatpush3.bf16.msra.mxu1 %v517_v4  ;;  %v546_v3 = vpack.c.bf16 %v334_v59, %v333_v58  ;;  %v303_v4 = vld [vmem:[%s7156_s1 + $0x1e0] sm:$0xff]  ;;  %v573_v41 = vpack.c.bf16 %v388_v35, %v387_v34  ;;  %v4895_v42 = vld [vmem:[%s5388_s7 + $0x2ac] ss:$68 sps:$4 sm:$0xff]   ;;  %v4901_v50 = vld [vmem:[%s5388_s7 + $0x94] ss:$68 sps:$4 sm:$0xff]  }
  0x2f   : > { %4200 = vmatprep.subr.bf16.mxu0 %v542_v8  ;;  %1837 = vmatprep.mubr.bf16.mxu0 %v4871_v0  ;;  %v537_v0 = vpack.c.bf16 %v316_v55, %v315_v54  ;;  %v287_v8 = vld [vmem:[%s7156_s1 + $0x160] sm:$0xff]  ;;  %v4899_v43 = vld [vmem:[%s5388_s7 + $0xc] ss:$68 sps:$4 sm:$0xff]   ;;  %v342_v55 = vld [vmem:[%s7156_s1 + $0x318] sm:$0xff] }
  0x30   : > { %1885 = vmatprep.mubr.bf16.mxu1 %v4873_v5  ;;  %4118 = vmatprep.subr.bf16.mxu1 %v526_v12  ;;  %v304_v5 = vld [vmem:[%s7156_s1 + $0x1e8] sm:$0xff]  ;;  %v522_v12 = vpack.c.bf16 %v286_v61, %v285_v60  ;;  %v523_v26 = vpack.c.bf16 %v288_v9, %v287_v8  ;;  %v4893_v38 = vld [vmem:[%s5388_s7 + $0x220] ss:$68 sps:$4 sm:$0xff]   ;;  %v4903_v61 = vld [vmem:[%s5388_s7 + $0x10] ss:$68 sps:$4 sm:$0xff]  }
  0x31   : > { %v531_v19 = vpack.c.bf16 %v304_v5, %v303_v4  ;;  %v4897_v46 = vld [vmem:[%s5388_s7 + $0x8] ss:$68 sps:$4 sm:$0xff]   ;;  %v359_v56 = vld [vmem:[%s7156_s1 + $0x3a0] sm:$0xff]  ;;  %v4906_v62 = vld [vmem:[%s5388_s7 + $0x90] ss:$68 sps:$4 sm:$0xff]  }
  0x32   : > { %4201 = vmatpush3.bf16.msra.mxu0 %v534_v17  ;;  %4119 = vmatpush3.bf16.msra.mxu1 %v518_v18  ;;  %v320_v17 = vld [vmem:[%s7156_s1 + $0x268] sm:$0xff]  ;;  %v371_v58 = vld [vmem:[%s7156_s1 + $0x400] sm:$0xff]  ;;  %v373_v4 = vld [vmem:[%s7156_s1 + $0x410] sm:$0xff] }
  0x33   : > { %4202 = vmatprep.subr.bf16.mxu0 %v543_v22  ;;  %4120 = vmatprep.subr.bf16.mxu1 %v527_v23  ;;  %v4889_v18 = vld [vmem:[%s5388_s7 + $0x224] ss:$68 sps:$4 sm:$0xff]   ;;  %v338_v22 = vld [vmem:[%s7156_s1 + $0x2f8] sm:$0xff]  ;;  %v361_v9 = vld [vmem:[%s7156_s1 + $0x3b0] sm:$0xff] }
  0x34   : > { %v4891_v23 = vld [vmem:[%s5388_s7 + $0x554] ss:$68 sps:$4 sm:$0xff]   ;;  %v360_v57 = vld [vmem:[%s7156_s1 + $0x3a8] sm:$0xff]  ;;  %v4907_v1 = vld [vmem:[%s5388_s7 + $0x11c] ss:$68 sps:$4 sm:$0xff]  }
  0x35   : > { %1838 = vmatmul.mubr.bf16.gmra.mrb[4].mxu0 %v4875_v21  ;;  %1886 = vmatmul.mubr.bf16.gmra.mrb[4].mxu1 %v4876_v25  ;;  %v337_v21 = vld [vmem:[%s7156_s1 + $0x2f0] sm:$0xff]  ;;  %v290_v25 = vld [vmem:[%s7156_s1 + $0x178] sm:$0xff]  ;;  %v372_v59 = vld [vmem:[%s7156_s1 + $0x408] sm:$0xff] }
  0x36   : > { %4203 = vmatpush3.bf16.msra.mxu0 %v535_v31  ;;  %4121 = vmatpush3.bf16.msra.mxu1 %v519_v32  ;;  %v532_v31 = vpack.c.bf16 %v306_v15, %v305_v14  ;;  %v548_v32 = vpack.c.bf16 %v338_v22, %v337_v21  ;;  %v524_v36 = vpack.c.bf16 %v290_v25, %v289_v24  ;;  %v343_v5 = vld [vmem:[%s7156_s1 + $0x320] sm:$0xff]  ;;  %v344_v6 = vld [vmem:[%s7156_s1 + $0x328] sm:$0xff]  ;;  %v374_v8 = vld [vmem:[%s7156_s1 + $0x418] sm:$0xff] }
  0x37   : > { %1845 = vmatprep.mubr.bf16.mxu0 %v4877_v27  ;;  %1893 = vmatprep.mubr.bf16.mxu1 %v4879_v33  ;;  %v539_v27 = vpack.c.bf16 %v320_v17, %v319_v16  ;;  %v356_v33 = vld [vmem:[%s7156_s1 + $0x388] sm:$0xff]  ;;  %v565_v7 = vpack.c.bf16 %v372_v59, %v371_v58  ;;  %v345_v16 = vld [vmem:[%s7156_s1 + $0x330] sm:$0xff]  ;;  %v346_v17 = vld [vmem:[%s7156_s1 + $0x338] sm:$0xff] }
  0x38   : > { %4122 = vmatprep.subr.bf16.mxu1 %v528_v39  ;;  %4204 = vmatprep.subr.bf16.mxu0 %v544_v40  ;;  %v4894_v39 = vld [vmem:[%s5388_s7 + $0x550] ss:$68 sps:$4 sm:$0xff]   ;;  %v557_v40 = vpack.c.bf16 %v356_v33, %v355_v30  ;;  %v392_v14 = vld [vmem:[%s7156_s1 + $0x4a8] sm:$0xff]  ;;  %v4911_v21 = vld [vmem:[%s5388_s7 + $0x118] ss:$68 sps:$4 sm:$0xff]   ;;  %v552_v29 = vpack.c.bf16 %v346_v17, %v345_v16 }
  0x39   : > { %v4912_v22 = vld [vmem:[%s5388_s7 + $0x98] ss:$68 sps:$4 sm:$0xff]   ;;  %v393_v24 = vld [vmem:[%s7156_s1 + $0x4b0] sm:$0xff]  ;;  %v4915_v28 = vld [vmem:[%s5388_s7 + $0x124] ss:$68 sps:$4 sm:$0xff]  }
  0x3a   : > { %4123 = vmatpush3.bf16.msra.mxu1 %v520_v44  ;;  %4205 = vmatpush3.bf16.msra.mxu0 %v536_v45  ;;  %v339_v44 = vld [vmem:[%s7156_s1 + $0x300] sm:$0xff]  ;;  %v340_v45 = vld [vmem:[%s7156_s1 + $0x308] sm:$0xff]  ;;  %v394_v25 = vld [vmem:[%s7156_s1 + $0x4b8] sm:$0xff] }
  0x3b   : > { %4124 = vmatprep.subr.bf16.mxu1 %v529_v49  ;;  %4206 = vmatprep.subr.bf16.mxu0 %v545_v51  ;;  %v4900_v49 = vld [vmem:[%s5388_s7 + $0x2a8] ss:$68 sps:$4 sm:$0xff]   ;;  %v4905_v51 = vld [vmem:[%s5388_s7 + $0x14] ss:$68 sps:$4 sm:$0xff]   ;;  %v351_v59 = vld [vmem:[%s7156_s1 + $0x360] sm:$0xff] }
  0x3c   : > { %v364_v30 = vld [vmem:[%s7156_s1 + $0x3c8] sm:$0xff]  ;;  %v365_v33 = vld [vmem:[%s7156_s1 + $0x3d0] sm:$0xff]  ;;  %v366_v34 = vld [vmem:[%s7156_s1 + $0x3d8] sm:$0xff] }
  0x3d   : > { %1846 = vmatmul.mubr.bf16.gmra.mrb[8].mxu0 %v4881_v47  ;;  %1894 = vmatmul.mubr.bf16.gmra.mrb[8].mxu1 %v4882_v48  ;;  %v357_v47 = vld [vmem:[%s7156_s1 + $0x390] sm:$0xff]  ;;  %v358_v48 = vld [vmem:[%s7156_s1 + $0x398] sm:$0xff]  ;;  %v368_v58 = vld [vmem:[%s7156_s1 + $0x3e8] sm:$0xff] }
  0x3e   : > { %1853 = vmatprep.mubr.bf16.mxu0 %v4883_v52  ;;  %1901 = vmatprep.mubr.bf16.mxu1 %v4885_v53  ;;  %v549_v52 = vpack.c.bf16 %v340_v45, %v339_v44  ;;  %v341_v53 = vld [vmem:[%s7156_s1 + $0x310] sm:$0xff]  ;;  %v558_v54 = vpack.c.bf16 %v358_v48, %v357_v47  ;;  %v562_v44 = vpack.c.bf16 %v366_v34, %v365_v33  ;;  %v350_v45 = vld [vmem:[%s7156_s1 + $0x358] sm:$0xff]  ;;  %v4918_v47 = vld [vmem:[%s5388_s7 + $0x120] ss:$68 sps:$4 sm:$0xff]  }
  0x3f   : > { %4125 = vmatpush3.bf16.msra.mxu1 %v521_v63  ;;  %4207 = vmatpush3.bf16.msra.mxu0 %v537_v0  ;;  %v550_v60 = vpack.c.bf16 %v342_v55, %v341_v53  ;;  %v389_v63 = vld [vmem:[%s7156_s1 + $0x490] sm:$0xff]  ;;  %v559_v0 = vpack.c.bf16 %v360_v57, %v359_v56  ;;  %v398_v56 = vld [vmem:[%s7156_s1 + $0x4d8] sm:$0xff]  ;;  %v367_v57 = vld [vmem:[%s7156_s1 + $0x3e0] sm:$0xff] }
  0x40   : > { %4126 = vmatprep.subr.bf16.mxu1 %v530_v2  ;;  %4208 = vmatprep.subr.bf16.mxu0 %v546_v3  ;;  %v390_v2 = vld [vmem:[%s7156_s1 + $0x498] sm:$0xff]  ;;  %v4921_v53 = vld [vmem:[%s5388_s7 + $0x1ac] ss:$68 sps:$4 sm:$0xff]   ;;  %v419_v16 = vld [vmem:[%s7156_s1 + $0x580] sm:$0xff] }
  0x41   : > { %v4909_v3 = vld [vmem:[%s5388_s7 + $0x9c] ss:$68 sps:$4 sm:$0xff]   ;;  %v420_v17 = vld [vmem:[%s7156_s1 + $0x588] sm:$0xff]  ;;  %v4930_v33 = vld [vmem:[%s5388_s7 + $0x230] ss:$68 sps:$4 sm:$0xff]  }
  0x42   : > { %v4931_v34 = vld [vmem:[%s5388_s7 + $0x33c] ss:$68 sps:$4 sm:$0xff]  }
  0x43   : > { %4127 = vmatpush3.bf16.msra.mxu1 %v522_v12  ;;  %4209 = vmatpush3.bf16.msra.mxu0 %v538_v13  ;;  %v391_v12 = vld [vmem:[%s7156_s1 + $0x4a0] sm:$0xff]  ;;  %v551_v13 = vpack.c.bf16 %v344_v6, %v343_v5  ;;  %v400_v6 = vld [vmem:[%s7156_s1 + $0x4e8] sm:$0xff] }
  0x44   : > { %4128 = vmatprep.subr.bf16.mxu1 %v531_v19  ;;  %4210 = vmatprep.subr.bf16.mxu0 %v547_v20  ;;  %v375_v19 = vld [vmem:[%s7156_s1 + $0x420] sm:$0xff]  ;;  %v376_v20 = vld [vmem:[%s7156_s1 + $0x428] sm:$0xff] }
  0x45   : > { %1854 = vmatmul.mubr.bf16.gmra.mrb[12].mxu0 %v4887_v10  ;;  %1902 = vmatmul.mubr.bf16.gmra.mrb[12].mxu1 %v4888_v11  ;;  %v362_v10 = vld [vmem:[%s7156_s1 + $0x3b8] sm:$0xff]  ;;  %v574_v11 = vpack.c.bf16 %v390_v2, %v389_v63  ;;  %v567_v35 = vpack.c.bf16 %v376_v20, %v375_v19  ;;  %v381_v2 = vld [vmem:[%s7156_s1 + $0x450] sm:$0xff]  ;;  %v399_v5 = vld [vmem:[%s7156_s1 + $0x4e0] sm:$0xff] }
  0x46   : > { %1861 = vmatprep.mubr.bf16.mxu0 %v4889_v18  ;;  %1909 = vmatprep.mubr.bf16.mxu1 %v4891_v23  ;;  %v560_v15 = vpack.c.bf16 %v362_v10, %v361_v9  ;;  %v566_v18 = vpack.c.bf16 %v374_v8, %v373_v4  ;;  %v575_v23 = vpack.c.bf16 %v392_v14, %v391_v12  ;;  %v353_v8 = vld [vmem:[%s7156_s1 + $0x370] sm:$0xff]  ;;  %v354_v9 = vld [vmem:[%s7156_s1 + $0x378] sm:$0xff]  ;;  %v4923_v10 = vld [vmem:[%s5388_s7 + $0x228] ss:$68 sps:$4 sm:$0xff]  }
  0x47   : > { %4129 = vmatpush3.bf16.msra.mxu1 %v523_v26  ;;  %4211 = vmatpush3.bf16.msra.mxu0 %v539_v27  ;;  %v363_v26 = vld [vmem:[%s7156_s1 + $0x3c0] sm:$0xff]  ;;  %v384_v14 = vld [vmem:[%s7156_s1 + $0x468] sm:$0xff]  ;;  %v401_v19 = vld [vmem:[%s7156_s1 + $0x4f0] sm:$0xff] }
  0x48   : > { %4130 = vmatprep.subr.bf16.mxu1 %v532_v31  ;;  %4212 = vmatprep.subr.bf16.mxu0 %v548_v32  ;;  %v4913_v27 = vld [vmem:[%s5388_s7 + $0x1a4] ss:$68 sps:$4 sm:$0xff]   ;;  %v402_v20 = vld [vmem:[%s7156_s1 + $0x4f8] sm:$0xff] }
  0x49   : > { %v347_v31 = vld [vmem:[%s7156_s1 + $0x340] sm:$0xff]  ;;  %v348_v32 = vld [vmem:[%s7156_s1 + $0x348] sm:$0xff] }
  0x4a   : > { %v383_v12 = vld [vmem:[%s7156_s1 + $0x460] sm:$0xff] }
  0x4b   : > { %4131 = vmatpush3.bf16.msra.mxu1 %v524_v36  ;;  %4213 = vmatpush3.bf16.msra.mxu0 %v540_v37  ;;  %v377_v36 = vld [vmem:[%s7156_s1 + $0x430] sm:$0xff]  ;;  %v378_v37 = vld [vmem:[%s7156_s1 + $0x438] sm:$0xff] }
  0x4c   : > { %4280 = vmatprep.subr.bf16.mxu1 %v557_v40  ;;  %4362 = vmatprep.subr.bf16.mxu0 %v573_v41  ;;  %v576_v40 = vpack.c.bf16 %v394_v25, %v393_v24  ;;  %v553_v41 = vpack.c.bf16 %v348_v32, %v347_v31  ;;  %v568_v48 = vpack.c.bf16 %v378_v37, %v377_v36  ;;  %v4929_v32 = vld [vmem:[%s5388_s7 + $0x2b0] ss:$68 sps:$4 sm:$0xff]   ;;  %v4935_v36 = vld [vmem:[%s5388_s7 + $0x338] ss:$68 sps:$4 sm:$0xff]  }
  0x4d   : > { %1862 = vmatmul.mubr.bf16.gmra.mrb[16].mxu0 %v4893_v38  ;;  %1910 = vmatmul.mubr.bf16.gmra.mrb[16].mxu1 %v4894_v39  ;;  %v561_v38 = vpack.c.bf16 %v364_v30, %v363_v26  ;;  %v395_v39 = vld [vmem:[%s7156_s1 + $0x4c0] sm:$0xff]  ;;  %v589_v24 = vpack.c.bf16 %v420_v17, %v419_v16  ;;  %v580_v25 = vpack.c.bf16 %v402_v20, %v401_v19  ;;  %v385_v26 = vld [vmem:[%s7156_s1 + $0x470] sm:$0xff]  ;;  %v4936_v37 = vld [vmem:[%s5388_s7 + $0x2b8] ss:$68 sps:$4 sm:$0xff]  }
  0x4e   : > { %1869 = vmatprep.mubr.bf16.mxu0 %v4895_v42  ;;  %1950 = vmatprep.mubr.bf16.mxu1 %v4899_v43  ;;  %v396_v42 = vld [vmem:[%s7156_s1 + $0x4c8] sm:$0xff]  ;;  %v349_v43 = vld [vmem:[%s7156_s1 + $0x350] sm:$0xff] }
  0x4f   : > { %v554_v55 = vpack.c.bf16 %v350_v45, %v349_v43  ;;  %v4945_v43 = vld [vmem:[%s5388_s7 + $0x3cc] ss:$68 sps:$4 sm:$0xff]  }
  0x50   : > { %v4948_v45 = vld [vmem:[%s5388_s7 + $0x3c8] ss:$68 sps:$4 sm:$0xff]   ;;  %v437_v17 = vld [vmem:[%s7156_s1 + $0x610] sm:$0xff] }
  0x51   : > { %v4975_v16 = vld [vmem:[%s5388_s7 + $0xac] ss:$68 sps:$4 sm:$0xff]  }
  0x52   : > { %v408_v19 = vld [vmem:[%s7156_s1 + $0x528] sm:$0xff] }
  0x55   : > { %1870 = vmatmul.mubr.bf16.gmra.mrb[20].mxu0 %v4900_v49  ;;  %1951 = vmatmul.mubr.bf16.vlgmr.msra.gmra.mrb[20].mxu1 %v4897_v46  ;;  %v4917_v46 = vld [vmem:[%s5388_s7 + $0x1a0] ss:$68 sps:$4 sm:$0xff]  }
  0x56   : > { %4281 = vmatpush3.bf16.msra.mxu1 %v549_v52  ;;  %1958 = vmatprep.mubr.bf16.mxu1 %v4901_v50  ;;  %v379_v49 = vld [vmem:[%s7156_s1 + $0x440] sm:$0xff]  ;;  %v380_v50 = vld [vmem:[%s7156_s1 + $0x448] sm:$0xff] }
  0x57   : > { %2071 = vmatprep.mubr.bf16.mxu0 %v4905_v51  ;;  %4282 = vmatprep.subr.bf16.mxu1 %v558_v54  ;;  %v397_v51 = vld [vmem:[%s7156_s1 + $0x4d0] sm:$0xff]  ;;  %v577_v54 = vpack.c.bf16 %v396_v42, %v395_v39  ;;  %v569_v63 = vpack.c.bf16 %v380_v50, %v379_v49  ;;  %v4939_v39 = vld [vmem:[%s5388_s7 + $0x344] ss:$68 sps:$4 sm:$0xff]   ;;  %v4955_v50 = vld [vmem:[%s5388_s7 + $0x55c] ss:$68 sps:$4 sm:$0xff]  }
  0x58   : > { %v4919_v52 = vld [vmem:[%s5388_s7 + $0x22c] ss:$68 sps:$4 sm:$0xff]  }
  0x59   : > { %v4943_v42 = vld [vmem:[%s5388_s7 + $0x44c] ss:$68 sps:$4 sm:$0xff]  }
  0x5a   : > { %4283 = vmatpush3.bf16.msra.mxu1 %v550_v60  ;;  %v352_v60 = vld [vmem:[%s7156_s1 + $0x368] sm:$0xff]  ;;  %v4954_v49 = vld [vmem:[%s5388_s7 + $0x450] ss:$68 sps:$4 sm:$0xff]  }
  0x5b   : > { %4284 = vmatprep.subr.bf16.mxu1 %v559_v0  ;;  %v563_v0 = vpack.c.bf16 %v368_v58, %v367_v57  ;;  %v555_v4 = vpack.c.bf16 %v352_v60, %v351_v59  ;;  %v403_v57 = vld [vmem:[%s7156_s1 + $0x500] sm:$0xff]  ;;  %v404_v58 = vld [vmem:[%s7156_s1 + $0x508] sm:$0xff]  ;;  %v421_v59 = vld [vmem:[%s7156_s1 + $0x590] sm:$0xff] }
  0x5c   : > { %v422_v60 = vld [vmem:[%s7156_s1 + $0x598] sm:$0xff] }
  0x5d   : > { %1959 = vmatmul.mubr.bf16.gmra.mrb[24].mxu1 %v4906_v62  ;;  %2072 = vmatmul.mubr.bf16.vlgmr.msra.gmra.mrb[24].mxu0 %v4903_v61  ;;  %v369_v61 = vld [vmem:[%s7156_s1 + $0x3f0] sm:$0xff]  ;;  %v370_v62 = vld [vmem:[%s7156_s1 + $0x3f8] sm:$0xff] }
  0x5e   : > { %4363 = vmatpush3.bf16.msra.mxu0 %v565_v7  ;;  %1966 = vmatprep.mubr.bf16.mxu1 %v4907_v1  ;;  %v578_v1 = vpack.c.bf16 %v398_v56, %v397_v51  ;;  %v564_v7 = vpack.c.bf16 %v370_v62, %v369_v61  ;;  %v4957_v51 = vld [vmem:[%s5388_s7 + $0x4dc] ss:$68 sps:$4 sm:$0xff]   ;;  %v581_v62 = vpack.c.bf16 %v404_v58, %v403_v57 }
  0x5f   : > { %2079 = vmatprep.mubr.bf16.mxu0 %v4909_v3  ;;  %4364 = vmatprep.subr.bf16.mxu0 %v574_v11  ;;  %v382_v3 = vld [vmem:[%s7156_s1 + $0x458] sm:$0xff]  ;;  %v4966_v61 = vld [vmem:[%s5388_s7 + $0x560] ss:$68 sps:$4 sm:$0xff]  }
  0x60   : > { %4285 = vmatpush3.bf16.msra.mxu1 %v551_v13  ;;  %v570_v11 = vpack.c.bf16 %v382_v3, %v381_v2  ;;  %v579_v13 = vpack.c.bf16 %v400_v6, %v399_v5  ;;  %v4963_v56 = vld [vmem:[%s5388_s7 + $0x18] ss:$68 sps:$4 sm:$0xff]   ;;  %v405_v2 = vld [vmem:[%s7156_s1 + $0x510] sm:$0xff]  ;;  %v424_v5 = vld [vmem:[%s7156_s1 + $0x5a8] sm:$0xff] }
  0x61   : > { %4286 = vmatprep.subr.bf16.mxu1 %v560_v15  ;;  %v556_v15 = vpack.c.bf16 %v354_v9, %v353_v8  ;;  %v406_v3 = vld [vmem:[%s7156_s1 + $0x518] sm:$0xff]  ;;  %v435_v6 = vld [vmem:[%s7156_s1 + $0x600] sm:$0xff] }
  0x62   : > { %4365 = vmatpush3.bf16.msra.mxu0 %v566_v18  ;;  %v4924_v18 = vld [vmem:[%s5388_s7 + $0x1a8] ss:$68 sps:$4 sm:$0xff]   ;;  %v4969_v8 = vld [vmem:[%s5388_s7 + $0x20] ss:$68 sps:$4 sm:$0xff]  }
  0x63   : > { %4366 = vmatprep.subr.bf16.mxu0 %v575_v23  ;;  %v571_v23 = vpack.c.bf16 %v384_v14, %v383_v12  ;;  %v4972_v9 = vld [vmem:[%s5388_s7 + $0xa0] ss:$68 sps:$4 sm:$0xff]   ;;  %v454_v12 = vld [vmem:[%s7156_s1 + $0x698] sm:$0xff]  ;;  %v4973_v14 = vld [vmem:[%s5388_s7 + $0x12c] ss:$68 sps:$4 sm:$0xff]  }
  0x64   : > { %4287 = vmatpush3.bf16.msra.mxu1 %v552_v29  ;;  %v452_v29 = vld [vmem:[%s7156_s1 + $0x688] sm:$0xff]  ;;  %v443_v58 = vld [vmem:[%s7156_s1 + $0x640] sm:$0xff] }
  0x65   : > { %1967 = vmatmul.mubr.bf16.gmra.mrb[28].mxu1 %v4911_v21  ;;  %2080 = vmatmul.mubr.bf16.gmra.mrb[28].mxu0 %v4912_v22  ;;  %v4925_v21 = vld [vmem:[%s5388_s7 + $0x2b4] ss:$68 sps:$4 sm:$0xff]  }
  0x66   : > { %1974 = vmatprep.mubr.bf16.mxu1 %v4913_v27  ;;  %2087 = vmatprep.mubr.bf16.mxu0 %v4915_v28  ;;  %v4927_v22 = vld [vmem:[%s5388_s7 + $0x234] ss:$68 sps:$4 sm:$0xff]   ;;  %v451_v28 = vld [vmem:[%s7156_s1 + $0x680] sm:$0xff] }
  0x67   : > { %4367 = vmatpush3.bf16.msra.mxu0 %v567_v35  ;;  %4288 = vmatprep.subr.bf16.mxu1 %v561_v38  ;;  %v386_v27 = vld [vmem:[%s7156_s1 + $0x478] sm:$0xff]  ;;  %v605_v31 = vpack.c.bf16 %v452_v29, %v451_v28  ;;  %v4937_v38 = vld [vmem:[%s5388_s7 + $0x3c4] ss:$68 sps:$4 sm:$0xff]  }
  0x68   : > { %4368 = vmatprep.subr.bf16.mxu0 %v576_v40  ;;  %4289 = vmatpush3.bf16.msra.mxu1 %v553_v41  ;;  %v572_v30 = vpack.c.bf16 %v386_v27, %v385_v26  ;;  %v4933_v35 = vld [vmem:[%s5388_s7 + $0x2bc] ss:$68 sps:$4 sm:$0xff]   ;;  %v456_v26 = vld [vmem:[%s7156_s1 + $0x6a8] sm:$0xff]  ;;  %v409_v27 = vld [vmem:[%s7156_s1 + $0x530] sm:$0xff] }
  0x69   : > { %4290 = vmatprep.subr.bf16.mxu1 %v562_v44  ;;  %v4941_v40 = vld [vmem:[%s5388_s7 + $0x3c0] ss:$68 sps:$4 sm:$0xff]   ;;  %v4947_v44 = vld [vmem:[%s5388_s7 + $0x448] ss:$68 sps:$4 sm:$0xff]   ;;  %v410_v29 = vld [vmem:[%s7156_s1 + $0x538] sm:$0xff] }
  0x6a   : > { %v4942_v41 = vld [vmem:[%s5388_s7 + $0x340] ss:$68 sps:$4 sm:$0xff]  }
  0x6b   : > { %4369 = vmatpush3.bf16.msra.mxu0 %v568_v48  ;;  %v4953_v48 = vld [vmem:[%s5388_s7 + $0x4d0] ss:$68 sps:$4 sm:$0xff]  }
  0x6c   : > { %4370 = vmatprep.subr.bf16.mxu0 %v577_v54  ;;  %4291 = vmatpush3.bf16.msra.mxu1 %v554_v55  ;;  %v4961_v54 = vld [vmem:[%s5388_s7 + $0x564] ss:$68 sps:$4 sm:$0xff]   ;;  %v4965_v55 = vld [vmem:[%s5388_s7 + $0x1c] ss:$68 sps:$4 sm:$0xff]  }
  0x6d   : > { %1975 = vmatmul.mubr.bf16.gmra.mrb[32].mxu1 %v4917_v46  ;;  %2088 = vmatmul.mubr.bf16.gmra.mrb[32].mxu0 %v4918_v47  ;;  %v4949_v46 = vld [vmem:[%s5388_s7 + $0x4d4] ss:$68 sps:$4 sm:$0xff]  }
  0x6e   : > { %1982 = vmatprep.mubr.bf16.mxu1 %v4919_v52  ;;  %2095 = vmatprep.mubr.bf16.mxu0 %v4921_v53  ;;  %v4951_v47 = vld [vmem:[%s5388_s7 + $0x454] ss:$68 sps:$4 sm:$0xff]  }
  0x6f   : > { %4371 = vmatpush3.bf16.msra.mxu0 %v569_v63  ;;  %4292 = vmatprep.subr.bf16.mxu1 %v563_v0  ;;  %v4959_v52 = vld [vmem:[%s5388_s7 + $0x558] ss:$68 sps:$4 sm:$0xff]   ;;  %v4967_v63 = vld [vmem:[%s5388_s7 + $0xa4] ss:$68 sps:$4 sm:$0xff]  }
  0x70   : > { %4372 = vmatprep.subr.bf16.mxu0 %v578_v1  ;;  %4293 = vmatpush3.bf16.msra.mxu1 %v555_v4  ;;  %v4960_v53 = vld [vmem:[%s5388_s7 + $0x4d8] ss:$68 sps:$4 sm:$0xff]   ;;  %v4971_v0 = vld [vmem:[%s5388_s7 + $0x24] ss:$68 sps:$4 sm:$0xff]   ;;  %v590_v1 = vpack.c.bf16 %v422_v60, %v421_v59 }
  0x71   : > { %4294 = vmatprep.subr.bf16.mxu1 %v564_v7  ;;  %v423_v4 = vld [vmem:[%s7156_s1 + $0x5a0] sm:$0xff]  ;;  %v582_v7 = vpack.c.bf16 %v406_v3, %v405_v2  ;;  %v444_v59 = vld [vmem:[%s7156_s1 + $0x648] sm:$0xff]  ;;  %v462_v2 = vld [vmem:[%s7156_s1 + $0x6d8] sm:$0xff] }
  0x72   : > { %v431_v60 = vld [vmem:[%s7156_s1 + $0x5e0] sm:$0xff] }
  0x73   : > { %4373 = vmatpush3.bf16.msra.mxu0 %v570_v11  ;;  %v453_v11 = vld [vmem:[%s7156_s1 + $0x690] sm:$0xff]  ;;  %v4985_v3 = vld [vmem:[%s5388_s7 + $0x23c] ss:$68 sps:$4 sm:$0xff]  }
  0x74   : > { %4374 = vmatprep.subr.bf16.mxu0 %v579_v13  ;;  %4295 = vmatpush3.bf16.msra.mxu1 %v556_v15  ;;  %v591_v13 = vpack.c.bf16 %v424_v5, %v423_v4  ;;  %v407_v15 = vld [vmem:[%s7156_s1 + $0x520] sm:$0xff] }
  0x75   : > { %1983 = vmatmul.mubr.bf16.gmra.mrb[36].mxu1 %v4923_v10  ;;  %2096 = vmatmul.mubr.bf16.gmra.mrb[36].mxu0 %v4924_v18  ;;  %v436_v10 = vld [vmem:[%s7156_s1 + $0x608] sm:$0xff]  ;;  %v438_v18 = vld [vmem:[%s7156_s1 + $0x618] sm:$0xff] }
  0x76   : > { %1990 = vmatprep.mubr.bf16.mxu1 %v4925_v21  ;;  %2103 = vmatprep.mubr.bf16.mxu0 %v4927_v22  ;;  %v597_v20 = vpack.c.bf16 %v436_v10, %v435_v6  ;;  %v425_v21 = vld [vmem:[%s7156_s1 + $0x5b0] sm:$0xff]  ;;  %v426_v22 = vld [vmem:[%s7156_s1 + $0x5b8] sm:$0xff] }
  0x77   : > { %4375 = vmatpush3.bf16.msra.mxu0 %v571_v23  ;;  %4444 = vmatprep.subr.bf16.mxu1 %v589_v24  ;;  %v606_v23 = vpack.c.bf16 %v454_v12, %v453_v11  ;;  %v455_v24 = vld [vmem:[%s7156_s1 + $0x6a0] sm:$0xff]  ;;  %v592_v28 = vpack.c.bf16 %v426_v22, %v425_v21  ;;  %v446_v10 = vld [vmem:[%s7156_s1 + $0x658] sm:$0xff]  ;;  %v433_v11 = vld [vmem:[%s7156_s1 + $0x5f0] sm:$0xff] }
  0x78   : > { %4376 = vmatprep.subr.bf16.mxu0 %v580_v25  ;;  %v583_v25 = vpack.c.bf16 %v408_v19, %v407_v15  ;;  %v4987_v4 = vld [vmem:[%s5388_s7 + $0x1bc] ss:$68 sps:$4 sm:$0xff]  }
  0x79   : > { %v434_v12 = vld [vmem:[%s7156_s1 + $0x5f8] sm:$0xff]  ;;  %v463_v15 = vld [vmem:[%s7156_s1 + $0x6e0] sm:$0xff] }
  0x7a   : > { %v596_v21 = vpack.c.bf16 %v434_v12, %v433_v11  ;;  %v447_v22 = vld [vmem:[%s7156_s1 + $0x660] sm:$0xff]  ;;  %v5032_v11 = vld [vmem:[%s5388_s7 + $0x570] ss:$68 sps:$4 sm:$0xff]  }
  0x7b   : > { %4377 = vmatpush3.bf16.msra.mxu0 %v572_v30  ;;  %v598_v30 = vpack.c.bf16 %v438_v18, %v437_v17  ;;  %v417_v17 = vld [vmem:[%s7156_s1 + $0x570] sm:$0xff]  ;;  %v418_v18 = vld [vmem:[%s7156_s1 + $0x578] sm:$0xff] }
  0x7c   : > { %4526 = vmatprep.subr.bf16.mxu0 %v605_v31  ;;  %v439_v31 = vld [vmem:[%s7156_s1 + $0x620] sm:$0xff] }
  0x7d   : > { %1991 = vmatmul.mubr.bf16.gmra.mrb[40].mxu1 %v4929_v32  ;;  %2104 = vmatmul.mubr.bf16.gmra.mrb[40].mxu0 %v4930_v33  ;;  %v440_v32 = vld [vmem:[%s7156_s1 + $0x628] sm:$0xff]  ;;  %v427_v33 = vld [vmem:[%s7156_s1 + $0x5c0] sm:$0xff] }
  0x7e   : > { %1998 = vmatprep.mubr.bf16.mxu1 %v4931_v34  ;;  %2111 = vmatprep.mubr.bf16.mxu0 %v4933_v35  ;;  %v428_v34 = vld [vmem:[%s7156_s1 + $0x5c8] sm:$0xff] }
  0x7f   : > { %v4977_v35 = vld [vmem:[%s5388_s7 + $0x128] ss:$68 sps:$4 sm:$0xff]  }
  0x85   : > { %1999 = vmatmul.mubr.bf16.gmra.mrb[44].mxu1 %v4935_v36  ;;  %2112 = vmatmul.mubr.bf16.gmra.mrb[44].mxu0 %v4936_v37  ;;  %v4978_v36 = vld [vmem:[%s5388_s7 + $0xa8] ss:$68 sps:$4 sm:$0xff]   ;;  %v607_v37 = vpack.c.bf16 %v456_v26, %v455_v24  ;;  %v483_v24 = vld [vmem:[%s7156_s1 + $0x780] sm:$0xff]  ;;  %v4989_v26 = vld [vmem:[%s5388_s7 + $0x238] ss:$68 sps:$4 sm:$0xff]  }
  0x86   : > { %2006 = vmatprep.mubr.bf16.mxu1 %v4937_v38  ;;  %2119 = vmatprep.mubr.bf16.mxu0 %v4939_v39  ;;  %v457_v38 = vld [vmem:[%s7156_s1 + $0x6b0] sm:$0xff]  ;;  %v458_v39 = vld [vmem:[%s7156_s1 + $0x6b8] sm:$0xff] }
  0x8d   : > { %2007 = vmatmul.mubr.bf16.gmra.mrb[48].mxu1 %v4941_v40  ;;  %2120 = vmatmul.mubr.bf16.gmra.mrb[48].mxu0 %v4942_v41  ;;  %v411_v40 = vld [vmem:[%s7156_s1 + $0x540] sm:$0xff]  ;;  %v412_v41 = vld [vmem:[%s7156_s1 + $0x548] sm:$0xff] }
  0x8e   : > { %2014 = vmatprep.mubr.bf16.mxu1 %v4943_v42  ;;  %2127 = vmatprep.mubr.bf16.mxu0 %v4945_v43  ;;  %v4979_v42 = vld [vmem:[%s5388_s7 + $0x1b4] ss:$68 sps:$4 sm:$0xff]  }
  0x8f   : > { %v4981_v43 = vld [vmem:[%s5388_s7 + $0x134] ss:$68 sps:$4 sm:$0xff]  }
  0x95   : > { %2015 = vmatmul.mubr.bf16.gmra.mrb[52].mxu1 %v4947_v44  ;;  %2128 = vmatmul.mubr.bf16.gmra.mrb[52].mxu0 %v4948_v45  ;;  %v584_v44 = vpack.c.bf16 %v410_v29, %v409_v27  ;;  %v441_v45 = vld [vmem:[%s7156_s1 + $0x630] sm:$0xff]  ;;  %v4990_v27 = vld [vmem:[%s5388_s7 + $0x1b8] ss:$68 sps:$4 sm:$0xff]  }
  0x96   : > { %2022 = vmatprep.mubr.bf16.mxu1 %v4949_v46  ;;  %2135 = vmatprep.mubr.bf16.mxu0 %v4951_v47  ;;  %v442_v46 = vld [vmem:[%s7156_s1 + $0x638] sm:$0xff]  ;;  %v429_v47 = vld [vmem:[%s7156_s1 + $0x5d0] sm:$0xff] }
  0x97   : > { %v465_v29 = vld [vmem:[%s7156_s1 + $0x6f0] sm:$0xff] }
  0x9d   : > { %2023 = vmatmul.mubr.bf16.gmra.mrb[56].mxu1 %v4953_v48  ;;  %2136 = vmatmul.mubr.bf16.gmra.mrb[56].mxu0 %v4954_v49  ;;  %v430_v48 = vld [vmem:[%s7156_s1 + $0x5d8] sm:$0xff]  ;;  %v599_v49 = vpack.c.bf16 %v440_v32, %v439_v31  ;;  %v588_v32 = vpack.c.bf16 %v418_v18, %v417_v17 }
  0x9e   : > { %2030 = vmatprep.mubr.bf16.mxu1 %v4955_v50  ;;  %2143 = vmatprep.mubr.bf16.mxu0 %v4957_v51  ;;  %v593_v50 = vpack.c.bf16 %v428_v34, %v427_v33  ;;  %v459_v51 = vld [vmem:[%s7156_s1 + $0x6c0] sm:$0xff]  ;;  %v594_v57 = vpack.c.bf16 %v430_v48, %v429_v47  ;;  %v5002_v47 = vld [vmem:[%s5388_s7 + $0x2c8] ss:$68 sps:$4 sm:$0xff]   ;;  %v5003_v48 = vld [vmem:[%s5388_s7 + $0x3d4] ss:$68 sps:$4 sm:$0xff]  }
  0x9f   : > { %v4991_v33 = vld [vmem:[%s5388_s7 + $0x2c4] ss:$68 sps:$4 sm:$0xff]   ;;  %v5033_v17 = vld [vmem:[%s5388_s7 + $0xb4] ss:$68 sps:$4 sm:$0xff]  }
  0xa0   : > { %v4993_v34 = vld [vmem:[%s5388_s7 + $0x244] ss:$68 sps:$4 sm:$0xff]  }
  0xa5   : > { %2031 = vmatmul.mubr.bf16.gmra.mrb[60].mxu1 %v4959_v52  ;;  %2144 = vmatmul.mubr.bf16.gmra.mrb[60].mxu0 %v4960_v53  ;;  %v460_v52 = vld [vmem:[%s7156_s1 + $0x6c8] sm:$0xff]  ;;  %v413_v53 = vld [vmem:[%s7156_s1 + $0x550] sm:$0xff] }
  0xa6   : > { %2151 = vmatprep.mubr.bf16.mxu0 %v4961_v54  ;;  %2192 = vmatprep.mubr.bf16.mxu1 %v4965_v55  ;;  %v414_v54 = vld [vmem:[%s7156_s1 + $0x558] sm:$0xff]  ;;  %v608_v55 = vpack.c.bf16 %v458_v39, %v457_v38  ;;  %v609_v5 = vpack.c.bf16 %v460_v52, %v459_v51  ;;  %v449_v38 = vld [vmem:[%s7156_s1 + $0x670] sm:$0xff] }
  0xa7   : > { %v586_v6 = vpack.c.bf16 %v414_v54, %v413_v53  ;;  %v450_v39 = vld [vmem:[%s7156_s1 + $0x678] sm:$0xff]  ;;  %v5008_v51 = vld [vmem:[%s5388_s7 + $0x350] ss:$68 sps:$4 sm:$0xff]  }
  0xa8   : > { %v5009_v52 = vld [vmem:[%s5388_s7 + $0x45c] ss:$68 sps:$4 sm:$0xff]  }
  0xa9   : > { %v5011_v53 = vld [vmem:[%s5388_s7 + $0x3dc] ss:$68 sps:$4 sm:$0xff]  }
  0xaa   : > { %v5013_v54 = vld [vmem:[%s5388_s7 + $0x458] ss:$68 sps:$4 sm:$0xff]  }
  0xad   : > { %2152 = vmatmul.mubr.bf16.gmra.mrb[64].mxu0 %v4966_v61  ;;  %2193 = vmatmul.mubr.bf16.vlgmr.msra.gmra.mrb[64].mxu1 %v4963_v56  ;;  %v585_v56 = vpack.c.bf16 %v412_v41, %v411_v40  ;;  %v432_v61 = vld [vmem:[%s7156_s1 + $0x5e8] sm:$0xff]  ;;  %v4995_v40 = vld [vmem:[%s5388_s7 + $0x2c0] ss:$68 sps:$4 sm:$0xff]  }
  0xae   : > { %4445 = vmatpush3.bf16.msra.mxu1 %v581_v62  ;;  %2200 = vmatprep.mubr.bf16.mxu1 %v4967_v63  ;;  %v4983_v62 = vld [vmem:[%s5388_s7 + $0x1b0] ss:$68 sps:$4 sm:$0xff]   ;;  %v4996_v41 = vld [vmem:[%s5388_s7 + $0x240] ss:$68 sps:$4 sm:$0xff]  }
  0xaf   : > { %2313 = vmatprep.mubr.bf16.mxu0 %v4971_v0  ;;  %4446 = vmatprep.subr.bf16.mxu1 %v590_v1  ;;  %v4984_v63 = vld [vmem:[%s5388_s7 + $0x130] ss:$68 sps:$4 sm:$0xff]   ;;  %v600_v0 = vpack.c.bf16 %v442_v46, %v441_v45  ;;  %v5282_v45 = vmov 0.0   ;;  %v5001_v46 = vld [vmem:[%s5388_s7 + $0x348] ss:$68 sps:$4 sm:$0xff]  }
  0xb0   : > { %v461_v1 = vld [vmem:[%s7156_s1 + $0x6d0] sm:$0xff] }
  0xb1   : > { %v610_v19 = vpack.c.bf16 %v462_v2, %v461_v1  ;;  %v5031_v1 = vld [vmem:[%s5388_s7 + $0x2c] ss:$68 sps:$4 sm:$0xff]   ;;  %v467_v2 = vld [vmem:[%s7156_s1 + $0x700] sm:$0xff] }
  0xb2   : > { %4447 = vmatpush3.bf16.msra.mxu1 %v582_v7  ;;  %v415_v7 = vld [vmem:[%s7156_s1 + $0x560] sm:$0xff] }
  0xb3   : > { %4448 = vmatprep.subr.bf16.mxu1 %v591_v13  ;;  %v601_v13 = vpack.c.bf16 %v444_v59, %v443_v58  ;;  %v5019_v58 = vld [vmem:[%s5388_s7 + $0x4e0] ss:$68 sps:$4 sm:$0xff]  }
  0xb4   : > { %v5020_v59 = vld [vmem:[%s5388_s7 + $0x460] ss:$68 sps:$4 sm:$0xff]  }
  0xb5   : > { %2201 = vmatmul.mubr.bf16.gmra.mrb[68].mxu1 %v4972_v9  ;;  %2314 = vmatmul.mubr.bf16.vlgmr.msra.gmra.mrb[68].mxu0 %v4969_v8  ;;  %v416_v8 = vld [vmem:[%s7156_s1 + $0x568] sm:$0xff]  ;;  %v445_v9 = vld [vmem:[%s7156_s1 + $0x650] sm:$0xff] }
  0xb6   : > { %4527 = vmatpush3.bf16.msra.mxu0 %v597_v20  ;;  %2208 = vmatprep.mubr.bf16.mxu1 %v4973_v14  ;;  %v595_v14 = vpack.c.bf16 %v432_v61, %v431_v60  ;;  %v587_v20 = vpack.c.bf16 %v416_v8, %v415_v7  ;;  %v5021_v60 = vld [vmem:[%s5388_s7 + $0x56c] ss:$68 sps:$4 sm:$0xff]   ;;  %v486_v7 = vld [vmem:[%s7156_s1 + $0x798] sm:$0xff] }
  0xb7   : > { %2321 = vmatprep.mubr.bf16.mxu0 %v4975_v16  ;;  %4528 = vmatprep.subr.bf16.mxu0 %v606_v23  ;;  %v464_v16 = vld [vmem:[%s7156_s1 + $0x6e8] sm:$0xff] }
  0xb8   : > { %4449 = vmatpush3.bf16.msra.mxu1 %v583_v25  ;;  %v448_v23 = vld [vmem:[%s7156_s1 + $0x668] sm:$0xff]  ;;  %v611_v31 = vpack.c.bf16 %v464_v16, %v463_v15 }
  0xb9   : > { %4450 = vmatprep.subr.bf16.mxu1 %v592_v28  ;;  %v484_v25 = vld [vmem:[%s7156_s1 + $0x788] sm:$0xff]  ;;  %v602_v28 = vpack.c.bf16 %v446_v10, %v445_v9 }
  0xba   : > { %4529 = vmatpush3.bf16.msra.mxu0 %v598_v30  ;;  %v466_v30 = vld [vmem:[%s7156_s1 + $0x6f8] sm:$0xff]  ;;  %v5023_v61 = vld [vmem:[%s5388_s7 + $0x4ec] ss:$68 sps:$4 sm:$0xff]  }
  0xbb   : > { %4530 = vmatprep.subr.bf16.mxu0 %v607_v37  ;;  %v612_v37 = vpack.c.bf16 %v466_v30, %v465_v29  ;;  %v5029_v10 = vld [vmem:[%s5388_s7 + $0x28] ss:$68 sps:$4 sm:$0xff]   ;;  %v499_v29 = vld [vmem:[%s7156_s1 + $0x800] sm:$0xff] }
  0xbc   : > { %4451 = vmatpush3.bf16.msra.mxu1 %v584_v44  ;;  %v4999_v44 = vld [vmem:[%s5388_s7 + $0x2cc] ss:$68 sps:$4 sm:$0xff]  }
  0xbd   : > { %2209 = vmatmul.mubr.bf16.gmra.mrb[72].mxu1 %v4977_v35  ;;  %2322 = vmatmul.mubr.bf16.gmra.mrb[72].mxu0 %v4978_v36  ;;  %v603_v35 = vpack.c.bf16 %v448_v23, %v447_v22  ;;  %v621_v36 = vpack.c.bf16 %v484_v25, %v483_v24  ;;  %v469_v22 = vld [vmem:[%s7156_s1 + $0x710] sm:$0xff]  ;;  %v470_v23 = vld [vmem:[%s7156_s1 + $0x718] sm:$0xff]  ;;  %v500_v30 = vld [vmem:[%s7156_s1 + $0x808] sm:$0xff] }
  0xbe   : > { %2216 = vmatprep.mubr.bf16.mxu1 %v4979_v42  ;;  %2329 = vmatprep.mubr.bf16.mxu0 %v4981_v43  ;;  %v604_v42 = vpack.c.bf16 %v450_v39, %v449_v38  ;;  %v4997_v43 = vld [vmem:[%s5388_s7 + $0x34c] ss:$68 sps:$4 sm:$0xff]  }
  0xbf   : > { %4531 = vmatpush3.bf16.msra.mxu0 %v599_v49  ;;  %4452 = vmatprep.subr.bf16.mxu1 %v593_v50  ;;  %v5005_v49 = vld [vmem:[%s5388_s7 + $0x354] ss:$68 sps:$4 sm:$0xff]  }
  0xc0   : > { %4532 = vmatprep.subr.bf16.mxu0 %v608_v55  ;;  %4453 = vmatpush3.bf16.msra.mxu1 %v585_v56  ;;  %v5007_v50 = vld [vmem:[%s5388_s7 + $0x3d0] ss:$68 sps:$4 sm:$0xff]   ;;  %v5014_v55 = vld [vmem:[%s5388_s7 + $0x3d8] ss:$68 sps:$4 sm:$0xff]   ;;  %v5015_v56 = vld [vmem:[%s5388_s7 + $0x4e4] ss:$68 sps:$4 sm:$0xff]  }
  0xc1   : > { %4454 = vmatprep.subr.bf16.mxu1 %v594_v57  ;;  %v5017_v57 = vld [vmem:[%s5388_s7 + $0x464] ss:$68 sps:$4 sm:$0xff]   ;;  %v5038_v39 = vld [vmem:[%s5388_s7 + $0xb0] ss:$68 sps:$4 sm:$0xff]  }
  0xc3   : > { %4533 = vmatpush3.bf16.msra.mxu0 %v600_v0  ;;  %v5027_v0 = vld [vmem:[%s5388_s7 + $0x574] ss:$68 sps:$4 sm:$0xff]  }
  0xc4   : > { %4534 = vmatprep.subr.bf16.mxu0 %v609_v5  ;;  %4455 = vmatpush3.bf16.msra.mxu1 %v586_v6  ;;  %v485_v6 = vld [vmem:[%s7156_s1 + $0x790] sm:$0xff] }
  0xc5   : > { %2217 = vmatmul.mubr.bf16.gmra.mrb[76].mxu1 %v4983_v62  ;;  %2330 = vmatmul.mubr.bf16.gmra.mrb[76].mxu0 %v4984_v63  ;;  %v5025_v62 = vld [vmem:[%s5388_s7 + $0x568] ss:$68 sps:$4 sm:$0xff]  }
  0xc6   : > { %2224 = vmatprep.mubr.bf16.mxu1 %v4985_v3  ;;  %2337 = vmatprep.mubr.bf16.mxu0 %v4987_v4  ;;  %v5026_v63 = vld [vmem:[%s5388_s7 + $0x4e8] ss:$68 sps:$4 sm:$0xff]  }
  0xc7   : > { %4535 = vmatpush3.bf16.msra.mxu0 %v601_v13  ;;  %4456 = vmatprep.subr.bf16.mxu1 %v595_v14  ;;  %v468_v3 = vld [vmem:[%s7156_s1 + $0x708] sm:$0xff] }
  0xc8   : > { %4536 = vmatprep.subr.bf16.mxu0 %v610_v19  ;;  %4457 = vmatpush3.bf16.msra.mxu1 %v587_v20  ;;  %v613_v16 = vpack.c.bf16 %v468_v3, %v467_v2  ;;  %v5037_v20 = vld [vmem:[%s5388_s7 + $0x34] ss:$68 sps:$4 sm:$0xff]   ;;  %v476_v2 = vld [vmem:[%s7156_s1 + $0x748] sm:$0xff] }
  0xc9   : > { %4458 = vmatprep.subr.bf16.mxu1 %v596_v21  ;;  %v622_v21 = vpack.c.bf16 %v486_v7, %v485_v6  ;;  %v493_v6 = vld [vmem:[%s7156_s1 + $0x7d0] sm:$0xff]  ;;  %v494_v7 = vld [vmem:[%s7156_s1 + $0x7d8] sm:$0xff] }
  0xcb   : > { %4537 = vmatpush3.bf16.msra.mxu0 %v602_v28  ;;  %v614_v28 = vpack.c.bf16 %v470_v23, %v469_v22  ;;  %v477_v22 = vld [vmem:[%s7156_s1 + $0x750] sm:$0xff]  ;;  %v478_v23 = vld [vmem:[%s7156_s1 + $0x758] sm:$0xff] }
  0xcc   : > { %4538 = vmatprep.subr.bf16.mxu0 %v611_v31  ;;  %4459 = vmatpush3.bf16.msra.mxu1 %v588_v32 }
  0xcd   : > { %2225 = vmatmul.mubr.bf16.gmra.mrb[80].mxu1 %v4989_v26  ;;  %2338 = vmatmul.mubr.bf16.gmra.mrb[80].mxu0 %v4990_v27  ;;  %v487_v26 = vld [vmem:[%s7156_s1 + $0x7a0] sm:$0xff]  ;;  %v488_v27 = vld [vmem:[%s7156_s1 + $0x7a8] sm:$0xff] }
  0xce   : > { %2232 = vmatprep.mubr.bf16.mxu1 %v4991_v33  ;;  %2345 = vmatprep.mubr.bf16.mxu0 %v4993_v34  ;;  %v623_v31 = vpack.c.bf16 %v488_v27, %v487_v26  ;;  %v5035_v34 = vld [vmem:[%s5388_s7 + $0x30] ss:$68 sps:$4 sm:$0xff]   ;;  %v495_v26 = vld [vmem:[%s7156_s1 + $0x7e0] sm:$0xff]  ;;  %v496_v27 = vld [vmem:[%s7156_s1 + $0x7e8] sm:$0xff] }
  0xcf   : > { %4539 = vmatpush3.bf16.msra.mxu0 %v603_v35  ;;  %4608 = vmatprep.subr.bf16.mxu1 %v621_v36  ;;  %v471_v35 = vld [vmem:[%s7156_s1 + $0x720] sm:$0xff]  ;;  %v472_v36 = vld [vmem:[%s7156_s1 + $0x728] sm:$0xff] }
  0xd0   : > { %4540 = vmatprep.subr.bf16.mxu0 %v612_v37 }
  0xd3   : > { %4541 = vmatpush3.bf16.msra.mxu0 %v604_v42 }
  0xd4   : > { %4702 = vmatprep.subr.bf16.mxu0 %v5282_v45 }
  0xd5   : > { %2233 = vmatmul.mubr.bf16.gmra.mrb[84].mxu1 %v4995_v40  ;;  %2346 = vmatmul.mubr.bf16.gmra.mrb[84].mxu0 %v4996_v41  ;;  %v489_v40 = vld [vmem:[%s7156_s1 + $0x7b0] sm:$0xff]  ;;  %v490_v41 = vld [vmem:[%s7156_s1 + $0x7b8] sm:$0xff] }
  0xd6   : > { %2240 = vmatprep.mubr.bf16.mxu1 %v4997_v43  ;;  %2353 = vmatprep.mubr.bf16.mxu0 %v4999_v44 }
  0xdd   : > { %2241 = vmatmul.mubr.bf16.gmra.mrb[88].mxu1 %v5001_v46  ;;  %2354 = vmatmul.mubr.bf16.gmra.mrb[88].mxu0 %v5002_v47  ;;  %v629_v47 = vpack.c.bf16 %v500_v30, %v499_v29 }
  0xde   : > { %2248 = vmatprep.mubr.bf16.mxu1 %v5003_v48  ;;  %2361 = vmatprep.mubr.bf16.mxu0 %v5005_v49  ;;  %v5039_v48 = vld [vmem:[%s5388_s7 + $0x13c] ss:$68 sps:$4 sm:$0xff]  }
  0xe5   : > { %2249 = vmatmul.mubr.bf16.gmra.mrb[92].mxu1 %v5007_v50  ;;  %2362 = vmatmul.mubr.bf16.gmra.mrb[92].mxu0 %v5008_v51  ;;  %v5041_v51 = vld [vmem:[%s5388_s7 + $0xbc] ss:$68 sps:$4 sm:$0xff]  }
  0xe6   : > { %2256 = vmatprep.mubr.bf16.mxu1 %v5009_v52  ;;  %2369 = vmatprep.mubr.bf16.mxu0 %v5011_v53  ;;  %v615_v52 = vpack.c.bf16 %v472_v36, %v471_v35 }
  0xed   : > { %2257 = vmatmul.mubr.bf16.gmra.mrb[96].mxu1 %v5013_v54  ;;  %2370 = vmatmul.mubr.bf16.gmra.mrb[96].mxu0 %v5014_v55  ;;  %v624_v55 = vpack.c.bf16 %v490_v41, %v489_v40 }
  0xee   : > { %2264 = vmatprep.mubr.bf16.mxu1 %v5015_v56  ;;  %2377 = vmatprep.mubr.bf16.mxu0 %v5017_v57  ;;  %v473_v56 = vld [vmem:[%s7156_s1 + $0x730] sm:$0xff]  ;;  %v474_v57 = vld [vmem:[%s7156_s1 + $0x738] sm:$0xff] }
  0xf5   : > { %2265 = vmatmul.mubr.bf16.gmra.mrb[100].mxu1 %v5019_v58  ;;  %2378 = vmatmul.mubr.bf16.gmra.mrb[100].mxu0 %v5020_v59  ;;  %v491_v58 = vld [vmem:[%s7156_s1 + $0x7c0] sm:$0xff]  ;;  %v492_v59 = vld [vmem:[%s7156_s1 + $0x7c8] sm:$0xff] }
  0xf6   : > { %2272 = vmatprep.mubr.bf16.mxu1 %v5021_v60  ;;  %2385 = vmatprep.mubr.bf16.mxu0 %v5023_v61  ;;  %v616_v60 = vpack.c.bf16 %v474_v57, %v473_v56  ;;  %v481_v57 = vld [vmem:[%s7156_s1 + $0x770] sm:$0xff] }
  0xfd   : > { %2273 = vmatmul.mubr.bf16.gmra.mrb[104].mxu1 %v5025_v62  ;;  %2386 = vmatmul.mubr.bf16.gmra.mrb[104].mxu0 %v5026_v63  ;;  %v5043_v63 = vld [vmem:[%s5388_s7 + $0x138] ss:$68 sps:$4 sm:$0xff]  }
  0xfe   : > { %2393 = vmatprep.mubr.bf16.mxu0 %v5027_v0  ;;  %2434 = vmatprep.mubr.bf16.mxu1 %v5031_v1  ;;  %v625_v0 = vpack.c.bf16 %v492_v59, %v491_v58  ;;  %v475_v1 = vld [vmem:[%s7156_s1 + $0x740] sm:$0xff]  ;;  %v482_v58 = vld [vmem:[%s7156_s1 + $0x778] sm:$0xff] }
  0xff   : > { %v620_v59 = vpack.c.bf16 %v482_v58, %v481_v57  ;;  %v5071_v57 = vld [vmem:[%s5388_s7 + $0x364] ss:$68 sps:$4 sm:$0xff]  }
 0x100   : > { %v4050_v4 = vpop.f32.mrb[0].mxu0  ;;  %v4086_v5 = vpop.f32.mrb[0].mxu1 }
 0x101   : > { %v4051_v8 = vpop.f32.mrb[1].mxu0  ;;  %v4087_v9 = vpop.f32.mrb[1].mxu1 }
 0x102   : > { %v6151_v12 = vadd.f32 %v4051_v8, %v4050_v4  ;;  %v4053_v13 = vpop.f32.mrb[2].mxu0  ;;  %v6153_v14 = vadd.f32 %v4087_v9, %v4086_v5  ;;  %v4089_v15 = vpop.f32.mrb[2].mxu1  ;;  %v5044_v5 = vld [vmem:[%s5388_s7 + $0xb8] ss:$68 sps:$4 sm:$0xff]  }
 0x103   : > { %v4054_v18 = vpop.f32.mrb[3].mxu0  ;;  %v4090_v19 = vpop.f32.mrb[3].mxu1 }
 0x104   : > { %v6163_v24 = vadd.f32 %v4054_v18, %v4053_v13  ;;  %v6165_v25 = vadd.f32 %v4090_v19, %v4089_v15  ;;  %v5045_v13 = vld [vmem:[%s5388_s7 + $0x1c4] ss:$68 sps:$4 sm:$0xff]   ;;  %v617_v18 = vpack.c.bf16 %v476_v2, %v475_v1 }
 0x105   : > { %2394 = vmatmul.mubr.bf16.gmra.mrb[108].mxu0 %v5032_v11  ;;  %2435 = vmatmul.mubr.bf16.vlgmr.msra.gmra.mrb[108].mxu1 %v5029_v10  ;;  %v5047_v15 = vld [vmem:[%s5388_s7 + $0x144] ss:$68 sps:$4 sm:$0xff]  }
 0x106   : > { %4609 = vmatpush3.bf16.msra.mxu1 %v613_v16  ;;  %2442 = vmatprep.mubr.bf16.mxu1 %v5033_v17  ;;  %v5056_v1 = vld [vmem:[%s5388_s7 + $0x1c8] ss:$68 sps:$4 sm:$0xff]  }
 0x107   : > { %2555 = vmatprep.mubr.bf16.mxu0 %v5037_v20  ;;  %4610 = vmatprep.subr.bf16.mxu1 %v622_v21  ;;  %v626_v21 = vpack.c.bf16 %v494_v7, %v493_v6  ;;  %v5057_v6 = vld [vmem:[%s5388_s7 + $0x2d4] ss:$68 sps:$4 sm:$0xff]  }
 0x108   : > { %v4056_v32 = vpop.f32.mrb[4].mxu0  ;;  %v4092_v33 = vpop.f32.mrb[4].mxu1  ;;  %v5059_v7 = vld [vmem:[%s5388_s7 + $0x254] ss:$68 sps:$4 sm:$0xff]  }
 0x109   : > { %v4057_v37 = vpop.f32.mrb[5].mxu0  ;;  %v4093_v38 = vpop.f32.mrb[5].mxu1 }
 0x10a   : > { %v6193_v42 = vadd.f32 %v4057_v37, %v4056_v32  ;;  %v4059_v43 = vpop.f32.mrb[6].mxu0  ;;  %v6195_v44 = vadd.f32 %v4093_v38, %v4092_v33  ;;  %v4095_v46 = vpop.f32.mrb[6].mxu1  ;;  %4611 = vmatpush3.bf16.msra.mxu1 %v614_v28  ;;  %v618_v28 = vpack.c.bf16 %v478_v23, %v477_v22  ;;  %v627_v32 = vpack.c.bf16 %v496_v27, %v495_v26  ;;  %v479_v33 = vld [vmem:[%s7156_s1 + $0x760] sm:$0xff]  ;;  %v497_v38 = vld [vmem:[%s7156_s1 + $0x7f0] sm:$0xff] }
 0x10b   : > { %v4060_v49 = vpop.f32.mrb[7].mxu0  ;;  %v4096_v50 = vpop.f32.mrb[7].mxu1  ;;  %4612 = vmatprep.subr.bf16.mxu1 %v623_v31  ;;  %v5049_v31 = vld [vmem:[%s5388_s7 + $0x1c0] ss:$68 sps:$4 sm:$0xff]   ;;  %v5061_v22 = vld [vmem:[%s5388_s7 + $0x2d0] ss:$68 sps:$4 sm:$0xff]  }
 0x10c   : > { %v6199_v53 = vadd.f32 %v4060_v49, %v4059_v43  ;;  %v6201_v54 = vadd.f32 %v4096_v50, %v4095_v46  ;;  %v5050_v37 = vld [vmem:[%s5388_s7 + $0x140] ss:$68 sps:$4 sm:$0xff]   ;;  %v5062_v23 = vld [vmem:[%s5388_s7 + $0x250] ss:$68 sps:$4 sm:$0xff]  }
 0x10d   : > { %2443 = vmatmul.mubr.bf16.gmra.mrb[112].mxu1 %v5038_v39  ;;  %2556 = vmatmul.mubr.bf16.vlgmr.msra.gmra.mrb[112].mxu0 %v5035_v34  ;;  %v480_v34 = vld [vmem:[%s7156_s1 + $0x768] sm:$0xff]  ;;  %v498_v39 = vld [vmem:[%s7156_s1 + $0x7f8] sm:$0xff] }
 0x10e   : > { %4703 = vmatpush3.bf16.msra.mxu0 %v629_v47  ;;  %2450 = vmatprep.mubr.bf16.mxu1 %v5039_v48  ;;  %v5051_v47 = vld [vmem:[%s5388_s7 + $0x24c] ss:$68 sps:$4 sm:$0xff]   ;;  %v628_v56 = vpack.c.bf16 %v498_v39, %v497_v38 }
 0x10f   : > { %2563 = vmatprep.mubr.bf16.mxu0 %v5041_v51  ;;  %4613 = vmatpush3.bf16.msra.mxu1 %v615_v52  ;;  %v5053_v48 = vld [vmem:[%s5388_s7 + $0x1cc] ss:$68 sps:$4 sm:$0xff]   ;;  %v619_v51 = vpack.c.bf16 %v480_v34, %v479_v33 }
 0x110   : > { %v4062_v61 = vpop.f32.mrb[8].mxu0  ;;  %v4098_v62 = vpop.f32.mrb[8].mxu1  ;;  %4614 = vmatprep.subr.bf16.mxu1 %v624_v55 }
 0x111   : > { %v4063_v3 = vpop.f32.mrb[9].mxu0  ;;  %v4099_v4 = vpop.f32.mrb[9].mxu1 }
 0x112   : > { %v6229_v8 = vadd.f32 %v4063_v3, %v4062_v61  ;;  %v4065_v9 = vpop.f32.mrb[10].mxu0  ;;  %v6231_v10 = vadd.f32 %v4099_v4, %v4098_v62  ;;  %v4101_v11 = vpop.f32.mrb[10].mxu1 }
 0x113   : > { %v4066_v16 = vpop.f32.mrb[11].mxu0  ;;  %v4102_v17 = vpop.f32.mrb[11].mxu1  ;;  %4615 = vmatpush3.bf16.msra.mxu1 %v616_v60 }
 0x114   : > { %v6235_v19 = vadd.f32 %v4066_v16, %v4065_v9  ;;  %v6237_v20 = vadd.f32 %v4102_v17, %v4101_v11  ;;  %4616 = vmatprep.subr.bf16.mxu1 %v625_v0  ;;  %v5055_v0 = vld [vmem:[%s5388_s7 + $0x248] ss:$68 sps:$4 sm:$0xff]  }
 0x115   : > { %2451 = vmatmul.mubr.bf16.gmra.mrb[116].mxu1 %v5043_v63  ;;  %2564 = vmatmul.mubr.bf16.gmra.mrb[116].mxu0 %v5044_v5 }
 0x116   : > { %2458 = vmatprep.mubr.bf16.mxu1 %v5045_v13  ;;  %2571 = vmatprep.mubr.bf16.mxu0 %v5047_v15 }
 0x117   : > { %4617 = vmatpush3.bf16.msra.mxu1 %v617_v18 }
 0x118   : > { %v4068_v29 = vpop.f32.mrb[12].mxu0  ;;  %v4104_v30 = vpop.f32.mrb[12].mxu1  ;;  %4618 = vmatprep.subr.bf16.mxu1 %v626_v21 }
 0x119   : > { %v4069_v35 = vpop.f32.mrb[13].mxu0  ;;  %v4105_v36 = vpop.f32.mrb[13].mxu1 }
 0x11a   : > { %v6265_v40 = vadd.f32 %v4069_v35, %v4068_v29  ;;  %v4071_v41 = vpop.f32.mrb[14].mxu0  ;;  %v6267_v43 = vadd.f32 %v4105_v36, %v4104_v30  ;;  %v4107_v46 = vpop.f32.mrb[14].mxu1  ;;  %v5063_v30 = vld [vmem:[%s5388_s7 + $0x35c] ss:$68 sps:$4 sm:$0xff]  }
 0x11b   : > { %v4072_v49 = vpop.f32.mrb[15].mxu0  ;;  %v4108_v50 = vpop.f32.mrb[15].mxu1  ;;  %4619 = vmatpush3.bf16.msra.mxu1 %v618_v28 }
 0x11c   : > { %v6271_v52 = vadd.f32 %v4072_v49, %v4071_v41  ;;  %v6273_v55 = vadd.f32 %v4108_v50, %v4107_v46  ;;  %4620 = vmatprep.subr.bf16.mxu1 %v627_v32 }
 0x11d   : > { %2459 = vmatmul.mubr.bf16.gmra.mrb[120].mxu1 %v5049_v31  ;;  %2572 = vmatmul.mubr.bf16.gmra.mrb[120].mxu0 %v5050_v37  ;;  %v5065_v31 = vld [vmem:[%s5388_s7 + $0x2dc] ss:$68 sps:$4 sm:$0xff]  }
 0x11e   : > { %2466 = vmatprep.mubr.bf16.mxu1 %v5051_v47  ;;  %2579 = vmatprep.mubr.bf16.mxu0 %v5053_v48  ;;  %v5067_v47 = vld [vmem:[%s5388_s7 + $0x358] ss:$68 sps:$4 sm:$0xff]  }
 0x11f   : > { %4621 = vmatpush3.bf16.msra.mxu1 %v619_v51  ;;  %v5068_v48 = vld [vmem:[%s5388_s7 + $0x2d8] ss:$68 sps:$4 sm:$0xff]  }
 0x120   : > { %v4074_v60 = vpop.f32.mrb[16].mxu0  ;;  %v4110_v61 = vpop.f32.mrb[16].mxu1  ;;  %4622 = vmatprep.subr.bf16.mxu1 %v628_v56  ;;  %v5069_v56 = vld [vmem:[%s5388_s7 + $0x3e4] ss:$68 sps:$4 sm:$0xff]  }
 0x121   : > { %v4075_v62 = vpop.f32.mrb[17].mxu0  ;;  %v4111_v63 = vpop.f32.mrb[17].mxu1 }
 0x122   : > { %v6283_v2 = vadd.f32 %v4075_v62, %v4074_v60  ;;  %v4077_v3 = vpop.f32.mrb[18].mxu0  ;;  %v6285_v4 = vadd.f32 %v4111_v63, %v4110_v61  ;;  %v4113_v5 = vpop.f32.mrb[18].mxu1 }
 0x123   : > { %v4078_v9 = vpop.f32.mrb[19].mxu0  ;;  %v4114_v11 = vpop.f32.mrb[19].mxu1  ;;  %4623 = vmatpush3.bf16.msra.mxu1 %v620_v59 }
 0x124   : > { %v6289_v13 = vadd.f32 %v4078_v9, %v4077_v3  ;;  %v6291_v15 = vadd.f32 %v4114_v11, %v4113_v5 }
 0x125   : > { %2467 = vmatmul.mubr.bf16.gmra.mrb[124].mxu1 %v5055_v0  ;;  %2580 = vmatmul.mubr.bf16.gmra.mrb[124].mxu0 %v5056_v1 }
 0x126   : > { %2474 = vmatprep.mubr.bf16.mxu1 %v5057_v6  ;;  %2587 = vmatprep.mubr.bf16.mxu0 %v5059_v7  ;;  %v5073_v7 = vld [vmem:[%s5388_s7 + $0x3e0] ss:$68 sps:$4 sm:$0xff]  }
 0x128   : > { %v4080_v16 = vpop.f32.mrb[20].mxu0  ;;  %v4132_v17 = vpop.f32.mrb[20].mxu1 }
 0x129   : > { %v4081_v18 = vpop.f32.mrb[21].mxu0  ;;  %v4133_v21 = vpop.f32.mrb[21].mxu1 }
 0x12a   : > { %v6295_v26 = vadd.f32 %v4081_v18, %v4080_v16  ;;  %v4134_v27 = vadd.f32 %v4133_v21, %v4132_v17  ;;  %v4083_v28 = vpop.f32.mrb[22].mxu0  ;;  %v4135_v29 = vpop.f32.mrb[22].mxu1  ;;  %v5075_v18 = vld [vmem:[%s5388_s7 + $0x46c] ss:$68 sps:$4 sm:$0xff]  }
 0x12b   : > { %v4084_v32 = vpop.f32.mrb[23].mxu0  ;;  %v4136_v33 = vpop.f32.mrb[23].mxu1  ;;  %v5077_v21 = vld [vmem:[%s5388_s7 + $0x3ec] ss:$68 sps:$4 sm:$0xff]  }
 0x12c   : > { %v1953_v34 = vadd.f32 %v4134_v27, %v6151_v12  ;;  %v6300_v35 = vadd.f32 %v4084_v32, %v4083_v28  ;;  %v4137_v36 = vadd.f32 %v4136_v33, %v4135_v29 }
 0x12d   : > { %2475 = vmatmul.mubr.bf16.gmra.mrb[128].mxu1 %v5061_v22  ;;  %2588 = vmatmul.mubr.bf16.gmra.mrb[128].mxu0 %v5062_v23 }
 0x12e   : > { %v1956_v37 = vadd.f32 %v4137_v36, %v6163_v24  ;;  %2482 = vmatprep.mubr.bf16.mxu1 %v5063_v30  ;;  %2595 = vmatprep.mubr.bf16.mxu0 %v5065_v31 }
 0x130   : > { %v4138_v38 = vpop.f32.mrb[24].mxu1  ;;  %v4214_v39 = vpop.f32.mrb[24].mxu0 }
 0x131   : > { %v4139_v41 = vpop.f32.mrb[25].mxu1  ;;  %v4215_v46 = vpop.f32.mrb[25].mxu0 }
 0x132   : > { %v4140_v49 = vadd.f32 %v4139_v41, %v4138_v38  ;;  %v4216_v50 = vadd.f32 %v4215_v46, %v4214_v39  ;;  %v4141_v12 = vpop.f32.mrb[26].mxu1  ;;  %v4217_v51 = vpop.f32.mrb[26].mxu0 }
 0x133   : > { %v4142_v58 = vpop.f32.mrb[27].mxu1  ;;  %v4218_v59 = vpop.f32.mrb[27].mxu0 }
 0x134   : > { %v1961_v24 = vadd.f32 %v4140_v49, %v6193_v42  ;;  %v6308_v60 = vadd.f32 %v4216_v50, %v1953_v34  ;;  %v4143_v61 = vadd.f32 %v4142_v58, %v4141_v12  ;;  %v4219_v62 = vadd.f32 %v4218_v59, %v4217_v51  ;;  %v5074_v42 = vld [vmem:[%s5388_s7 + $0x360] ss:$68 sps:$4 sm:$0xff]  }
 0x135   : > { %2483 = vmatmul.mubr.bf16.gmra.mrb[132].mxu1 %v5067_v47  ;;  %2596 = vmatmul.mubr.bf16.gmra.mrb[132].mxu0 %v5068_v48  ;;  %v5081_v47 = vld [vmem:[%s5388_s7 + $0x4f4] ss:$68 sps:$4 sm:$0xff]  }
 0x136   : > { %v1964_v63 = vadd.f32 %v4143_v61, %v6199_v53  ;;  %v6311_v0 = vadd.f32 %v4219_v62, %v1956_v37  ;;  %2490 = vmatprep.mubr.bf16.mxu1 %v5069_v56  ;;  %2603 = vmatprep.mubr.bf16.mxu0 %v5071_v57  ;;  %v5079_v37 = vld [vmem:[%s5388_s7 + $0x468] ss:$68 sps:$4 sm:$0xff]   ;;  %v5083_v48 = vld [vmem:[%s5388_s7 + $0x474] ss:$68 sps:$4 sm:$0xff]  }
 0x138   : > { %v4144_v1 = vpop.f32.mrb[28].mxu1  ;;  %v4220_v3 = vpop.f32.mrb[28].mxu0 }
 0x139   : > { %v4145_v5 = vpop.f32.mrb[29].mxu1  ;;  %v4221_v6 = vpop.f32.mrb[29].mxu0 }
 0x13a   : > { %v4146_v9 = vadd.f32 %v4145_v5, %v4144_v1  ;;  %v4222_v11 = vadd.f32 %v4221_v6, %v4220_v3  ;;  %v4147_v16 = vpop.f32.mrb[30].mxu1  ;;  %v4223_v17 = vpop.f32.mrb[30].mxu0 }
 0x13b   : > { %v4148_v22 = vpop.f32.mrb[31].mxu1  ;;  %v4224_v23 = vpop.f32.mrb[31].mxu0 }
 0x13c   : > { %v1969_v53 = vadd.f32 %v4146_v9, %v6229_v8  ;;  %v6318_v27 = vadd.f32 %v4222_v11, %v1961_v24  ;;  %v4149_v28 = vadd.f32 %v4148_v22, %v4147_v16  ;;  %v4225_v29 = vadd.f32 %v4224_v23, %v4223_v17  ;;  %v5080_v8 = vld [vmem:[%s5388_s7 + $0x3e8] ss:$68 sps:$4 sm:$0xff]  }
 0x13d   : > { %2491 = vmatmul.mubr.bf16.gmra.mrb[136].mxu1 %v5073_v7  ;;  %2604 = vmatmul.mubr.bf16.gmra.mrb[136].mxu0 %v5074_v42  ;;  %v5087_v7 = vld [vmem:[%s5388_s7 + $0x57c] ss:$68 sps:$4 sm:$0xff]  }
 0x13e   : > { %v1972_v30 = vadd.f32 %v4149_v28, %v6235_v19  ;;  %v6321_v31 = vadd.f32 %v4225_v29, %v1964_v63  ;;  %2498 = vmatprep.mubr.bf16.mxu1 %v5075_v18  ;;  %2611 = vmatprep.mubr.bf16.mxu0 %v5077_v21  ;;  %v5085_v63 = vld [vmem:[%s5388_s7 + $0x4f0] ss:$68 sps:$4 sm:$0xff]   ;;  %v5089_v42 = vld [vmem:[%s5388_s7 + $0x4fc] ss:$68 sps:$4 sm:$0xff]  }
 0x140   : > { %v4150_v32 = vpop.f32.mrb[32].mxu1  ;;  %v4226_v33 = vpop.f32.mrb[32].mxu0 }
 0x141   : > { %v4151_v34 = vpop.f32.mrb[33].mxu1  ;;  %v4227_v36 = vpop.f32.mrb[33].mxu0 }
 0x142   : > { %v4152_v38 = vadd.f32 %v4151_v34, %v4150_v32  ;;  %v4228_v39 = vadd.f32 %v4227_v36, %v4226_v33  ;;  %v4153_v41 = vpop.f32.mrb[34].mxu1  ;;  %v4229_v46 = vpop.f32.mrb[34].mxu0 }
 0x143   : > { %v4154_v49 = vpop.f32.mrb[35].mxu1  ;;  %v4230_v50 = vpop.f32.mrb[35].mxu0 }
 0x144   : > { %v1977_v19 = vadd.f32 %v4152_v38, %v6265_v40  ;;  %v6328_v12 = vadd.f32 %v4228_v39, %v1969_v53  ;;  %v4155_v51 = vadd.f32 %v4154_v49, %v4153_v41  ;;  %v4231_v56 = vadd.f32 %v4230_v50, %v4229_v46  ;;  %v5086_v40 = vld [vmem:[%s5388_s7 + $0x470] ss:$68 sps:$4 sm:$0xff]  }
 0x145   : > { %2499 = vmatmul.mubr.bf16.gmra.mrb[140].mxu1 %v5079_v37  ;;  %2612 = vmatmul.mubr.bf16.gmra.mrb[140].mxu0 %v5080_v8  ;;  %v5093_v37 = vld [vmem:[%s5388_s7 + $0x584] ss:$68 sps:$4 sm:$0xff]   ;;  %v5097_v8 = vld [vmem:[%s5388_s7 + $0x3c] ss:$68 sps:$4 sm:$0xff]  }
 0x146   : > { %v1980_v57 = vadd.f32 %v4155_v51, %v6271_v52  ;;  %v6331_v58 = vadd.f32 %v4231_v56, %v1972_v30  ;;  %2506 = vmatprep.mubr.bf16.mxu1 %v5081_v47  ;;  %2619 = vmatprep.mubr.bf16.mxu0 %v5083_v48  ;;  %v5091_v30 = vld [vmem:[%s5388_s7 + $0x578] ss:$68 sps:$4 sm:$0xff]  }
 0x148   : > { %v4156_v59 = vpop.f32.mrb[36].mxu1  ;;  %v4232_v24 = vpop.f32.mrb[36].mxu0 }
 0x149   : > { %v4157_v61 = vpop.f32.mrb[37].mxu1  ;;  %v4233_v62 = vpop.f32.mrb[37].mxu0 }
 0x14a   : > { %v4158_v1 = vadd.f32 %v4157_v61, %v4156_v59  ;;  %v4234_v3 = vadd.f32 %v4233_v62, %v4232_v24  ;;  %v4159_v5 = vpop.f32.mrb[38].mxu1  ;;  %v4235_v6 = vpop.f32.mrb[38].mxu0  ;;  %v5098_v59 = vld [vmem:[%s5388_s7 + $0x580] ss:$68 sps:$4 sm:$0xff]  }
 0x14b   : > { %v4160_v9 = vpop.f32.mrb[39].mxu1  ;;  %v4236_v11 = vpop.f32.mrb[39].mxu0 }
 0x14c   : > { %v1985_v52 = vadd.f32 %v4158_v1, %v6283_v2  ;;  %v6338_v16 = vadd.f32 %v4234_v3, %v1977_v19  ;;  %v4161_v17 = vadd.f32 %v4160_v9, %v4159_v5  ;;  %v4237_v18 = vadd.f32 %v4236_v11, %v4235_v6  ;;  %v5092_v2 = vld [vmem:[%s5388_s7 + $0x4f8] ss:$68 sps:$4 sm:$0xff]  }
 0x14d   : > { %2507 = vmatmul.mubr.bf16.gmra.mrb[144].mxu1 %v5085_v63  ;;  %2620 = vmatmul.mubr.bf16.gmra.mrb[144].mxu0 %v5086_v40  ;;  %v5099_v63 = vld [vmem:[%s5388_s7 + $0xc4] ss:$68 sps:$4 sm:$0xff]  }
 0x14e   : > { %v1988_v21 = vadd.f32 %v4161_v17, %v6289_v13  ;;  %v6341_v22 = vadd.f32 %v4237_v18, %v1980_v57  ;;  %2514 = vmatprep.mubr.bf16.mxu1 %v5087_v7  ;;  %2627 = vmatprep.mubr.bf16.mxu0 %v5089_v42  ;;  %v5095_v57 = vld [vmem:[%s5388_s7 + $0x38] ss:$68 sps:$4 sm:$0xff]   ;;  %v5101_v17 = vld [vmem:[%s5388_s7 + $0xc0] ss:$68 sps:$4 sm:$0xff]  }
 0x14f   : > { %v5102_v18 = vld [vmem:[%s5388_s7 + $0x40] ss:$68 sps:$4 sm:$0xff]  }
 0x150   : > { %v4162_v23 = vpop.f32.mrb[40].mxu1  ;;  %v4238_v53 = vpop.f32.mrb[40].mxu0 }
 0x151   : > { %v4163_v28 = vpop.f32.mrb[41].mxu1  ;;  %v4239_v29 = vpop.f32.mrb[41].mxu0 }
 0x152   : > { %v4164_v32 = vadd.f32 %v4163_v28, %v4162_v23  ;;  %v4240_v33 = vadd.f32 %v4239_v29, %v4238_v53  ;;  %v4165_v34 = vpop.f32.mrb[42].mxu1  ;;  %v4241_v36 = vpop.f32.mrb[42].mxu0 }
 0x153   : > { %v4166_v38 = vpop.f32.mrb[43].mxu1  ;;  %v4242_v39 = vpop.f32.mrb[43].mxu0 }
 0x154   : > { %v1993_v13 = vadd.f32 %v4164_v32, %v6295_v26  ;;  %v6348_v41 = vadd.f32 %v4240_v33, %v1985_v52  ;;  %v4167_v46 = vadd.f32 %v4166_v38, %v4165_v34  ;;  %v4243_v47 = vadd.f32 %v4242_v39, %v4241_v36 }
 0x155   : > { %2515 = vmatmul.mubr.bf16.gmra.mrb[148].mxu1 %v5091_v30  ;;  %2628 = vmatmul.mubr.bf16.gmra.mrb[148].mxu0 %v5092_v2 }
 0x156   : > { %v1996_v48 = vadd.f32 %v4167_v46, %v6300_v35  ;;  %v6351_v49 = vadd.f32 %v4243_v47, %v1988_v21  ;;  %2635 = vmatprep.mubr.bf16.mxu0 %v5093_v37  ;;  %2676 = vmatprep.mubr.bf16.mxu1 %v5097_v8  ;;  %v5106_v46 = vld [vmem:[%s5388_s7 + $0xc8] ss:$68 sps:$4 sm:$0xff]  }
 0x158   : > { %v4168_v50 = vpop.f32.mrb[44].mxu1  ;;  %v4244_v19 = vpop.f32.mrb[44].mxu0 }
 0x159   : > { %v4169_v51 = vpop.f32.mrb[45].mxu1  ;;  %v4245_v56 = vpop.f32.mrb[45].mxu0 }
 0x15a   : > { %v4170_v26 = vadd.f32 %v4169_v51, %v4168_v50  ;;  %v4246_v24 = vadd.f32 %v4245_v56, %v4244_v19  ;;  %v4171_v61 = vpop.f32.mrb[46].mxu1  ;;  %v4247_v62 = vpop.f32.mrb[46].mxu0  ;;  %v5107_v51 = vld [vmem:[%s5388_s7 + $0x1d4] ss:$68 sps:$4 sm:$0xff]  }
 0x15b   : > { %v4172_v40 = vpop.f32.mrb[47].mxu1  ;;  %v4248_v1 = vpop.f32.mrb[47].mxu0 }
 0x15c   : > { %v2001_v35 = vadd.f32 %v4170_v26, %v6153_v14  ;;  %v6357_v3 = vadd.f32 %v4246_v24, %v1993_v13  ;;  %v4173_v5 = vadd.f32 %v4172_v40, %v4171_v61  ;;  %v4249_v6 = vadd.f32 %v4248_v1, %v4247_v62  ;;  %v5105_v13 = vld [vmem:[%s5388_s7 + $0x148] ss:$68 sps:$4 sm:$0xff]  }
 0x15d   : > { %2636 = vmatmul.mubr.bf16.gmra.mrb[152].mxu0 %v5098_v59  ;;  %2677 = vmatmul.mubr.bf16.vlgmr.msra.gmra.mrb[152].mxu1 %v5095_v57 }
 0x15e   : > { %v2004_v7 = vadd.f32 %v4173_v5, %v6165_v25  ;;  %v6360_v42 = vadd.f32 %v4249_v6, %v1996_v48  ;;  %2684 = vmatprep.mubr.bf16.mxu1 %v5099_v63  ;;  %4704 = vmatprep.mubr.msk.bf16.mxu0 %vm5283_vm0, %v5282_v45  ;;  %v5103_v25 = vld [vmem:[%s5388_s7 + $0x14c] ss:$68 sps:$4 sm:$0xff]  }
 0x15f   : > { %v5110_v5 = vld [vmem:[%s5388_s7 + $0x150] ss:$68 sps:$4 sm:$0xff]  }
 0x160   : > { %v4174_v9 = vpop.f32.mrb[48].mxu1  ;;  %v4250_v11 = vpop.f32.mrb[48].mxu0 }
 0x161   : > { %v4175_v14 = vpop.f32.mrb[49].mxu1  ;;  %v4251_v52 = vpop.f32.mrb[49].mxu0 }
 0x162   : > { %v4176_v21 = vadd.f32 %v4175_v14, %v4174_v9  ;;  %v4252_v23 = vadd.f32 %v4251_v52, %v4250_v11  ;;  %v4177_v53 = vpop.f32.mrb[50].mxu1  ;;  %v4253_v28 = vpop.f32.mrb[50].mxu0  ;;  %v5111_v14 = vld [vmem:[%s5388_s7 + $0x25c] ss:$68 sps:$4 sm:$0xff]  }
 0x163   : > { %v4178_v29 = vpop.f32.mrb[51].mxu1  ;;  %v4254_v30 = vpop.f32.mrb[51].mxu0 }
 0x164   : > { %v2009_v2 = vadd.f32 %v4176_v21, %v6195_v44  ;;  %v6368_v32 = vadd.f32 %v4252_v23, %v2001_v35  ;;  %v4179_v33 = vadd.f32 %v4178_v29, %v4177_v53  ;;  %v4255_v34 = vadd.f32 %v4254_v30, %v4253_v28  ;;  %v5109_v35 = vld [vmem:[%s5388_s7 + $0x1d0] ss:$68 sps:$4 sm:$0xff]  }
 0x165   : > { %2685 = vmatmul.mubr.bf16.gmra.mrb[156].mxu1 %v5101_v17  ;;  %4705 = vmatmul.mubr.msk.bf16.vlgmr.msra.gmra.mrb[156].mxu0 %vm1763_vm1, %v5102_v18 }
 0x166   : > { %v2012_v36 = vadd.f32 %v4179_v33, %v6201_v54  ;;  %v6372_v37 = vadd.f32 %v4255_v34, %v2004_v7  ;;  %2692 = vmatprep.mubr.bf16.mxu1 %v5103_v25  ;;  %4708 = vmatprep.mubr.msk.bf16.mxu0 %vm5283_vm0, %v5282_v45  ;;  %v5114_v33 = vld [vmem:[%s5388_s7 + $0x1d8] ss:$68 sps:$4 sm:$0xff]  }
 0x168   : > { %v4180_v8 = vpop.f32.mrb[52].mxu1  ;;  %v4256_v38 = vpop.f32.mrb[52].mxu0 }
 0x169   : > { %v4181_v39 = vpop.f32.mrb[53].mxu1  ;;  %v4257_v44 = vpop.f32.mrb[53].mxu0 }
 0x16a   : > { %v4182_v47 = vadd.f32 %v4181_v39, %v4180_v8  ;;  %v4258_v48 = vadd.f32 %v4257_v44, %v4256_v38  ;;  %v4183_v50 = vpop.f32.mrb[54].mxu1  ;;  %v4259_v19 = vpop.f32.mrb[54].mxu0  ;;  %v5115_v39 = vld [vmem:[%s5388_s7 + $0x2e4] ss:$68 sps:$4 sm:$0xff]  }
 0x16b   : > { %v4184_v56 = vpop.f32.mrb[55].mxu1  ;;  %v4260_v54 = vpop.f32.mrb[55].mxu0 }
 0x16c   : > { %v2017_v57 = vadd.f32 %v4182_v47, %v6231_v10  ;;  %v6380_v59 = vadd.f32 %v4258_v48, %v2009_v2  ;;  %v4185_v26 = vadd.f32 %v4184_v56, %v4183_v50  ;;  %v4261_v24 = vadd.f32 %v4260_v54, %v4259_v19  ;;  %v5113_v2 = vld [vmem:[%s5388_s7 + $0x258] ss:$68 sps:$4 sm:$0xff]  }
 0x16d   : > { %2693 = vmatmul.mubr.bf16.gmra.mrb[160].mxu1 %v5105_v13  ;;  %4709 = vmatmul.mubr.msk.bf16.gmra.mrb[160].mxu0 %vm1763_vm1, %v5106_v46 }
 0x16e   : > { %v2020_v61 = vadd.f32 %v4185_v26, %v6237_v20  ;;  %v6384_v62 = vadd.f32 %v4261_v24, %v2012_v36  ;;  %2700 = vmatprep.mubr.bf16.mxu1 %v5107_v51  ;;  %4712 = vmatprep.mubr.msk.bf16.mxu0 %vm5283_vm0, %v5282_v45  ;;  %v5118_v26 = vld [vmem:[%s5388_s7 + $0x260] ss:$68 sps:$4 sm:$0xff]  }
 0x170   : > { %v4186_v63 = vpop.f32.mrb[56].mxu1  ;;  %v4262_v40 = vpop.f32.mrb[56].mxu0 }
 0x171   : > { %v4187_v1 = vpop.f32.mrb[57].mxu1  ;;  %v4263_v10 = vpop.f32.mrb[57].mxu0 }
 0x172   : > { %v4188_v6 = vadd.f32 %v4187_v1, %v4186_v63  ;;  %v4264_v7 = vadd.f32 %v4263_v10, %v4262_v40  ;;  %v4189_v9 = vpop.f32.mrb[58].mxu1  ;;  %v4265_v11 = vpop.f32.mrb[58].mxu0  ;;  %v5119_v1 = vld [vmem:[%s5388_s7 + $0x36c] ss:$68 sps:$4 sm:$0xff]  }
 0x173   : > { %v4190_v52 = vpop.f32.mrb[59].mxu1  ;;  %v4266_v20 = vpop.f32.mrb[59].mxu0 }
 0x174   : > { %v2025_v17 = vadd.f32 %v4188_v6, %v6267_v43  ;;  %v6392_v18 = vadd.f32 %v4264_v7, %v2017_v57  ;;  %v4191_v21 = vadd.f32 %v4190_v52, %v4189_v9  ;;  %v4267_v23 = vadd.f32 %v4266_v20, %v4265_v11  ;;  %v5117_v57 = vld [vmem:[%s5388_s7 + $0x2e0] ss:$68 sps:$4 sm:$0xff]  }
 0x175   : > { %2701 = vmatmul.mubr.bf16.gmra.mrb[164].mxu1 %v5109_v35  ;;  %4713 = vmatmul.mubr.msk.bf16.gmra.mrb[164].mxu0 %vm1763_vm1, %v5110_v5 }
 0x176   : > { %v2028_v53 = vadd.f32 %v4191_v21, %v6273_v55  ;;  %v6396_v28 = vadd.f32 %v4267_v23, %v2020_v61  ;;  %2708 = vmatprep.mubr.bf16.mxu1 %v5111_v14  ;;  %4716 = vmatprep.mubr.msk.bf16.mxu0 %vm5283_vm0, %v5282_v45  ;;  %v5121_v21 = vld [vmem:[%s5388_s7 + $0x368] ss:$68 sps:$4 sm:$0xff]  }
 0x178   : > { %v4192_v25 = vpop.f32.mrb[60].mxu1  ;;  %v4268_v29 = vpop.f32.mrb[60].mxu0 }
 0x179   : > { %v4193_v30 = vpop.f32.mrb[61].mxu1  ;;  %v4269_v43 = vpop.f32.mrb[61].mxu0 }
 0x17a   : > { %v4194_v34 = vadd.f32 %v4193_v30, %v4192_v25  ;;  %v4270_v36 = vadd.f32 %v4269_v43, %v4268_v29  ;;  %v4195_v8 = vpop.f32.mrb[62].mxu1  ;;  %v4271_v38 = vpop.f32.mrb[62].mxu0  ;;  %v5123_v30 = vld [vmem:[%s5388_s7 + $0x3f4] ss:$68 sps:$4 sm:$0xff]  }
 0x17b   : > { %v4196_v44 = vpop.f32.mrb[63].mxu1  ;;  %v4272_v55 = vpop.f32.mrb[63].mxu0 }
 0x17c   : > { %v2033_v13 = vadd.f32 %v4194_v34, %v6285_v4  ;;  %v6404_v46 = vadd.f32 %v4270_v36, %v2025_v17  ;;  %v4197_v47 = vadd.f32 %v4196_v44, %v4195_v8  ;;  %v4273_v48 = vadd.f32 %v4272_v55, %v4271_v38 }
 0x17d   : > { %2709 = vmatmul.mubr.bf16.gmra.mrb[168].mxu1 %v5113_v2  ;;  %4717 = vmatmul.mubr.msk.bf16.gmra.mrb[168].mxu0 %vm1763_vm1, %v5114_v33 }
 0x17e   : > { %v2036_v50 = vadd.f32 %v4197_v47, %v6291_v15  ;;  %v6408_v19 = vadd.f32 %v4273_v48, %v2028_v53  ;;  %2716 = vmatprep.mubr.bf16.mxu1 %v5115_v39  ;;  %4720 = vmatprep.mubr.msk.bf16.mxu0 %vm5283_vm0, %v5282_v45  ;;  %v5126_v47 = vld [vmem:[%s5388_s7 + $0x370] ss:$68 sps:$4 sm:$0xff]  }
 0x180   : > { %v4274_v51 = vpop.f32.mrb[64].mxu0  ;;  %v4296_v56 = vpop.f32.mrb[64].mxu1 }
 0x181   : > { %v4275_v54 = vpop.f32.mrb[65].mxu0  ;;  %v4297_v4 = vpop.f32.mrb[65].mxu1 }
 0x182   : > { %v4276_v24 = vadd.f32 %v4275_v54, %v4274_v51  ;;  %v4298_v61 = vadd.f32 %v4297_v4, %v4296_v56  ;;  %v4277_v63 = vpop.f32.mrb[66].mxu0  ;;  %v4299_v40 = vpop.f32.mrb[66].mxu1  ;;  %v5127_v54 = vld [vmem:[%s5388_s7 + $0x47c] ss:$68 sps:$4 sm:$0xff]  }
 0x183   : > { %v4278_v10 = vpop.f32.mrb[67].mxu0  ;;  %v4300_v15 = vpop.f32.mrb[67].mxu1 }
 0x184   : > { %v6415_v35 = vadd.f32 %v4276_v24, %v2033_v13  ;;  %v2195_v5 = vadd.f32 %v4298_v61, %v6308_v60  ;;  %v4279_v6 = vadd.f32 %v4278_v10, %v4277_v63  ;;  %v4301_v7 = vadd.f32 %v4300_v15, %v4299_v40  ;;  %v5122_v60 = vld [vmem:[%s5388_s7 + $0x2e8] ss:$68 sps:$4 sm:$0xff]  }
 0x185   : > { %2717 = vmatmul.mubr.bf16.gmra.mrb[172].mxu1 %v5117_v57  ;;  %4721 = vmatmul.mubr.msk.bf16.gmra.mrb[172].mxu0 %vm1763_vm1, %v5118_v26  ;;  %v5284_v57 = vmov 1   ;;  %v3174_v26 = vld [vmem:[%s6443_s17] sm:$0xff] }
 0x186   : > { %v6419_v9 = vadd.f32 %v4279_v6, %v2036_v50  ;;  %v2198_v11 = vadd.f32 %v4301_v7, %v6311_v0  ;;  %2724 = vmatprep.mubr.bf16.mxu1 %v5119_v1  ;;  %4724 = vmatprep.mubr.msk.bf16.mxu0 %vm5283_vm0, %v5282_v45  ;;  %v3175_v6 = vld [vmem:[%s6443_s17 + $0x8] sm:$0xff] }
 0x187   : > { %4859 = vset.pattern.permute.xlu1 %v5284_v57  ;;  %4860 = vset.pattern.permute.xlu0 %v5284_v57 }
 0x188   : > { %v4302_v14 = vpop.f32.mrb[68].mxu1  ;;  %v4378_v52 = vpop.f32.mrb[68].mxu0  ;;  %3352 = vperm.xlu1 %4859, %v3174_v26   ;;  %3357 = vperm.xlu0 %4860, %v3175_v6   ;;  %v5138_v6 = vld [vmem:[%s5388_s7 + $0x508] ss:$68 sps:$4 sm:$0xff]  }
 0x189   : > { %v4303_v20 = vpop.f32.mrb[69].mxu1  ;;  %v4379_v17 = vpop.f32.mrb[69].mxu0 }
 0x18a   : > { %v4304_v23 = vadd.f32 %v4303_v20, %v4302_v14  ;;  %v4380_v53 = vadd.f32 %v4379_v17, %v4378_v52  ;;  %v4305_v25 = vpop.f32.mrb[70].mxu1  ;;  %v4381_v29 = vpop.f32.mrb[70].mxu0  ;;  %v5129_v14 = vld [vmem:[%s5388_s7 + $0x478] ss:$68 sps:$4 sm:$0xff]  }
 0x18b   : > { %v4306_v43 = vpop.f32.mrb[71].mxu1  ;;  %v4382_v2 = vpop.f32.mrb[71].mxu0  ;;  %v5130_v52 = vld [vmem:[%s5388_s7 + $0x3f8] ss:$68 sps:$4 sm:$0xff]  }
 0x18c   : > { %v2203_v0 = vadd.f32 %v4304_v23, %v6318_v27  ;;  %v6428_v33 = vadd.f32 %v4380_v53, %v2195_v5  ;;  %v4307_v34 = vadd.f32 %v4306_v43, %v4305_v25  ;;  %v4383_v36 = vadd.f32 %v4382_v2, %v4381_v29  ;;  %v5125_v27 = vld [vmem:[%s5388_s7 + $0x3f0] ss:$68 sps:$4 sm:$0xff]   ;;  %v3177_v25 = vld [vmem:[%s6443_s17 + $0x18] sm:$0xff] }
 0x18d   : > { %2725 = vmatmul.mubr.bf16.gmra.mrb[176].mxu1 %v5121_v21  ;;  %4725 = vmatmul.mubr.msk.bf16.gmra.mrb[176].mxu0 %vm1763_vm1, %v5122_v60  ;;  %v5131_v60 = vld [vmem:[%s5388_s7 + $0x504] ss:$68 sps:$4 sm:$0xff]  }
 0x18e   : > { %v2206_v8 = vadd.f32 %v4307_v34, %v6321_v31  ;;  %v6432_v38 = vadd.f32 %v4383_v36, %v2198_v11  ;;  %2732 = vmatprep.mubr.bf16.mxu1 %v5123_v30  ;;  %4728 = vmatprep.mubr.msk.bf16.mxu0 %vm5283_vm0, %v5282_v45 }
 0x190   : > { %v4308_v39 = vpop.f32.mrb[72].mxu1  ;;  %v4384_v44 = vpop.f32.mrb[72].mxu0 }
 0x191   : > { %v4309_v55 = vpop.f32.mrb[73].mxu1  ;;  %v4385_v13 = vpop.f32.mrb[73].mxu0 }
 0x192   : > { %v4310_v48 = vadd.f32 %v4309_v55, %v4308_v39  ;;  %v4386_v50 = vadd.f32 %v4385_v13, %v4384_v44  ;;  %v4311_v51 = vpop.f32.mrb[74].mxu1  ;;  %v4387_v56 = vpop.f32.mrb[74].mxu0  ;;  %v5133_v55 = vld [vmem:[%s5388_s7 + $0x500] ss:$68 sps:$4 sm:$0xff]  }
 0x193   : > { %v4312_v31 = vpop.f32.mrb[75].mxu1  ;;  %v4388_v4 = vpop.f32.mrb[75].mxu0  ;;  %v5134_v13 = vld [vmem:[%s5388_s7 + $0x480] ss:$68 sps:$4 sm:$0xff]  }
 0x194   : > { %v2211_v24 = vadd.f32 %v4310_v48, %v6328_v12  ;;  %v6449_v61 = vadd.f32 %v4386_v50, %v2203_v0  ;;  %v4313_v63 = vadd.f32 %v4312_v31, %v4311_v51  ;;  %v4389_v40 = vadd.f32 %v4388_v4, %v4387_v56  ;;  %v3176_v12 = vld [vmem:[%s6443_s17 + $0x10] sm:$0xff]  ;;  %v3178_v0 = vld [vmem:[%s6443_s17 + $0x20] sm:$0xff] }
 0x195   : > { %2733 = vmatmul.mubr.bf16.gmra.mrb[180].mxu1 %v5125_v27  ;;  %4729 = vmatmul.mubr.msk.bf16.gmra.mrb[180].mxu0 %vm1763_vm1, %v5126_v47  ;;  %v5135_v51 = vld [vmem:[%s5388_s7 + $0x58c] ss:$68 sps:$4 sm:$0xff]  }
 0x196   : > { %v2214_v1 = vadd.f32 %v4313_v63, %v6331_v58  ;;  %v6453_v10 = vadd.f32 %v4389_v40, %v2206_v8  ;;  %2740 = vmatprep.mubr.bf16.mxu1 %v5127_v54  ;;  %4732 = vmatprep.mubr.msk.bf16.mxu0 %vm5283_vm0, %v5282_v45 }
 0x197   : > { %3362 = vperm.xlu1 %4859, %v3176_v12   ;;  %3372 = vperm.xlu0 %4860, %v3178_v0   ;;  %v5139_v0 = vld [vmem:[%s5388_s7 + $0x590] ss:$68 sps:$4 sm:$0xff]  }
 0x198   : > { %v4314_v15 = vpop.f32.mrb[76].mxu1  ;;  %v4390_v5 = vpop.f32.mrb[76].mxu0 }
 0x199   : > { %v4315_v7 = vpop.f32.mrb[77].mxu1  ;;  %v4391_v11 = vpop.f32.mrb[77].mxu0 }
 0x19a   : > { %v4316_v58 = vadd.f32 %v4315_v7, %v4314_v15  ;;  %v4392_v20 = vadd.f32 %v4391_v11, %v4390_v5  ;;  %v4317_v17 = vpop.f32.mrb[78].mxu1  ;;  %v4393_v21 = vpop.f32.mrb[78].mxu0 }
 0x19b   : > { %v4318_v23 = vpop.f32.mrb[79].mxu1  ;;  %v4394_v53 = vpop.f32.mrb[79].mxu0  ;;  %3367 = vperm.xlu1 %4859, %v3177_v25  }
 0x19c   : > { %v2219_v29 = vadd.f32 %v4316_v58, %v6338_v16  ;;  %v6464_v30 = vadd.f32 %v4392_v20, %v2211_v24  ;;  %v4319_v43 = vadd.f32 %v4318_v23, %v4317_v17  ;;  %v4395_v2 = vadd.f32 %v4394_v53, %v4393_v21  ;;  %v3179_v16 = vld [vmem:[%s6443_s17 + $0x28] sm:$0xff] }
 0x19d   : > { %2741 = vmatmul.mubr.bf16.gmra.mrb[184].mxu1 %v5129_v14  ;;  %4733 = vmatmul.mubr.msk.bf16.gmra.mrb[184].mxu0 %vm1763_vm1, %v5130_v52 }
 0x19e   : > { %v2222_v34 = vadd.f32 %v4319_v43, %v6341_v22  ;;  %v6469_v36 = vadd.f32 %v4395_v2, %v2214_v1  ;;  %2748 = vmatprep.mubr.bf16.mxu1 %v5131_v60  ;;  %4736 = vmatprep.mubr.msk.bf16.mxu0 %vm5283_vm0, %v5282_v45 }
 0x19f   : > { %3377 = vperm.xlu1 %4859, %v3179_v16  }
 0x1a0   : > { %v4320_v8 = vpop.f32.mrb[80].mxu1  ;;  %v4396_v39 = vpop.f32.mrb[80].mxu0 }
 0x1a1   : > { %v4321_v44 = vpop.f32.mrb[81].mxu1  ;;  %v4397_v27 = vpop.f32.mrb[81].mxu0 }
 0x1a2   : > { %v4322_v47 = vadd.f32 %v4321_v44, %v4320_v8  ;;  %v4398_v48 = vadd.f32 %v4397_v27, %v4396_v39  ;;  %v4323_v50 = vpop.f32.mrb[82].mxu1  ;;  %v4399_v22 = vpop.f32.mrb[82].mxu0 }
 0x1a3   : > { %v4324_v56 = vpop.f32.mrb[83].mxu1  ;;  %v4400_v54 = vpop.f32.mrb[83].mxu0 }
 0x1a4   : > { %v2227_v31 = vadd.f32 %v4322_v47, %v6348_v41  ;;  %v6478_v4 = vadd.f32 %v4398_v48, %v2219_v29  ;;  %v4325_v26 = vadd.f32 %v4324_v56, %v4323_v50  ;;  %v4401_v24 = vadd.f32 %v4400_v54, %v4399_v22  ;;  %v5137_v41 = vld [vmem:[%s5388_s7 + $0x588] ss:$68 sps:$4 sm:$0xff]   ;;  %s4764_s7 = smul.u32 176, %s203_s21 }
 0x1a5   : > { %2749 = vmatmul.mubr.bf16.gmra.mrb[188].mxu1 %v5133_v55  ;;  %4737 = vmatmul.mubr.msk.bf16.gmra.mrb[188].mxu0 %vm1763_vm1, %v5134_v13 }
 0x1a6   : > { %v2230_v63 = vadd.f32 %v4325_v26, %v6351_v49  ;;  %v6482_v40 = vadd.f32 %v4401_v24, %v2222_v34  ;;  %2756 = vmatprep.mubr.bf16.mxu1 %v5135_v51  ;;  %4740 = vmatprep.mubr.msk.bf16.mxu0 %vm5283_vm0, %v5282_v45  ;;  %s6959_s18 = scalar_lea.vmem [#allocation2], %s4764_s7  }
 0x1a8   : > { %v4326_v1 = vpop.f32.mrb[84].mxu1  ;;  %v4402_v12 = vpop.f32.mrb[84].mxu0 }
 0x1a9   : > { %v4327_v15 = vpop.f32.mrb[85].mxu1  ;;  %v4403_v5 = vpop.f32.mrb[85].mxu0 }
 0x1aa   : > { %v4328_v7 = vadd.f32 %v4327_v15, %v4326_v1  ;;  %v4404_v11 = vadd.f32 %v4403_v5, %v4402_v12  ;;  %v4329_v14 = vpop.f32.mrb[86].mxu1  ;;  %v4405_v52 = vpop.f32.mrb[86].mxu0 }
 0x1ab   : > { %v4330_v58 = vpop.f32.mrb[87].mxu1  ;;  %v4406_v20 = vpop.f32.mrb[87].mxu0 }
 0x1ac   : > { %v2235_v49 = vadd.f32 %v4328_v7, %v6357_v3  ;;  %v6489_v17 = vadd.f32 %v4404_v11, %v2227_v31  ;;  %v4331_v21 = vadd.f32 %v4330_v58, %v4329_v14  ;;  %v4407_v60 = vadd.f32 %v4406_v20, %v4405_v52 }
 0x1ad   : > { %2757 = vmatmul.mubr.bf16.gmra.mrb[192].mxu1 %v5137_v41  ;;  %4741 = vmatmul.mubr.msk.bf16.gmra.mrb[192].mxu0 %vm1763_vm1, %v5138_v6 }
 0x1ae   : > { %v2238_v23 = vadd.f32 %v4331_v21, %v6360_v42  ;;  %v6493_v53 = vadd.f32 %v4407_v60, %v2230_v63  ;;  %4744 = vmatprep.mubr.msk.bf16.mxu0 %vm5283_vm0, %v5282_v45 }
 0x1b0   : > { %v4332_v25 = vpop.f32.mrb[88].mxu1  ;;  %v4408_v29 = vpop.f32.mrb[88].mxu0 }
 0x1b1   : > { %v4333_v43 = vpop.f32.mrb[89].mxu1  ;;  %v4409_v2 = vpop.f32.mrb[89].mxu0 }
 0x1b2   : > { %v4334_v3 = vadd.f32 %v4333_v43, %v4332_v25  ;;  %v4410_v34 = vadd.f32 %v4409_v2, %v4408_v29  ;;  %v4335_v16 = vpop.f32.mrb[90].mxu1  ;;  %v4411_v8 = vpop.f32.mrb[90].mxu0 }
 0x1b3   : > { %v4336_v39 = vpop.f32.mrb[91].mxu1  ;;  %v4412_v44 = vpop.f32.mrb[91].mxu0 }
 0x1b4   : > { %v2243_v27 = vadd.f32 %v4334_v3, %v6368_v32  ;;  %v6499_v55 = vadd.f32 %v4410_v34, %v2235_v49  ;;  %v4337_v42 = vadd.f32 %v4336_v39, %v4335_v16  ;;  %v4413_v13 = vadd.f32 %v4412_v44, %v4411_v8 }
 0x1b5   : > { %4745 = vmatmul.mubr.msk.bf16.gmra.mrb[196].mxu0 %vm1763_vm1, %v5139_v0 }
 0x1b6   : > { %v2246_v45 = vadd.f32 %v4337_v42, %v6372_v37  ;;  %v6503_v47 = vadd.f32 %v4413_v13, %v2238_v23 }
 0x1b8   : > { %v4338_v48 = vpop.f32.mrb[92].mxu1  ;;  %v4414_v50 = vpop.f32.mrb[92].mxu0 }
 0x1b9   : > { %v4339_v22 = vpop.f32.mrb[93].mxu1  ;;  %v4415_v51 = vpop.f32.mrb[93].mxu0 }
 0x1ba   : > { %v4340_v56 = vadd.f32 %v4339_v22, %v4338_v48  ;;  %v4416_v54 = vadd.f32 %v4415_v51, %v4414_v50  ;;  %v4341_v31 = vpop.f32.mrb[94].mxu1  ;;  %v4417_v26 = vpop.f32.mrb[94].mxu0 }
 0x1bb   : > { %v4342_v24 = vpop.f32.mrb[95].mxu1  ;;  %v4418_v32 = vpop.f32.mrb[95].mxu0 }
 0x1bc   : > { %v2251_v63 = vadd.f32 %v4340_v56, %v6380_v59  ;;  %v6506_v1 = vadd.f32 %v4416_v54, %v2243_v27  ;;  %v4343_v12 = vadd.f32 %v4342_v24, %v4341_v31  ;;  %v4419_v15 = vadd.f32 %v4418_v32, %v4417_v26 }
 0x1be   : > { %v2254_v37 = vadd.f32 %v4343_v12, %v6384_v62  ;;  %v6509_v5 = vadd.f32 %v4419_v15, %v2246_v45 }
 0x1c0   : > { %v4344_v41 = vpop.f32.mrb[96].mxu1  ;;  %v4420_v6 = vpop.f32.mrb[96].mxu0 }
 0x1c1   : > { %v4345_v7 = vpop.f32.mrb[97].mxu1  ;;  %v4421_v11 = vpop.f32.mrb[97].mxu0 }
 0x1c2   : > { %v4346_v14 = vadd.f32 %v4345_v7, %v4344_v41  ;;  %v4422_v52 = vadd.f32 %v4421_v11, %v4420_v6  ;;  %v4347_v58 = vpop.f32.mrb[98].mxu1  ;;  %v4423_v20 = vpop.f32.mrb[98].mxu0 }
 0x1c3   : > { %v4348_v49 = vpop.f32.mrb[99].mxu1  ;;  %v4424_v21 = vpop.f32.mrb[99].mxu0 }
 0x1c4   : > { %v2259_v59 = vadd.f32 %v4346_v14, %v6392_v18  ;;  %v6512_v60 = vadd.f32 %v4422_v52, %v2251_v63  ;;  %v4349_v23 = vadd.f32 %v4348_v49, %v4347_v58  ;;  %v4425_v25 = vadd.f32 %v4424_v21, %v4423_v20 }
 0x1c6   : > { %v2262_v62 = vadd.f32 %v4349_v23, %v6396_v28  ;;  %v6515_v29 = vadd.f32 %v4425_v25, %v2254_v37 }
 0x1c8   : > { %v4350_v43 = vpop.f32.mrb[100].mxu1  ;;  %v4426_v2 = vpop.f32.mrb[100].mxu0 }
 0x1c9   : > { %v4351_v0 = vpop.f32.mrb[101].mxu1  ;;  %v4427_v3 = vpop.f32.mrb[101].mxu0 }
 0x1ca   : > { %v4352_v34 = vadd.f32 %v4351_v0, %v4350_v43  ;;  %v4428_v16 = vadd.f32 %v4427_v3, %v4426_v2  ;;  %v4353_v8 = vpop.f32.mrb[102].mxu1  ;;  %v4429_v39 = vpop.f32.mrb[102].mxu0 }
 0x1cb   : > { %v4354_v44 = vpop.f32.mrb[103].mxu1  ;;  %v4430_v27 = vpop.f32.mrb[103].mxu0 }
 0x1cc   : > { %v2267_v18 = vadd.f32 %v4352_v34, %v6404_v46  ;;  %v6518_v42 = vadd.f32 %v4428_v16, %v2259_v59  ;;  %v4355_v13 = vadd.f32 %v4354_v44, %v4353_v8  ;;  %v4431_v45 = vadd.f32 %v4430_v27, %v4429_v39 }
 0x1ce   : > { %v2270_v28 = vadd.f32 %v4355_v13, %v6408_v19  ;;  %v6521_v48 = vadd.f32 %v4431_v45, %v2262_v62 }
 0x1d0   : > { %v4356_v50 = vpop.f32.mrb[104].mxu1  ;;  %v4432_v22 = vpop.f32.mrb[104].mxu0 }
 0x1d1   : > { %v4357_v51 = vpop.f32.mrb[105].mxu1  ;;  %v4433_v56 = vpop.f32.mrb[105].mxu0 }
 0x1d2   : > { %v4358_v54 = vadd.f32 %v4357_v51, %v4356_v50  ;;  %v4434_v31 = vadd.f32 %v4433_v56, %v4432_v22  ;;  %v4359_v26 = vpop.f32.mrb[106].mxu1  ;;  %v4435_v24 = vpop.f32.mrb[106].mxu0 }
 0x1d3   : > { %v4360_v32 = vpop.f32.mrb[107].mxu1  ;;  %v4436_v63 = vpop.f32.mrb[107].mxu0 }
 0x1d4   : > { %v2275_v46 = vadd.f32 %v4358_v54, %v6415_v35  ;;  %v6524_v12 = vadd.f32 %v4434_v31, %v2267_v18  ;;  %v4361_v15 = vadd.f32 %v4360_v32, %v4359_v26  ;;  %v4437_v37 = vadd.f32 %v4436_v63, %v4435_v24 }
 0x1d6   : > { %v2278_v19 = vadd.f32 %v4361_v15, %v6419_v9  ;;  %v6527_v41 = vadd.f32 %v4437_v37, %v2270_v28 }
 0x1d8   : > { %v4438_v6 = vpop.f32.mrb[108].mxu0  ;;  %v4460_v7 = vpop.f32.mrb[108].mxu1 }
 0x1d9   : > { %v4439_v11 = vpop.f32.mrb[109].mxu0  ;;  %v4461_v14 = vpop.f32.mrb[109].mxu1 }
 0x1da   : > { %v4440_v52 = vadd.f32 %v4439_v11, %v4438_v6  ;;  %v4462_v58 = vadd.f32 %v4461_v14, %v4460_v7  ;;  %v4441_v20 = vpop.f32.mrb[110].mxu0  ;;  %v4463_v49 = vpop.f32.mrb[110].mxu1 }
 0x1db   : > { %v4442_v21 = vpop.f32.mrb[111].mxu0  ;;  %v4464_v59 = vpop.f32.mrb[111].mxu1 }
 0x1dc   : > { %v6529_v23 = vadd.f32 %v4440_v52, %v2275_v46  ;;  %v2437_v35 = vadd.f32 %v4462_v58, %v6428_v33  ;;  %v4443_v25 = vadd.f32 %v4442_v21, %v4441_v20  ;;  %v4465_v62 = vadd.f32 %v4464_v59, %v4463_v49 }
 0x1de   : > { %v6532_v43 = vadd.f32 %v4443_v25, %v2278_v19  ;;  %v2440_v9 = vadd.f32 %v4465_v62, %v6432_v38 }
 0x1e0   : > { %v4466_v2 = vpop.f32.mrb[112].mxu1  ;;  %v4542_v0 = vpop.f32.mrb[112].mxu0 }
 0x1e1   : > { %v4467_v3 = vpop.f32.mrb[113].mxu1  ;;  %v4543_v34 = vpop.f32.mrb[113].mxu0 }
 0x1e2   : > { %v4468_v16 = vadd.f32 %v4467_v3, %v4466_v2  ;;  %v4544_v8 = vadd.f32 %v4543_v34, %v4542_v0  ;;  %v4469_v39 = vpop.f32.mrb[114].mxu1  ;;  %v4545_v44 = vpop.f32.mrb[114].mxu0 }
 0x1e3   : > { %v4470_v27 = vpop.f32.mrb[115].mxu1  ;;  %v4546_v18 = vpop.f32.mrb[115].mxu0 }
 0x1e4   : > { %v2445_v13 = vadd.f32 %v4468_v16, %v6449_v61  ;;  %v6536_v45 = vadd.f32 %v4544_v8, %v2437_v35  ;;  %v4471_v33 = vadd.f32 %v4470_v27, %v4469_v39  ;;  %v4547_v28 = vadd.f32 %v4546_v18, %v4545_v44 }
 0x1e6   : > { %v2448_v50 = vadd.f32 %v4471_v33, %v6453_v10  ;;  %v6539_v22 = vadd.f32 %v4547_v28, %v2440_v9 }
 0x1e8   : > { %v4472_v38 = vpop.f32.mrb[116].mxu1  ;;  %v4548_v51 = vpop.f32.mrb[116].mxu0 }
 0x1e9   : > { %v4473_v56 = vpop.f32.mrb[117].mxu1  ;;  %v4549_v54 = vpop.f32.mrb[117].mxu0 }
 0x1ea   : > { %v4474_v31 = vadd.f32 %v4473_v56, %v4472_v38  ;;  %v4550_v26 = vadd.f32 %v4549_v54, %v4548_v51  ;;  %v4475_v24 = vpop.f32.mrb[118].mxu1  ;;  %v4551_v32 = vpop.f32.mrb[118].mxu0 }
 0x1eb   : > { %v4476_v63 = vpop.f32.mrb[119].mxu1  ;;  %v4552_v46 = vpop.f32.mrb[119].mxu0 }
 0x1ec   : > { %v2453_v61 = vadd.f32 %v4474_v31, %v6464_v30  ;;  %v6542_v15 = vadd.f32 %v4550_v26, %v2445_v13  ;;  %v4477_v37 = vadd.f32 %v4476_v63, %v4475_v24  ;;  %v4553_v19 = vadd.f32 %v4552_v46, %v4551_v32 }
 0x1ee   : > { %v2456_v10 = vadd.f32 %v4477_v37, %v6469_v36  ;;  %v6545_v6 = vadd.f32 %v4553_v19, %v2448_v50 }
 0x1f0   : > { %v4478_v7 = vpop.f32.mrb[120].mxu1  ;;  %v4554_v11 = vpop.f32.mrb[120].mxu0 }
 0x1f1   : > { %v4479_v14 = vpop.f32.mrb[121].mxu1  ;;  %v4555_v52 = vpop.f32.mrb[121].mxu0 }
 0x1f2   : > { %v4480_v58 = vadd.f32 %v4479_v14, %v4478_v7  ;;  %v4556_v20 = vadd.f32 %v4555_v52, %v4554_v11  ;;  %v4481_v49 = vpop.f32.mrb[122].mxu1  ;;  %v4557_v21 = vpop.f32.mrb[122].mxu0 }
 0x1f3   : > { %v4482_v59 = vpop.f32.mrb[123].mxu1  ;;  %v4558_v35 = vpop.f32.mrb[123].mxu0 }
 0x1f4   : > { %v2461_v30 = vadd.f32 %v4480_v58, %v6478_v4  ;;  %v6548_v25 = vadd.f32 %v4556_v20, %v2453_v61  ;;  %v4483_v62 = vadd.f32 %v4482_v59, %v4481_v49  ;;  %v4559_v9 = vadd.f32 %v4558_v35, %v4557_v21 }
 0x1f6   : > { %v2464_v36 = vadd.f32 %v4483_v62, %v6482_v40  ;;  %v6551_v2 = vadd.f32 %v4559_v9, %v2456_v10 }
 0x1f8   : > { %v4484_v0 = vpop.f32.mrb[124].mxu1  ;;  %v4560_v3 = vpop.f32.mrb[124].mxu0 }
 0x1f9   : > { %v4485_v34 = vpop.f32.mrb[125].mxu1  ;;  %v4561_v16 = vpop.f32.mrb[125].mxu0 }
 0x1fa   : > { %v4486_v8 = vadd.f32 %v4485_v34, %v4484_v0  ;;  %v4562_v39 = vadd.f32 %v4561_v16, %v4560_v3  ;;  %v4487_v44 = vpop.f32.mrb[126].mxu1  ;;  %v4563_v27 = vpop.f32.mrb[126].mxu0 }
 0x1fb   : > { %v4488_v18 = vpop.f32.mrb[127].mxu1  ;;  %v4564_v13 = vpop.f32.mrb[127].mxu0 }
 0x1fc   : > { %v2469_v4 = vadd.f32 %v4486_v8, %v6489_v17  ;;  %v6554_v33 = vadd.f32 %v4562_v39, %v2461_v30  ;;  %v4489_v28 = vadd.f32 %v4488_v18, %v4487_v44  ;;  %v4565_v50 = vadd.f32 %v4564_v13, %v4563_v27 }
 0x1fe   : > { %v2472_v40 = vadd.f32 %v4489_v28, %v6493_v53  ;;  %v6557_v38 = vadd.f32 %v4565_v50, %v2464_v36 }
 0x200   : > { %v4490_v51 = vpop.f32.mrb[128].mxu1  ;;  %v4566_v56 = vpop.f32.mrb[128].mxu0 }
 0x201   : > { %v4491_v54 = vpop.f32.mrb[129].mxu1  ;;  %v4567_v31 = vpop.f32.mrb[129].mxu0 }
 0x202   : > { %v4492_v26 = vadd.f32 %v4491_v54, %v4490_v51  ;;  %v4568_v24 = vadd.f32 %v4567_v31, %v4566_v56  ;;  %v4493_v32 = vpop.f32.mrb[130].mxu1  ;;  %v4569_v63 = vpop.f32.mrb[130].mxu0 }
 0x203   : > { %v4494_v46 = vpop.f32.mrb[131].mxu1  ;;  %v4570_v61 = vpop.f32.mrb[131].mxu0 }
 0x204   : > { %v2477_v17 = vadd.f32 %v4492_v26, %v6499_v55  ;;  %v6560_v37 = vadd.f32 %v4568_v24, %v2469_v4  ;;  %v4495_v19 = vadd.f32 %v4494_v46, %v4493_v32  ;;  %v4571_v10 = vadd.f32 %v4570_v61, %v4569_v63 }
 0x206   : > { %v2480_v53 = vadd.f32 %v4495_v19, %v6503_v47  ;;  %v6563_v7 = vadd.f32 %v4571_v10, %v2472_v40 }
 0x208   : > { %v4496_v11 = vpop.f32.mrb[132].mxu1  ;;  %v4572_v14 = vpop.f32.mrb[132].mxu0 }
 0x209   : > { %v4497_v52 = vpop.f32.mrb[133].mxu1  ;;  %v4573_v58 = vpop.f32.mrb[133].mxu0 }
 0x20a   : > { %v4498_v20 = vadd.f32 %v4497_v52, %v4496_v11  ;;  %v4574_v49 = vadd.f32 %v4573_v58, %v4572_v14  ;;  %v4499_v21 = vpop.f32.mrb[134].mxu1  ;;  %v4575_v59 = vpop.f32.mrb[134].mxu0 }
 0x20b   : > { %v4500_v35 = vpop.f32.mrb[135].mxu1  ;;  %v4576_v30 = vpop.f32.mrb[135].mxu0 }
 0x20c   : > { %v2485_v55 = vadd.f32 %v4498_v20, %v6506_v1  ;;  %v6566_v62 = vadd.f32 %v4574_v49, %v2477_v17  ;;  %v4501_v9 = vadd.f32 %v4500_v35, %v4499_v21  ;;  %v4577_v36 = vadd.f32 %v4576_v30, %v4575_v59 }
 0x20e   : > { %v2488_v47 = vadd.f32 %v4501_v9, %v6509_v5  ;;  %v6569_v0 = vadd.f32 %v4577_v36, %v2480_v53 }
 0x210   : > { %v4502_v3 = vpop.f32.mrb[136].mxu1  ;;  %v4578_v34 = vpop.f32.mrb[136].mxu0 }
 0x211   : > { %v4503_v16 = vpop.f32.mrb[137].mxu1  ;;  %v4579_v8 = vpop.f32.mrb[137].mxu0 }
 0x212   : > { %v4504_v39 = vadd.f32 %v4503_v16, %v4502_v3  ;;  %v4580_v44 = vadd.f32 %v4579_v8, %v4578_v34  ;;  %v4505_v27 = vpop.f32.mrb[138].mxu1  ;;  %v4581_v18 = vpop.f32.mrb[138].mxu0 }
 0x213   : > { %v4506_v13 = vpop.f32.mrb[139].mxu1  ;;  %v4582_v4 = vpop.f32.mrb[139].mxu0 }
 0x214   : > { %v2493_v1 = vadd.f32 %v4504_v39, %v6512_v60  ;;  %v6572_v28 = vadd.f32 %v4580_v44, %v2485_v55  ;;  %v4507_v50 = vadd.f32 %v4506_v13, %v4505_v27  ;;  %v4583_v40 = vadd.f32 %v4582_v4, %v4581_v18 }
 0x216   : > { %v2496_v5 = vadd.f32 %v4507_v50, %v6515_v29  ;;  %v6575_v51 = vadd.f32 %v4583_v40, %v2488_v47 }
 0x218   : > { %v4508_v56 = vpop.f32.mrb[140].mxu1  ;;  %v4584_v54 = vpop.f32.mrb[140].mxu0 }
 0x219   : > { %v4509_v31 = vpop.f32.mrb[141].mxu1  ;;  %v4585_v26 = vpop.f32.mrb[141].mxu0 }
 0x21a   : > { %v4510_v24 = vadd.f32 %v4509_v31, %v4508_v56  ;;  %v4586_v32 = vadd.f32 %v4585_v26, %v4584_v54  ;;  %v4511_v63 = vpop.f32.mrb[142].mxu1  ;;  %v4587_v46 = vpop.f32.mrb[142].mxu0 }
 0x21b   : > { %v4512_v61 = vpop.f32.mrb[143].mxu1  ;;  %v4588_v17 = vpop.f32.mrb[143].mxu0 }
 0x21c   : > { %v2501_v60 = vadd.f32 %v4510_v24, %v6518_v42  ;;  %v6578_v19 = vadd.f32 %v4586_v32, %v2493_v1  ;;  %v4513_v10 = vadd.f32 %v4512_v61, %v4511_v63  ;;  %v4589_v53 = vadd.f32 %v4588_v17, %v4587_v46 }
 0x21e   : > { %v2504_v29 = vadd.f32 %v4513_v10, %v6521_v48  ;;  %v6581_v11 = vadd.f32 %v4589_v53, %v2496_v5 }
 0x220   : > { %v4514_v14 = vpop.f32.mrb[144].mxu1  ;;  %v4590_v52 = vpop.f32.mrb[144].mxu0 }
 0x221   : > { %v4515_v58 = vpop.f32.mrb[145].mxu1  ;;  %v4591_v20 = vpop.f32.mrb[145].mxu0 }
 0x222   : > { %v4516_v49 = vadd.f32 %v4515_v58, %v4514_v14  ;;  %v4592_v21 = vadd.f32 %v4591_v20, %v4590_v52  ;;  %v4517_v59 = vpop.f32.mrb[146].mxu1  ;;  %v4593_v35 = vpop.f32.mrb[146].mxu0 }
 0x223   : > { %v4518_v30 = vpop.f32.mrb[147].mxu1  ;;  %v4594_v55 = vpop.f32.mrb[147].mxu0 }
 0x224   : > { %v2509_v42 = vadd.f32 %v4516_v49, %v6524_v12  ;;  %v6584_v9 = vadd.f32 %v4592_v21, %v2501_v60  ;;  %v4519_v36 = vadd.f32 %v4518_v30, %v4517_v59  ;;  %v4595_v47 = vadd.f32 %v4594_v55, %v4593_v35 }
 0x226   : > { %v2512_v48 = vadd.f32 %v4519_v36, %v6527_v41  ;;  %v6587_v3 = vadd.f32 %v4595_v47, %v2504_v29 }
 0x228   : > { %v4520_v34 = vpop.f32.mrb[148].mxu1  ;;  %v4596_v16 = vpop.f32.mrb[148].mxu0 }
 0x229   : > { %v4521_v8 = vpop.f32.mrb[149].mxu1  ;;  %v4597_v39 = vpop.f32.mrb[149].mxu0 }
 0x22a   : > { %v4522_v44 = vadd.f32 %v4521_v8, %v4520_v34  ;;  %v4598_v27 = vadd.f32 %v4597_v39, %v4596_v16  ;;  %v4523_v18 = vpop.f32.mrb[150].mxu1  ;;  %v4599_v13 = vpop.f32.mrb[150].mxu0 }
 0x22b   : > { %v4524_v4 = vpop.f32.mrb[151].mxu1  ;;  %v4600_v1 = vpop.f32.mrb[151].mxu0 }
 0x22c   : > { %v2517_v12 = vadd.f32 %v4522_v44, %v6529_v23  ;;  %v6590_v50 = vadd.f32 %v4598_v27, %v2509_v42  ;;  %v4525_v40 = vadd.f32 %v4524_v4, %v4523_v18  ;;  %v4601_v5 = vadd.f32 %v4600_v1, %v4599_v13 }
 0x22e   : > { %v2520_v41 = vadd.f32 %v4525_v40, %v6532_v43  ;;  %v6593_v56 = vadd.f32 %v4601_v5, %v2512_v48 }
 0x230   : > { %v4602_v54 = vpop.f32.mrb[152].mxu0  ;;  %v4624_v31 = vpop.f32.mrb[152].mxu1 }
 0x231   : > { %v4603_v26 = vpop.f32.mrb[153].mxu0  ;;  %v4625_v24 = vpop.f32.mrb[153].mxu1 }
 0x232   : > { %v4604_v32 = vadd.f32 %v4603_v26, %v4602_v54  ;;  %v4626_v63 = vadd.f32 %v4625_v24, %v4624_v31  ;;  %v4605_v46 = vpop.f32.mrb[154].mxu0  ;;  %v4627_v61 = vpop.f32.mrb[154].mxu1 }
 0x233   : > { %v4606_v17 = vpop.f32.mrb[155].mxu0  ;;  %v4628_v60 = vpop.f32.mrb[155].mxu1 }
 0x234   : > { %v6595_v10 = vadd.f32 %v4604_v32, %v2517_v12  ;;  %v4607_v23 = vadd.f32 %v4606_v17, %v4605_v46  ;;  %v4629_v53 = vadd.f32 %v4628_v60, %v4627_v61  ;;  %v2679_v29 = vadd.f32 %v4626_v63, %v6536_v45 }
 0x236   : > { %v6598_v14 = vadd.f32 %v4607_v23, %v2520_v41  ;;  %v2682_v43 = vadd.f32 %v4629_v53, %v6539_v22 }
 0x238   : > { %v4630_v52 = vpop.f32.mrb[156].mxu1  ;;  %v2799_v58 = vpop.f32.mrb[156].mxu0 }
 0x239   : > { %v6601_v20 = vadd.f32 %v2799_v58, %v2679_v29  ;;  %v4631_v49 = vpop.f32.mrb[157].mxu1  ;;  %v4706_v21 = vpop.f32.mrb[157].mxu0 }
 0x23a   : > { %v4632_v59 = vadd.f32 %v4631_v49, %v4630_v52  ;;  %v4633_v35 = vpop.f32.mrb[158].mxu1  ;;  %v2802_v30 = vpop.f32.mrb[158].mxu0 }
 0x23b   : > { %v6603_v55 = vadd.f32 %v2802_v30, %v2682_v43  ;;  %v4634_v42 = vpop.f32.mrb[159].mxu1  ;;  %v4707_v36 = vpop.f32.mrb[159].mxu0  ;;  %v2887_v45 = vsel %vm2886_vm2, %v6601_v20, 0.0 }
 0x23c   : > { %v4635_v47 = vadd.f32 %v4634_v42, %v4633_v35  ;;  %2888 = vadd.xlane.f32.xlu0 %v2887_v45  ;;  %v2687_v22 = vadd.f32 %v4632_v59, %v6542_v15 }
 0x23d   : > { %v2890_v34 = vsel %vm2886_vm2, %v6603_v55, 0.0 }
 0x23e   : > { %v2690_v48 = vadd.f32 %v4635_v47, %v6545_v6 }
 0x240   : > { %v4636_v16 = vpop.f32.mrb[160].mxu1  ;;  %v2807_v8 = vpop.f32.mrb[160].mxu0  ;;  %2891 = vadd.xlane.f32.xlu0 %v2890_v34 }
 0x241   : > { %v6611_v39 = vadd.f32 %v2807_v8, %v2687_v22  ;;  %v4637_v44 = vpop.f32.mrb[161].mxu1  ;;  %v4710_v27 = vpop.f32.mrb[161].mxu0 }
 0x242   : > { %v4638_v18 = vadd.f32 %v4637_v44, %v4636_v16  ;;  %v4639_v13 = vpop.f32.mrb[162].mxu1  ;;  %v2810_v4 = vpop.f32.mrb[162].mxu0 }
 0x243   : > { %v6613_v1 = vadd.f32 %v2810_v4, %v2690_v48  ;;  %v4640_v12 = vpop.f32.mrb[163].mxu1  ;;  %v4711_v40 = vpop.f32.mrb[163].mxu0  ;;  %v2893_v15 = vsel %vm2886_vm2, %v6611_v39, 0.0 }
 0x244   : > { %v4641_v6 = vadd.f32 %v4640_v12, %v4639_v13  ;;  %2894 = vadd.xlane.f32.xlu1 %v2893_v15  ;;  %v2695_v5 = vadd.f32 %v4638_v18, %v6548_v25 }
 0x245   : > { %v2896_v54 = vsel %vm2886_vm2, %v6613_v1, 0.0 }
 0x246   : > { %v2698_v41 = vadd.f32 %v4641_v6, %v6551_v2 }
 0x248   : > { %v4642_v31 = vpop.f32.mrb[164].mxu1  ;;  %v2815_v26 = vpop.f32.mrb[164].mxu0  ;;  %2897 = vadd.xlane.f32.xlu1 %v2896_v54 }
 0x249   : > { %v6621_v24 = vadd.f32 %v2815_v26, %v2695_v5  ;;  %v4643_v32 = vpop.f32.mrb[165].mxu1  ;;  %v4714_v63 = vpop.f32.mrb[165].mxu0 }
 0x24a   : > { %v4644_v46 = vadd.f32 %v4643_v32, %v4642_v31  ;;  %v4645_v61 = vpop.f32.mrb[166].mxu1  ;;  %v2818_v17 = vpop.f32.mrb[166].mxu0 }
 0x24b   : > { %v6623_v60 = vadd.f32 %v2818_v17, %v2698_v41  ;;  %v4646_v23 = vpop.f32.mrb[167].mxu1  ;;  %v4715_v53 = vpop.f32.mrb[167].mxu0  ;;  %v2899_v25 = vsel %vm2886_vm2, %v6621_v24, 0.0 }
 0x24c   : > { %v4647_v2 = vadd.f32 %v4646_v23, %v4645_v61  ;;  %2900 = vadd.xlane.f32.xlu0 %v2899_v25  ;;  %v2703_v29 = vadd.f32 %v4644_v46, %v6554_v33 }
 0x24d   : > { %v2902_v43 = vsel %vm2886_vm2, %v6623_v60, 0.0 }
 0x24e   : > { %2903 = vadd.xlane.f32.xlu1 %v2902_v43  ;;  %v2706_v52 = vadd.f32 %v4647_v2, %v6557_v38 }
 0x250   : > { %v4648_v58 = vpop.f32.mrb[168].mxu1  ;;  %v2823_v49 = vpop.f32.mrb[168].mxu0 }
 0x251   : > { %v6631_v21 = vadd.f32 %v2823_v49, %v2703_v29  ;;  %v4649_v59 = vpop.f32.mrb[169].mxu1  ;;  %v4718_v35 = vpop.f32.mrb[169].mxu0 }
 0x252   : > { %v4650_v30 = vadd.f32 %v4649_v59, %v4648_v58  ;;  %v4651_v42 = vpop.f32.mrb[170].mxu1  ;;  %v2826_v36 = vpop.f32.mrb[170].mxu0 }
 0x253   : > { %v6633_v45 = vadd.f32 %v2826_v36, %v2706_v52  ;;  %v4652_v47 = vpop.f32.mrb[171].mxu1  ;;  %v4719_v22 = vpop.f32.mrb[171].mxu0  ;;  %v2905_v33 = vsel %vm2886_vm2, %v6631_v21, 0.0 }
 0x254   : > { %v4653_v48 = vadd.f32 %v4652_v47, %v4651_v42  ;;  %2906 = vadd.xlane.f32.xlu0 %v2905_v33  ;;  %v2711_v38 = vadd.f32 %v4650_v30, %v6560_v37 }
 0x255   : > { %v2908_v34 = vsel %vm2886_vm2, %v6633_v45, 0.0 }
 0x256   : > { %2909 = vadd.xlane.f32.xlu1 %v2908_v34  ;;  %v2714_v16 = vadd.f32 %v4653_v48, %v6563_v7 }
 0x258   : > { %v4654_v8 = vpop.f32.mrb[172].mxu1  ;;  %v2831_v44 = vpop.f32.mrb[172].mxu0 }
 0x259   : > { %v6641_v27 = vadd.f32 %v2831_v44, %v2711_v38  ;;  %v4655_v18 = vpop.f32.mrb[173].mxu1  ;;  %v4722_v13 = vpop.f32.mrb[173].mxu0 }
 0x25a   : > { %v4656_v4 = vadd.f32 %v4655_v18, %v4654_v8  ;;  %v4657_v12 = vpop.f32.mrb[174].mxu1  ;;  %v2834_v40 = vpop.f32.mrb[174].mxu0 }
 0x25b   : > { %v6643_v15 = vadd.f32 %v2834_v40, %v2714_v16  ;;  %v4658_v6 = vpop.f32.mrb[175].mxu1  ;;  %v4723_v5 = vpop.f32.mrb[175].mxu0  ;;  %v2911_v37 = vsel %vm2886_vm2, %v6641_v27, 0.0 }
 0x25c   : > { %v4659_v41 = vadd.f32 %v4658_v6, %v4657_v12  ;;  %2912 = vadd.xlane.f32.xlu0 %v2911_v37  ;;  %v2719_v7 = vadd.f32 %v4656_v4, %v6566_v62 }
 0x25d   : > { %v2914_v54 = vsel %vm2886_vm2, %v6643_v15, 0.0 }
 0x25e   : > { %2915 = vadd.xlane.f32.xlu1 %v2914_v54  ;;  %v2722_v31 = vadd.f32 %v4659_v41, %v6569_v0 }
 0x260   : > { %v4660_v26 = vpop.f32.mrb[176].mxu1  ;;  %v2839_v32 = vpop.f32.mrb[176].mxu0 }
 0x261   : > { %v6651_v63 = vadd.f32 %v2839_v32, %v2719_v7  ;;  %v4661_v46 = vpop.f32.mrb[177].mxu1  ;;  %v4726_v61 = vpop.f32.mrb[177].mxu0 }
 0x262   : > { %v4662_v17 = vadd.f32 %v4661_v46, %v4660_v26  ;;  %v4663_v23 = vpop.f32.mrb[178].mxu1  ;;  %v2842_v53 = vpop.f32.mrb[178].mxu0 }
 0x263   : > { %v6653_v25 = vadd.f32 %v2842_v53, %v2722_v31  ;;  %v4664_v2 = vpop.f32.mrb[179].mxu1  ;;  %v4727_v29 = vpop.f32.mrb[179].mxu0  ;;  %v2917_v62 = vsel %vm2886_vm2, %v6651_v63, 0.0 }
 0x264   : > { %v4665_v43 = vadd.f32 %v4664_v2, %v4663_v23  ;;  %2918 = vadd.xlane.f32.xlu0 %v2917_v62  ;;  %v2727_v0 = vadd.f32 %v4662_v17, %v6572_v28 }
 0x265   : > { %v2920_v52 = vsel %vm2886_vm2, %v6653_v25, 0.0 }
 0x266   : > { %2921 = vadd.xlane.f32.xlu1 %v2920_v52  ;;  %v2730_v58 = vadd.f32 %v4665_v43, %v6575_v51 }
 0x268   : > { %v4666_v49 = vpop.f32.mrb[180].mxu1  ;;  %v2847_v59 = vpop.f32.mrb[180].mxu0 }
 0x269   : > { %v6661_v35 = vadd.f32 %v2847_v59, %v2727_v0  ;;  %v4667_v30 = vpop.f32.mrb[181].mxu1  ;;  %v4730_v42 = vpop.f32.mrb[181].mxu0 }
 0x26a   : > { %v4668_v36 = vadd.f32 %v4667_v30, %v4666_v49  ;;  %v4669_v47 = vpop.f32.mrb[182].mxu1  ;;  %v2850_v22 = vpop.f32.mrb[182].mxu0 }
 0x26b   : > { %v6663_v33 = vadd.f32 %v2850_v22, %v2730_v58  ;;  %v4670_v48 = vpop.f32.mrb[183].mxu1  ;;  %v4731_v38 = vpop.f32.mrb[183].mxu0  ;;  %v2923_v28 = vsel %vm2886_vm2, %v6661_v35, 0.0 }
 0x26c   : > { %v4671_v34 = vadd.f32 %v4670_v48, %v4669_v47  ;;  %2924 = vadd.xlane.f32.xlu0 %v2923_v28  ;;  %v2735_v51 = vadd.f32 %v4668_v36, %v6578_v19 }
 0x26d   : > { %v2926_v16 = vsel %vm2886_vm2, %v6663_v33, 0.0 }
 0x26e   : > { %2927 = vadd.xlane.f32.xlu1 %v2926_v16  ;;  %v2738_v8 = vadd.f32 %v4671_v34, %v6581_v11 }
 0x270   : > { %v4672_v44 = vpop.f32.mrb[184].mxu1  ;;  %v2855_v18 = vpop.f32.mrb[184].mxu0 }
 0x271   : > { %v6671_v13 = vadd.f32 %v2855_v18, %v2735_v51  ;;  %v4673_v4 = vpop.f32.mrb[185].mxu1  ;;  %v4734_v12 = vpop.f32.mrb[185].mxu0 }
 0x272   : > { %v4674_v40 = vadd.f32 %v4673_v4, %v4672_v44  ;;  %v4675_v6 = vpop.f32.mrb[186].mxu1  ;;  %v2858_v5 = vpop.f32.mrb[186].mxu0 }
 0x273   : > { %v6673_v37 = vadd.f32 %v2858_v5, %v2738_v8  ;;  %v4676_v41 = vpop.f32.mrb[187].mxu1  ;;  %v4735_v7 = vpop.f32.mrb[187].mxu0  ;;  %v2929_v19 = vsel %vm2886_vm2, %v6671_v13, 0.0 }
 0x274   : > { %v4677_v54 = vadd.f32 %v4676_v41, %v4675_v6  ;;  %2930 = vadd.xlane.f32.xlu0 %v2929_v19  ;;  %v2743_v11 = vadd.f32 %v4674_v40, %v6584_v9  ;;  %v6708_v7 = vld [vmem:[%s6443_s17 + $0x38] sm:$0xff]  ;;  %v6717_v19 = vpop.permute.xlu1 %3352 }
 0x275   : > { %v2932_v31 = vsel %vm2886_vm2, %v6673_v37, 0.0 }
 0x276   : > { %2933 = vadd.xlane.f32.xlu1 %v2932_v31  ;;  %v2746_v26 = vadd.f32 %v4677_v54, %v6587_v3  ;;  %v6719_v54 = vpop.permute.xlu0 %3357 }
 0x278   : > { %v4678_v32 = vpop.f32.mrb[188].mxu1  ;;  %v2863_v46 = vpop.f32.mrb[188].mxu0 }
 0x279   : > { %v6681_v61 = vadd.f32 %v2863_v46, %v2743_v11  ;;  %v4679_v17 = vpop.f32.mrb[189].mxu1  ;;  %v4738_v23 = vpop.f32.mrb[189].mxu0 }
 0x27a   : > { %v4680_v53 = vadd.f32 %v4679_v17, %v4678_v32  ;;  %v4681_v2 = vpop.f32.mrb[190].mxu1  ;;  %v2866_v29 = vpop.f32.mrb[190].mxu0 }
 0x27b   : > { %v6683_v62 = vadd.f32 %v2866_v29, %v2746_v26  ;;  %v4682_v43 = vpop.f32.mrb[191].mxu1  ;;  %v4739_v0 = vpop.f32.mrb[191].mxu0  ;;  %v2935_v9 = vsel %vm2886_vm2, %v6681_v61, 0.0 }
 0x27c   : > { %v4683_v52 = vadd.f32 %v4682_v43, %v4681_v2  ;;  %2936 = vadd.xlane.f32.xlu0 %v2935_v9  ;;  %v2751_v3 = vadd.f32 %v4680_v53, %v6590_v50  ;;  %v6721_v11 = vpop.permute.xlu1 %3362  ;;  %v6723_v31 = vpop.permute.xlu0 %3372 }
 0x27d   : > { %v2938_v58 = vsel %vm2886_vm2, %v6683_v62, 0.0 }
 0x27e   : > { %2939 = vadd.xlane.f32.xlu1 %v2938_v58  ;;  %v2754_v49 = vadd.f32 %v4683_v52, %v6593_v56 }
 0x280   : > { %v4684_v59 = vpop.f32.mrb[192].mxu1  ;;  %v2871_v30 = vpop.f32.mrb[192].mxu0 }
 0x281   : > { %v6691_v42 = vadd.f32 %v2871_v30, %v2751_v3  ;;  %v4685_v36 = vpop.f32.mrb[193].mxu1  ;;  %v4742_v47 = vpop.f32.mrb[193].mxu0 }
 0x282   : > { %v4686_v22 = vadd.f32 %v4685_v36, %v4684_v59  ;;  %v4687_v48 = vpop.f32.mrb[194].mxu1  ;;  %v2874_v38 = vpop.f32.mrb[194].mxu0 }
 0x283   : > { %v6693_v28 = vadd.f32 %v2874_v38, %v2754_v49  ;;  %v4688_v34 = vpop.f32.mrb[195].mxu1  ;;  %v4743_v51 = vpop.f32.mrb[195].mxu0  ;;  %v2941_v50 = vsel %vm2886_vm2, %v6691_v42, 0.0 }
 0x284   : > { %v4689_v16 = vadd.f32 %v4688_v34, %v4687_v48  ;;  %2942 = vadd.xlane.f32.xlu0 %v2941_v50  ;;  %v2759_v56 = vadd.f32 %v4686_v22, %v6595_v10  ;;  %v6712_v10 = vld [vmem:[%s6443_s17 + $0x30] sm:$0xff]  ;;  %v6725_v26 = vpop.permute.xlu1 %3367 }
 0x285   : > { %v2944_v8 = vsel %vm2886_vm2, %v6693_v28, 0.0 }
 0x286   : > { %2945 = vadd.xlane.f32.xlu1 %v2944_v8  ;;  %v2762_v44 = vadd.f32 %v4689_v16, %v6598_v14 }
 0x288   : > { %v2879_v18 = vpop.f32.mrb[196].mxu0  ;;  %v6730_v23 = vpop.permute.xlu1 %3377 }
 0x289   : > { %v6701_v4 = vadd.f32 %v2879_v18, %v2759_v56  ;;  %v4746_v12 = vpop.f32.mrb[197].mxu0 }
 0x28a   : > { %v2882_v40 = vpop.f32.mrb[198].mxu0 }
 0x28b   : > { %v6703_v6 = vadd.f32 %v2882_v40, %v2762_v44  ;;  %v2947_v5 = vsel %vm2886_vm2, %v6701_v4, 0.0  ;;  %v4747_v41 = vpop.f32.mrb[199].mxu0 }
 0x28c   : > { %2948 = vadd.xlane.f32.xlu0 %v2947_v5 }
 0x28d   : > { %v2950_v14 = vsel %vm2886_vm2, %v6703_v6, 0.0 }
 0x297   : > { %3387 = vperm.xlu1 %4859, %v6708_v7  }
 0x2a2   : > { %3382 = vperm.xlu0 %4860, %v6712_v10  }
 0x2bb   : > { %2951 = vadd.xlane.f32.xlu1 %v2950_v14 }
 0x2c9   : > { %v2889_v32 = vpop.xlane.xlu0 %2888 }
 0x2ca   : > { %v2954_v46 = vmul.f32 0.020408163, %v2889_v32 }
 0x2cc   : > { %v6728_v17 = vsub.f32 %v6601_v20, %v2954_v46 }
 0x2cd   : > { %v2892_v53 = vpop.xlane.xlu0 %2891 }
 0x2ce   : > { %v2955_v2 = vmul.f32 0.020408163, %v2892_v53  ;;  %v2998_v29 = vmul.f32 %v6728_v17, %v6728_v17 }
 0x2d0   : > { %v6735_v43 = vsub.f32 %v6603_v55, %v2955_v2  ;;  %v3020_v0 = vsel %vm2886_vm2, %v2998_v29, 0.0 }
 0x2d1   : > { %v2895_v9 = vpop.xlane.xlu1 %2894  ;;  %3021 = vadd.xlane.f32.xlu0 %v3020_v0 }
 0x2d2   : > { %v2956_v52 = vmul.f32 0.020408163, %v2895_v9  ;;  %v2999_v3 = vmul.f32 %v6735_v43, %v6735_v43 }
 0x2d4   : > { %v6741_v20 = vsub.f32 %v6611_v39, %v2956_v52  ;;  %v3023_v58 = vsel %vm2886_vm2, %v2999_v3, 0.0 }
 0x2d5   : > { %v2898_v49 = vpop.xlane.xlu1 %2897  ;;  %3024 = vadd.xlane.f32.xlu1 %v3023_v58 }
 0x2d6   : > { %v2957_v59 = vmul.f32 0.020408163, %v2898_v49  ;;  %v3000_v55 = vmul.f32 %v6741_v20, %v6741_v20 }
 0x2d8   : > { %v6747_v30 = vsub.f32 %v6613_v1, %v2957_v59  ;;  %v3026_v36 = vsel %vm2886_vm2, %v3000_v55, 0.0 }
 0x2d9   : > { %3027 = vadd.xlane.f32.xlu0 %v3026_v36  ;;  %v2901_v47 = vpop.xlane.xlu0 %2900 }
 0x2da   : > { %v2958_v22 = vmul.f32 0.020408163, %v2901_v47  ;;  %v3001_v39 = vmul.f32 %v6747_v30, %v6747_v30 }
 0x2db   : > { %v2904_v48 = vpop.xlane.xlu1 %2903 }
 0x2dc   : > { %v6753_v38 = vsub.f32 %v6621_v24, %v2958_v22  ;;  %v2959_v34 = vmul.f32 0.020408163, %v2904_v48  ;;  %v3029_v51 = vsel %vm2886_vm2, %v3001_v39, 0.0 }
 0x2dd   : > { %3030 = vadd.xlane.f32.xlu1 %v3029_v51 }
 0x2de   : > { %v6757_v50 = vsub.f32 %v6623_v60, %v2959_v34  ;;  %v3002_v1 = vmul.f32 %v6753_v38, %v6753_v38 }
 0x2e0   : > { %v3032_v16 = vsel %vm2886_vm2, %v3002_v1, 0.0  ;;  %v3003_v56 = vmul.f32 %v6757_v50, %v6757_v50 }
 0x2e1   : > { %3033 = vadd.xlane.f32.xlu0 %v3032_v16  ;;  %v2907_v8 = vpop.xlane.xlu0 %2906 }
 0x2e2   : > { %v2960_v44 = vmul.f32 0.020408163, %v2907_v8  ;;  %v3035_v24 = vsel %vm2886_vm2, %v3003_v56, 0.0 }
 0x2e3   : > { %v2910_v18 = vpop.xlane.xlu1 %2909  ;;  %3036 = vadd.xlane.f32.xlu1 %v3035_v24 }
 0x2e4   : > { %v6766_v12 = vsub.f32 %v6631_v21, %v2960_v44  ;;  %v2961_v60 = vmul.f32 0.020408163, %v2910_v18 }
 0x2e6   : > { %v6769_v40 = vsub.f32 %v6633_v45, %v2961_v60  ;;  %v3004_v5 = vmul.f32 %v6766_v12, %v6766_v12 }
 0x2e8   : > { %v3038_v41 = vsel %vm2886_vm2, %v3004_v5, 0.0  ;;  %v3005_v14 = vmul.f32 %v6769_v40, %v6769_v40 }
 0x2e9   : > { %3039 = vadd.xlane.f32.xlu0 %v3038_v41  ;;  %v2913_v32 = vpop.xlane.xlu0 %2912 }
 0x2ea   : > { %v2962_v46 = vmul.f32 0.020408163, %v2913_v32  ;;  %v3041_v53 = vsel %vm2886_vm2, %v3005_v14, 0.0 }
 0x2eb   : > { %v2916_v2 = vpop.xlane.xlu1 %2915  ;;  %3042 = vadd.xlane.f32.xlu1 %v3041_v53 }
 0x2ec   : > { %v6778_v21 = vsub.f32 %v6641_v27, %v2962_v46  ;;  %v2963_v45 = vmul.f32 0.020408163, %v2916_v2 }
 0x2ee   : > { %v6781_v29 = vsub.f32 %v6643_v15, %v2963_v45  ;;  %v3006_v0 = vmul.f32 %v6778_v21, %v6778_v21 }
 0x2f0   : > { %v3044_v9 = vsel %vm2886_vm2, %v3006_v0, 0.0  ;;  %v3007_v52 = vmul.f32 %v6781_v29, %v6781_v29 }
 0x2f1   : > { %3045 = vadd.xlane.f32.xlu0 %v3044_v9  ;;  %v2919_v3 = vpop.xlane.xlu0 %2918 }
 0x2f2   : > { %v2964_v58 = vmul.f32 0.020408163, %v2919_v3  ;;  %v3047_v49 = vsel %vm2886_vm2, %v3007_v52, 0.0 }
 0x2f3   : > { %v2922_v59 = vpop.xlane.xlu1 %2921  ;;  %3048 = vadd.xlane.f32.xlu1 %v3047_v49 }
 0x2f4   : > { %v6790_v27 = vsub.f32 %v6651_v63, %v2964_v58  ;;  %v2965_v15 = vmul.f32 0.020408163, %v2922_v59 }
 0x2f6   : > { %v6793_v55 = vsub.f32 %v6653_v25, %v2965_v15  ;;  %v3008_v36 = vmul.f32 %v6790_v27, %v6790_v27 }
 0x2f8   : > { %v3050_v47 = vsel %vm2886_vm2, %v3008_v36, 0.0  ;;  %v3009_v22 = vmul.f32 %v6793_v55, %v6793_v55 }
 0x2f9   : > { %3051 = vadd.xlane.f32.xlu0 %v3050_v47  ;;  %v2925_v39 = vpop.xlane.xlu0 %2924 }
 0x2fa   : > { %v2966_v48 = vmul.f32 0.020408163, %v2925_v39  ;;  %v3053_v34 = vsel %vm2886_vm2, %v3009_v22, 0.0 }
 0x2fb   : > { %v2928_v51 = vpop.xlane.xlu1 %2927  ;;  %3054 = vadd.xlane.f32.xlu1 %v3053_v34 }
 0x2fc   : > { %v6802_v63 = vsub.f32 %v6661_v35, %v2966_v48  ;;  %v2967_v25 = vmul.f32 0.020408163, %v2928_v51 }
 0x2fe   : > { %v6805_v1 = vsub.f32 %v6663_v33, %v2967_v25  ;;  %v3010_v16 = vmul.f32 %v6802_v63, %v6802_v63 }
 0x300   : > { %v3056_v56 = vsel %vm2886_vm2, %v3010_v16, 0.0  ;;  %v3011_v8 = vmul.f32 %v6805_v1, %v6805_v1  ;;  %v6856_v16 = vld [vmem:[%s6443_s17 + $0x48] sm:$0xff] }
 0x301   : > { %3057 = vadd.xlane.f32.xlu0 %v3056_v56  ;;  %v2931_v44 = vpop.xlane.xlu0 %2930  ;;  %v6860_v56 = vld [vmem:[%s6443_s17 + $0x58] sm:$0xff] }
 0x302   : > { %v2968_v24 = vmul.f32 0.020408163, %v2931_v44  ;;  %v3059_v18 = vsel %vm2886_vm2, %v3011_v8, 0.0  ;;  %v6864_v8 = vld [vmem:[%s6443_s17 + $0x68] sm:$0xff]  ;;  %v6871_v44 = vld [vmem:[%s6443_s17 + $0x78] sm:$0xff] }
 0x303   : > { %v2934_v60 = vpop.xlane.xlu1 %2933  ;;  %3060 = vadd.xlane.f32.xlu1 %v3059_v18  ;;  %v6879_v18 = vld [vmem:[%s6443_s17 + $0x88] sm:$0xff] }
 0x304   : > { %v6814_v35 = vsub.f32 %v6671_v13, %v2968_v24  ;;  %v2969_v33 = vmul.f32 0.020408163, %v2934_v60  ;;  %v6876_v24 = vld [vmem:[%s6443_s17 + $0x50] sm:$0xff]  ;;  %v6884_v60 = vld [vmem:[%s6443_s17 + $0x60] sm:$0xff] }
 0x306   : > { %v6817_v5 = vsub.f32 %v6673_v37, %v2969_v33  ;;  %v3012_v41 = vmul.f32 %v6814_v35, %v6814_v35  ;;  %v6888_v33 = vld [vmem:[%s6443_s17 + $0x70] sm:$0xff] }
 0x308   : > { %v3062_v14 = vsel %vm2886_vm2, %v3012_v41, 0.0  ;;  %v3013_v32 = vmul.f32 %v6817_v5, %v6817_v5  ;;  %v6892_v41 = vld [vmem:[%s6443_s17 + $0x80] sm:$0xff] }
 0x309   : > { %3063 = vadd.xlane.f32.xlu0 %v3062_v14  ;;  %v2937_v46 = vpop.xlane.xlu0 %2936  ;;  %v6896_v14 = vld [vmem:[%s6443_s17 + $0x90] sm:$0xff] }
 0x30a   : > { %v2970_v53 = vmul.f32 0.020408163, %v2937_v46  ;;  %v3065_v2 = vsel %vm2886_vm2, %v3013_v32, 0.0  ;;  %v5285_v46 = vmov 0  }
 0x30b   : > { %v2940_v45 = vpop.xlane.xlu1 %2939  ;;  %3066 = vadd.xlane.f32.xlu1 %v3065_v2 }
 0x30c   : > { %v6826_v13 = vsub.f32 %v6681_v61, %v2970_v53  ;;  %v2971_v37 = vmul.f32 0.020408163, %v2940_v45 }
 0x30e   : > { %v6829_v0 = vsub.f32 %v6683_v62, %v2971_v37  ;;  %v3014_v9 = vmul.f32 %v6826_v13, %v6826_v13 }
 0x310   : > { %v3068_v52 = vsel %vm2886_vm2, %v3014_v9, 0.0  ;;  %v3015_v3 = vmul.f32 %v6829_v0, %v6829_v0 }
 0x311   : > { %3069 = vadd.xlane.f32.xlu0 %v3068_v52  ;;  %v2943_v58 = vpop.xlane.xlu0 %2942 }
 0x312   : > { %v2972_v49 = vmul.f32 0.020408163, %v2943_v58  ;;  %v3071_v59 = vsel %vm2886_vm2, %v3015_v3, 0.0 }
 0x313   : > { %v2946_v15 = vpop.xlane.xlu1 %2945  ;;  %3072 = vadd.xlane.f32.xlu1 %v3071_v59 }
 0x314   : > { %v6838_v61 = vsub.f32 %v6691_v42, %v2972_v49  ;;  %v2973_v62 = vmul.f32 0.020408163, %v2946_v15 }
 0x316   : > { %v6841_v36 = vsub.f32 %v6693_v28, %v2973_v62  ;;  %v3016_v47 = vmul.f32 %v6838_v61, %v6838_v61 }
 0x317   : > { %v6899_v32 = vpop.permute.xlu1 %3387 }
 0x318   : > { %v3074_v22 = vsel %vm2886_vm2, %v3016_v47, 0.0  ;;  %v3017_v39 = vmul.f32 %v6841_v36, %v6841_v36 }
 0x319   : > { %3075 = vadd.xlane.f32.xlu0 %v3074_v22  ;;  %v2949_v48 = vpop.xlane.xlu0 %2948 }
 0x31a   : > { %v2974_v42 = vmul.f32 0.020408163, %v2949_v48  ;;  %v3077_v34 = vsel %vm2886_vm2, %v3017_v39, 0.0 }
 0x31b   : > { %3078 = vadd.xlane.f32.xlu1 %v3077_v34 }
 0x31c   : > { %v6850_v28 = vsub.f32 %v6701_v4, %v2974_v42  ;;  %v6868_v4 = vld [vmem:[%s6443_s17 + $0x40] sm:$0xff] }
 0x31e   : > { %v3018_v51 = vmul.f32 %v6850_v28, %v6850_v28 }
 0x320   : > { %v3080_v25 = vsel %vm2886_vm2, %v3018_v51, 0.0 }
 0x321   : > { %3081 = vadd.xlane.f32.xlu0 %v3080_v25  ;;  %v6904_v37 = vpop.permute.xlu0 %3382 }
 0x32c   : > { %3397 = vperm.xlu1 %4859, %v6856_v16  }
 0x330   : > { %3407 = vperm.xlu1 %4859, %v6860_v56  }
 0x334   : > { %3417 = vperm.xlu1 %4859, %v6864_v8  }
 0x337   : > { %3392 = vperm.xlu0 %4860, %v6868_v4  }
 0x338   : > { %3427 = vperm.xlu1 %4859, %v6871_v44  }
 0x33b   : > { %3402 = vperm.xlu0 %4860, %v6876_v24  }
 0x33c   : > { %3437 = vperm.xlu1 %4859, %v6879_v18  }
 0x33f   : > { %3412 = vperm.xlu0 %4860, %v6884_v60  }
 0x343   : > { %3422 = vperm.xlu0 %4860, %v6888_v33  }
 0x347   : > { %3432 = vperm.xlu0 %4860, %v6892_v41  }
 0x348   : > { %v2952_v53 = vpop.xlane.xlu1 %2951 }
 0x349   : > { %v2975_v2 = vmul.f32 0.020408163, %v2952_v53 }
 0x34b   : > { %3442 = vperm.xlu0 %4860, %v6896_v14   ;;  %v6902_v45 = vsub.f32 %v6703_v6, %v2975_v2  ;;  %v6910_v2 = vld [vmem:[%s6443_s17 + $0x98] sm:$0xff] }
 0x34d   : > { %v3019_v9 = vmul.f32 %v6902_v45, %v6902_v45 }
 0x34f   : > { %4861 = vset.pattern.permute.xlu0 %v5285_v46  ;;  %v3083_v58 = vsel %vm2886_vm2, %v3019_v9, 0.0 }
 0x35e   : > { %v3022_v52 = vpop.xlane.xlu0 %3021 }
 0x35f   : > { %v3086_v3 = vmul.f32 0.020408163, %v3022_v52 }
 0x360   : > { %3084 = vadd.xlane.f32.xlu1 %v3083_v58 }
 0x361   : > { %v3108_v49 = vmax.f32 %v3086_v3, 0.0 }
 0x362   : > { %v3025_v59 = vpop.xlane.xlu1 %3024 }
 0x363   : > { %v3130_v15 = vadd.f32 1e-05, %v3108_v49  ;;  %v3087_v62 = vmul.f32 0.020408163, %v3025_v59  ;;  %v5184_v49 = vld [vmem:[%s6443_s17] sm:$0xff] }
 0x365   : > { %5140 = vrsqrt.f32 %v3130_v15  ;;  %v3109_v47 = vmax.f32 %v3087_v62, 0.0 }
 0x366   : > { %v3028_v22 = vpop.xlane.xlu0 %3027 }
 0x367   : > { %v3131_v6 = vadd.f32 1e-05, %v3109_v47  ;;  %v3088_v39 = vmul.f32 0.020408163, %v3028_v22 }
 0x369   : > { %5142 = vrsqrt.f32 %v3131_v6  ;;  %v3110_v48 = vmax.f32 %v3088_v39, 0.0  ;;  %v5185_v39 = vld [vmem:[%s6443_s17 + $0x8] sm:$0xff] }
 0x36a   : > { %v3031_v42 = vpop.xlane.xlu1 %3030 }
 0x36b   : > { %v3132_v34 = vadd.f32 1e-05, %v3110_v48  ;;  %v3089_v51 = vmul.f32 0.020408163, %v3031_v42 }
 0x36d   : > { %5144 = vrsqrt.f32 %v3132_v34  ;;  %v3111_v25 = vmax.f32 %v3089_v51, 0.0 }
 0x36e   : > { %v3034_v53 = vpop.xlane.xlu0 %3033 }
 0x36f   : > { %v5141_v9 = vpop.eup %5140  ;;  %v3133_v52 = vadd.f32 1e-05, %v3111_v25  ;;  %v3090_v3 = vmul.f32 0.020408163, %v3034_v53 }
 0x370   : > { %v3037_v58 = vpop.xlane.xlu1 %3036  ;;  %v3196_v59 = vmul.f32 %v5184_v49, %v5141_v9  ;;  %v5186_v9 = vld [vmem:[%s6443_s17 + $0x10] sm:$0xff] }
 0x371   : > { %5146 = vrsqrt.f32 %v3133_v52  ;;  %v3112_v15 = vmax.f32 %v3090_v3, 0.0  ;;  %v3091_v62 = vmul.f32 0.020408163, %v3037_v58  ;;  %3447 = vperm.xlu1 %4859, %v6910_v2  }
 0x372   : > { %3220 = vperm.xlu0 %4861, %v3196_v59  }
 0x373   : > { %v5143_v47 = vpop.eup %5142  ;;  %v3134_v22 = vadd.f32 1e-05, %v3112_v15  ;;  %v3113_v6 = vmax.f32 %v3091_v62, 0.0  ;;  %v5187_v62 = vld [vmem:[%s6443_s17 + $0x18] sm:$0xff] }
 0x374   : > { %v3197_v48 = vmul.f32 %v5185_v39, %v5143_v47 }
 0x375   : > { %5148 = vrsqrt.f32 %v3134_v22  ;;  %v3135_v42 = vadd.f32 1e-05, %v3113_v6  ;;  %4862 = vset.pattern.permute.xlu1 %v5285_v46 }
 0x376   : > { %3225 = vperm.xlu1 %4862, %v3197_v48   ;;  %v3040_v34 = vpop.xlane.xlu0 %3039 }
 0x377   : > { %v5145_v51 = vpop.eup %5144  ;;  %5150 = vrsqrt.f32 %v3135_v42  ;;  %v3092_v25 = vmul.f32 0.020408163, %v3040_v34  ;;  %v5188_v42 = vld [vmem:[%s6443_s17 + $0x20] sm:$0xff] }
 0x378   : > { %v3043_v53 = vpop.xlane.xlu1 %3042  ;;  %v3198_v52 = vmul.f32 %v5186_v9, %v5145_v51 }
 0x379   : > { %v3114_v3 = vmax.f32 %v3092_v25, 0.0  ;;  %v3093_v58 = vmul.f32 0.020408163, %v3043_v53 }
 0x37a   : > { %3230 = vperm.xlu1 %4862, %v3198_v52  }
 0x37b   : > { %v5147_v49 = vpop.eup %5146  ;;  %v3136_v59 = vadd.f32 1e-05, %v3114_v3  ;;  %v3115_v15 = vmax.f32 %v3093_v58, 0.0  ;;  %v5189_v3 = vld [vmem:[%s6443_s17 + $0x28] sm:$0xff] }
 0x37c   : > { %v3199_v47 = vmul.f32 %v5187_v62, %v5147_v49 }
 0x37d   : > { %5152 = vrsqrt.f32 %v3136_v59  ;;  %v3137_v46 = vadd.f32 1e-05, %v3115_v15 }
 0x37e   : > { %3235 = vperm.xlu1 %4862, %v3199_v47   ;;  %v3046_v22 = vpop.xlane.xlu0 %3045 }
 0x37f   : > { %v5149_v6 = vpop.eup %5148  ;;  %5154 = vrsqrt.f32 %v3137_v46  ;;  %v3094_v39 = vmul.f32 0.020408163, %v3046_v22 }
 0x380   : > { %v3049_v48 = vpop.xlane.xlu1 %3048  ;;  %v3200_v34 = vmul.f32 %v5188_v42, %v5149_v6 }
 0x381   : > { %v5151_v51 = vpop.eup %5150  ;;  %v3116_v25 = vmax.f32 %v3094_v39, 0.0  ;;  %v3095_v53 = vmul.f32 0.020408163, %v3049_v48 }
 0x382   : > { %3240 = vperm.xlu1 %4862, %v3200_v34   ;;  %v3201_v58 = vmul.f32 %v5189_v3, %v5151_v51 }
 0x383   : > { %v3138_v9 = vadd.f32 1e-05, %v3116_v25  ;;  %v3117_v52 = vmax.f32 %v3095_v53, 0.0 }
 0x385   : > { %5156 = vrsqrt.f32 %v3138_v9  ;;  %v3139_v49 = vadd.f32 1e-05, %v3117_v52 }
 0x386   : > { %3245 = vperm.xlu1 %4862, %v3201_v58   ;;  %v3052_v59 = vpop.xlane.xlu0 %3051 }
 0x387   : > { %v5153_v15 = vpop.eup %5152  ;;  %5158 = vrsqrt.f32 %v3139_v49  ;;  %v3096_v62 = vmul.f32 0.020408163, %v3052_v59 }
 0x388   : > { %v3055_v47 = vpop.xlane.xlu1 %3054  ;;  %v3202_v46 = vmul.f32 %v5153_v15, %v6712_v10 }
 0x389   : > { %v5155_v22 = vpop.eup %5154  ;;  %v3118_v6 = vmax.f32 %v3096_v62, 0.0  ;;  %v3097_v42 = vmul.f32 0.020408163, %v3055_v47 }
 0x38a   : > { %3250 = vperm.xlu1 %4862, %v3202_v46   ;;  %v3203_v34 = vmul.f32 %v5155_v22, %v6708_v7 }
 0x38b   : > { %v3140_v39 = vadd.f32 1e-05, %v3118_v6  ;;  %v3119_v48 = vmax.f32 %v3097_v42, 0.0 }
 0x38d   : > { %5160 = vrsqrt.f32 %v3140_v39  ;;  %v3141_v51 = vadd.f32 1e-05, %v3119_v48 }
 0x38e   : > { %3255 = vperm.xlu1 %4862, %v3203_v34   ;;  %v3058_v25 = vpop.xlane.xlu0 %3057 }
 0x38f   : > { %v5157_v53 = vpop.eup %5156  ;;  %5162 = vrsqrt.f32 %v3141_v51  ;;  %v3098_v9 = vmul.f32 0.020408163, %v3058_v25 }
 0x390   : > { %v3061_v52 = vpop.xlane.xlu1 %3060  ;;  %v3204_v3 = vmul.f32 %v5157_v53, %v6868_v4 }
 0x391   : > { %v5159_v58 = vpop.eup %5158  ;;  %v3120_v10 = vmax.f32 %v3098_v9, 0.0  ;;  %v3099_v49 = vmul.f32 0.020408163, %v3061_v52 }
 0x392   : > { %3260 = vperm.xlu1 %4862, %v3204_v3   ;;  %v3205_v59 = vmul.f32 %v5159_v58, %v6856_v16 }
 0x393   : > { %v3142_v15 = vadd.f32 1e-05, %v3120_v10  ;;  %v3121_v62 = vmax.f32 %v3099_v49, 0.0 }
 0x394   : > { %3265 = vperm.xlu0 %4861, %v3205_v59  }
 0x395   : > { %5164 = vrsqrt.f32 %v3142_v15  ;;  %v3143_v7 = vadd.f32 1e-05, %v3121_v62 }
 0x396   : > { %v3064_v47 = vpop.xlane.xlu0 %3063 }
 0x397   : > { %v5161_v46 = vpop.eup %5160  ;;  %5166 = vrsqrt.f32 %v3143_v7  ;;  %v3100_v22 = vmul.f32 0.020408163, %v3064_v47 }
 0x398   : > { %v3067_v6 = vpop.xlane.xlu1 %3066  ;;  %v3206_v42 = vmul.f32 %v5161_v46, %v6876_v24 }
 0x399   : > { %v5163_v39 = vpop.eup %5162  ;;  %v3122_v4 = vmax.f32 %v3100_v22, 0.0  ;;  %v3101_v48 = vmul.f32 0.020408163, %v3067_v6 }
 0x39a   : > { %3270 = vperm.xlu1 %4862, %v3206_v42   ;;  %v3207_v34 = vmul.f32 %v5163_v39, %v6860_v56 }
 0x39b   : > { %v3144_v51 = vadd.f32 1e-05, %v3122_v4  ;;  %v3123_v16 = vmax.f32 %v3101_v48, 0.0 }
 0x39c   : > { %3275 = vperm.xlu0 %4861, %v3207_v34  }
 0x39d   : > { %5168 = vrsqrt.f32 %v3144_v51  ;;  %v3145_v25 = vadd.f32 1e-05, %v3123_v16 }
 0x39e   : > { %v3070_v53 = vpop.xlane.xlu0 %3069 }
 0x39f   : > { %v5165_v9 = vpop.eup %5164  ;;  %5170 = vrsqrt.f32 %v3145_v25  ;;  %v3102_v52 = vmul.f32 0.020408163, %v3070_v53 }
 0x3a0   : > { %v3073_v3 = vpop.xlane.xlu1 %3072  ;;  %v3208_v58 = vmul.f32 %v5165_v9, %v6884_v60 }
 0x3a1   : > { %v5167_v10 = vpop.eup %5166  ;;  %v3124_v24 = vmax.f32 %v3102_v52, 0.0  ;;  %v3103_v49 = vmul.f32 0.020408163, %v3073_v3 }
 0x3a2   : > { %3280 = vperm.xlu1 %4862, %v3208_v58   ;;  %v3209_v59 = vmul.f32 %v5167_v10, %v6864_v8 }
 0x3a3   : > { %v3146_v15 = vadd.f32 1e-05, %v3124_v24  ;;  %v3125_v56 = vmax.f32 %v3103_v49, 0.0  ;;  %v3194_v49 = vld [vmem:[%s6443_s17 + $0xa0] sm:$0xff] }
 0x3a4   : > { %3285 = vperm.xlu0 %4861, %v3209_v59  }
 0x3a5   : > { %5172 = vrsqrt.f32 %v3146_v15  ;;  %v3147_v62 = vadd.f32 1e-05, %v3125_v56  ;;  %v3195_v15 = vld [vmem:[%s6443_s17 + $0xa8] sm:$0xff] }
 0x3a6   : > { %v3076_v7 = vpop.xlane.xlu0 %3075 }
 0x3a7   : > { %v5169_v47 = vpop.eup %5168  ;;  %5174 = vrsqrt.f32 %v3147_v62  ;;  %v3104_v46 = vmul.f32 0.020408163, %v3076_v7 }
 0x3a8   : > { %v3079_v22 = vpop.xlane.xlu1 %3078  ;;  %v3210_v6 = vmul.f32 %v5169_v47, %v6888_v33 }
 0x3a9   : > { %v5171_v42 = vpop.eup %5170  ;;  %v3126_v60 = vmax.f32 %v3104_v46, 0.0  ;;  %v3105_v39 = vmul.f32 0.020408163, %v3079_v22 }
 0x3aa   : > { %3290 = vperm.xlu1 %4862, %v3210_v6   ;;  %v3211_v4 = vmul.f32 %v5171_v42, %v6871_v44 }
 0x3ab   : > { %v3148_v48 = vadd.f32 1e-05, %v3126_v60  ;;  %v3127_v8 = vmax.f32 %v3105_v39, 0.0 }
 0x3ac   : > { %3295 = vperm.xlu0 %4861, %v3211_v4   ;;  %v3398_v56 = vpop.permute.xlu1 %3397 }
 0x3ad   : > { %5176 = vrsqrt.f32 %v3148_v48  ;;  %v3149_v34 = vadd.f32 1e-05, %v3127_v8 }
 0x3ae   : > { %v3082_v51 = vpop.xlane.xlu0 %3081 }
 0x3af   : > { %v5173_v16 = vpop.eup %5172  ;;  %5178 = vrsqrt.f32 %v3149_v34  ;;  %v3106_v25 = vmul.f32 0.020408163, %v3082_v51 }
 0x3b0   : > { %v3212_v53 = vmul.f32 %v5173_v16, %v6892_v41  ;;  %v6938_v7 = vpop.permute.xlu1 %3407 }
 0x3b1   : > { %v5175_v9 = vpop.eup %5174  ;;  %v3128_v33 = vmax.f32 %v3106_v25, 0.0 }
 0x3b2   : > { %3300 = vperm.xlu1 %4862, %v3212_v53   ;;  %v3213_v52 = vmul.f32 %v5175_v9, %v6879_v18 }
 0x3b3   : > { %v3150_v3 = vadd.f32 1e-05, %v3128_v33 }
 0x3b4   : > { %3305 = vperm.xlu0 %4861, %v3213_v52   ;;  %v6942_v47 = vpop.permute.xlu1 %3417 }
 0x3b5   : > { %5180 = vrsqrt.f32 %v3150_v3 }
 0x3b6   : > { %v3393_v18 = vpop.permute.xlu0 %3392 }
 0x3b7   : > { %v5177_v44 = vpop.eup %5176 }
 0x3b8   : > { %v3214_v58 = vmul.f32 %v5177_v44, %v6896_v14  ;;  %v6946_v46 = vpop.permute.xlu1 %3427 }
 0x3b9   : > { %v5179_v10 = vpop.eup %5178 }
 0x3ba   : > { %3310 = vperm.xlu1 %4862, %v3214_v58   ;;  %v3215_v24 = vmul.f32 %v5179_v10, %v6910_v2  ;;  %v6936_v62 = vpop.permute.xlu0 %3402 }
 0x3bc   : > { %3315 = vperm.xlu0 %4861, %v3215_v24   ;;  %v6950_v6 = vpop.permute.xlu1 %3437 }
 0x3be   : > { %v6940_v14 = vpop.permute.xlu0 %3412 }
 0x3bf   : > { %v5181_v59 = vpop.eup %5180 }
 0x3c0   : > { %v3216_v41 = vmul.f32 %v5181_v59, %v3194_v49 }
 0x3c2   : > { %3320 = vperm.xlu1 %4862, %v3216_v41   ;;  %v6944_v2 = vpop.permute.xlu0 %3422 }
 0x3c6   : > { %4864 = vset.pattern.permute.xlu1 %v5284_v57  ;;  %v6948_v22 = vpop.permute.xlu0 %3432 }
 0x3c7   : > { %3457 = vperm.xlu1 %4864, %v3195_v15  }
 0x3ca   : > { %v6953_v42 = vpop.permute.xlu0 %3442 }
 0x3ed   : > { %v3085_v60 = vpop.xlane.xlu1 %3084 }
 0x3ee   : > { %v3107_v39 = vmul.f32 0.020408163, %v3085_v60 }
 0x3f0   : > { %v3129_v4 = vmax.f32 %v3107_v39, 0.0 }
 0x3f1   : > { %v6955_v48 = vpop.permute.xlu1 %3447  ;;  %v3221_v8 = vpop.permute.xlu0 %3220 }
 0x3f2   : > { %v3151_v34 = vadd.f32 1e-05, %v3129_v4  ;;  %v3328_v51 = vmul.f32 %v3221_v8, %v6728_v17 }
 0x3f4   : > { %5182 = vrsqrt.f32 %v3151_v34  ;;  %v3460_v16 = vadd.f32 %v6717_v19, %v3328_v51 }
 0x3f5   : > { %v3226_v25 = vpop.permute.xlu1 %3225 }
 0x3f6   : > { %3482 = vst.msk [vmem:[%s6959_s18] sm:$0xff] %vm2886_vm2, %v3460_v16  ;;  %v3329_v53 = vmul.f32 %v3226_v25, %v6735_v43 }
 0x3f8   : > { %v3461_v9 = vadd.f32 %v6719_v54, %v3329_v53 }
 0x3f9   : > { %v3231_v33 = vpop.permute.xlu1 %3230 }
 0x3fa   : > { %3483 = vst.msk [vmem:[%s6959_s18 + $0x8] sm:$0xff] %vm2886_vm2, %v3461_v9  ;;  %v3330_v17 = vmul.f32 %v3231_v33, %v6741_v20 }
 0x3fc   : > { %v3462_v19 = vadd.f32 %v6721_v11, %v3330_v17 }
 0x3fd   : > { %v3236_v52 = vpop.permute.xlu1 %3235 }
 0x3fe   : > { %v5183_v3 = vpop.eup %5182  ;;  %3484 = vst.msk [vmem:[%s6959_s18 + $0x10] sm:$0xff] %vm2886_vm2, %v3462_v19  ;;  %v3331_v44 = vmul.f32 %v3236_v52, %v6747_v30 }
 0x3ff   : > { %v3217_v58 = vmul.f32 %v5183_v3, %v3195_v15 }
 0x400   : > { %v3463_v43 = vadd.f32 %v6725_v26, %v3331_v44 }
 0x401   : > { %3325 = vperm.xlu0 %4861, %v3217_v58   ;;  %v3241_v54 = vpop.permute.xlu1 %3240 }
 0x402   : > { %3485 = vst.msk [vmem:[%s6959_s18 + $0x18] sm:$0xff] %vm2886_vm2, %v3463_v43  ;;  %v3332_v10 = vmul.f32 %v3241_v54, %v6753_v38 }
 0x404   : > { %v3464_v20 = vadd.f32 %v6723_v31, %v3332_v10 }
 0x405   : > { %4863 = vset.pattern.permute.xlu0 %v5284_v57  ;;  %v3246_v11 = vpop.permute.xlu1 %3245 }
 0x406   : > { %3486 = vst.msk [vmem:[%s6959_s18 + $0x20] sm:$0xff] %vm2886_vm2, %v3464_v20  ;;  %v3333_v30 = vmul.f32 %v3246_v11, %v6757_v50  ;;  %3452 = vperm.xlu0 %4863, %v3194_v49  }
 0x408   : > { %v3465_v26 = vadd.f32 %v6730_v23, %v3333_v30 }
 0x409   : > { %v3251_v24 = vpop.permute.xlu1 %3250 }
 0x40a   : > { %3487 = vst.msk [vmem:[%s6959_s18 + $0x28] sm:$0xff] %vm2886_vm2, %v3465_v26  ;;  %v3334_v38 = vmul.f32 %v3251_v24, %v6766_v12 }
 0x40c   : > { %v3466_v31 = vadd.f32 %v6904_v37, %v3334_v38 }
 0x40d   : > { %v3256_v59 = vpop.permute.xlu1 %3255 }
 0x40e   : > { %3488 = vst.msk [vmem:[%s6959_s18 + $0x30] sm:$0xff] %vm2886_vm2, %v3466_v31  ;;  %v3335_v57 = vmul.f32 %v3256_v59, %v6769_v40 }
 0x410   : > { %v3467_v50 = vadd.f32 %v6899_v32, %v3335_v57 }
 0x411   : > { %v3261_v49 = vpop.permute.xlu1 %3260 }
 0x412   : > { %3489 = vst.msk [vmem:[%s6959_s18 + $0x38] sm:$0xff] %vm2886_vm2, %v3467_v50  ;;  %v3336_v23 = vmul.f32 %v3261_v49, %v6778_v21 }
 0x413   : > { %v3266_v41 = vpop.permute.xlu0 %3265 }
 0x414   : > { %v3468_v15 = vadd.f32 %v3393_v18, %v3336_v23  ;;  %v3337_v12 = vmul.f32 %v3266_v41, %v6781_v29 }
 0x416   : > { %3490 = vst.msk [vmem:[%s6959_s18 + $0x40] sm:$0xff] %vm2886_vm2, %v3468_v15  ;;  %v3469_v37 = vadd.f32 %v3398_v56, %v3337_v12 }
 0x418   : > { %3491 = vst.msk [vmem:[%s6959_s18 + $0x48] sm:$0xff] %vm2886_vm2, %v3469_v37 }
 0x419   : > { %v3271_v40 = vpop.permute.xlu1 %3270 }
 0x41a   : > { %v3338_v32 = vmul.f32 %v3271_v40, %v6790_v27 }
 0x41b   : > { %v3276_v60 = vpop.permute.xlu0 %3275 }
 0x41c   : > { %v3470_v39 = vadd.f32 %v6936_v62, %v3338_v32  ;;  %v3339_v4 = vmul.f32 %v3276_v60, %v6793_v55 }
 0x41e   : > { %3492 = vst.msk [vmem:[%s6959_s18 + $0x50] sm:$0xff] %vm2886_vm2, %v3470_v39  ;;  %v3471_v21 = vadd.f32 %v6938_v7, %v3339_v4 }
 0x420   : > { %3493 = vst.msk [vmem:[%s6959_s18 + $0x58] sm:$0xff] %vm2886_vm2, %v3471_v21 }
 0x421   : > { %v3281_v29 = vpop.permute.xlu1 %3280 }
 0x422   : > { %v3340_v18 = vmul.f32 %v3281_v29, %v6802_v63 }
 0x423   : > { %v3286_v56 = vpop.permute.xlu0 %3285 }
 0x424   : > { %v3472_v8 = vadd.f32 %v6940_v14, %v3340_v18  ;;  %v3341_v27 = vmul.f32 %v3286_v56, %v6805_v1 }
 0x426   : > { %3494 = vst.msk [vmem:[%s6959_s18 + $0x60] sm:$0xff] %vm2886_vm2, %v3472_v8  ;;  %v3473_v55 = vadd.f32 %v6942_v47, %v3341_v27 }
 0x428   : > { %3495 = vst.msk [vmem:[%s6959_s18 + $0x68] sm:$0xff] %vm2886_vm2, %v3473_v55 }
 0x429   : > { %v3291_v62 = vpop.permute.xlu1 %3290 }
 0x42a   : > { %v3342_v7 = vmul.f32 %v3291_v62, %v6814_v35 }
 0x42b   : > { %v3296_v34 = vpop.permute.xlu0 %3295 }
 0x42c   : > { %v3474_v51 = vadd.f32 %v6944_v2, %v3342_v7  ;;  %v3343_v63 = vmul.f32 %v3296_v34, %v6817_v5 }
 0x42e   : > { %3496 = vst.msk [vmem:[%s6959_s18 + $0x70] sm:$0xff] %vm2886_vm2, %v3474_v51  ;;  %v3475_v1 = vadd.f32 %v6946_v46, %v3343_v63 }
 0x430   : > { %3497 = vst.msk [vmem:[%s6959_s18 + $0x78] sm:$0xff] %vm2886_vm2, %v3475_v1 }
 0x431   : > { %v3301_v14 = vpop.permute.xlu1 %3300 }
 0x432   : > { %v3344_v47 = vmul.f32 %v3301_v14, %v6826_v13 }
 0x433   : > { %v3306_v16 = vpop.permute.xlu0 %3305 }
 0x434   : > { %v3476_v25 = vadd.f32 %v6948_v22, %v3344_v47  ;;  %v3345_v35 = vmul.f32 %v3306_v16, %v6829_v0 }
 0x436   : > { %3498 = vst.msk [vmem:[%s6959_s18 + $0x80] sm:$0xff] %vm2886_vm2, %v3476_v25  ;;  %v3477_v5 = vadd.f32 %v6950_v6, %v3345_v35 }
 0x438   : > { %3499 = vst.msk [vmem:[%s6959_s18 + $0x88] sm:$0xff] %vm2886_vm2, %v3477_v5 }
 0x439   : > { %v3311_v2 = vpop.permute.xlu1 %3310 }
 0x43a   : > { %v3346_v46 = vmul.f32 %v3311_v2, %v6838_v61 }
 0x43b   : > { %v3316_v53 = vpop.permute.xlu0 %3315 }
 0x43c   : > { %v3478_v9 = vadd.f32 %v6953_v42, %v3346_v46  ;;  %v3347_v13 = vmul.f32 %v3316_v53, %v6841_v36 }
 0x43e   : > { %3500 = vst.msk [vmem:[%s6959_s18 + $0x90] sm:$0xff] %vm2886_vm2, %v3478_v9  ;;  %v3479_v0 = vadd.f32 %v6955_v48, %v3347_v13 }
 0x440   : > { %3501 = vst.msk [vmem:[%s6959_s18 + $0x98] sm:$0xff] %vm2886_vm2, %v3479_v0 }
 0x441   : > { %v3321_v22 = vpop.permute.xlu1 %3320 }
 0x442   : > { %v3348_v61 = vmul.f32 %v3321_v22, %v6850_v28 }
 0x446   : > { %v3458_v33 = vpop.permute.xlu1 %3457 }
 0x480   : > { %v3326_v6 = vpop.permute.xlu0 %3325 }
 0x481   : > { %v3349_v17 = vmul.f32 %v3326_v6, %v6902_v45 }
 0x482   : > { %3510 = sbr.rel (!%p5331_p4) target bundleno = 1224 (0x4c8), region = 36 }
 0x483   : > { %v3481_v19 = vadd.f32 %v3458_v33, %v3349_v17 }
 0x485   : > { %3503 = vst.msk [vmem:[%s6959_s18 + $0xa8] sm:$0xff] %vm2886_vm2, %v3481_v19  ;;  %v3453_v52 = vpop.permute.xlu0 %3452 }
 0x486   : > { %v3480_v42 = vadd.f32 %v3453_v52, %v3348_v61 }
 0x488   : > { %3502 = vst.msk [vmem:[%s6959_s18 + $0xa0] sm:$0xff] %vm2886_vm2, %v3480_v42 }
 0x489   : > { %s7168_s12 = smov (!%p3513_p8, %s3512_s12), 22 }
 0x48a   : > { %s4021_s26 = sshll.u32 %s7168_s12, 7 }
 0x48b   : > { %p4024_p9 = scmp.eq.s32.totalorder %s4021_s26, 0 }
 0x48c   : > { %5190 = sdivrem.u32 (!%p4024_p9), %s7168_s12, 22 }
 0x48d   : > { %3521 = sbr.rel (%p4024_p9) target bundleno = 1224 (0x4c8), region = 40 }
 0x495   : > { %s7057_s20 = spop.drf %5190 }
 0x496   : > { %p4025_p10 = scmp.le.s32.totalorder %s7057_s20, 0 }
 0x497   : > { %s7160_s15 = smov (!%p4025_p10), %s7051_s25  ;;  %s7161_s27 = smov (!%p4025_p10), %s6959_s18 }
 0x498   : > { %3767 = sbr.rel (%p4025_p10) target bundleno = 1195 (0x4ab), region = 119  ;;  %s7066_s28 = smov (!%p4025_p10), 0  }
 0x499   : > { %s7068_s29 = smov (!%p4025_p10), 0  }
 0x49f LB: >> { %v3627_v36 = vld [vmem:[%s5256_s27] sm:$0xff]  ;;  %v3629_v28 = vld [vmem:[%s5256_s27 + $0x8] sm:$0xff]  ;;  %v3631_v45 = vld [vmem:[%s5256_s27 + $0x10] sm:$0xff]  ;;  %s3671_s30 = sadd.s32 1, %s5260_s28  ;;  %s3621_s29 = sadd.s32 1, %s5264_s29   ;;  %s5264_s29 = sphi %s7068_s29, %s3621_s29   ;;  %s5260_s28 = sphi %s7066_s28, %s7163_s28   ;;  %s5256_s27 = sphi %s7161_s27, %s3676_s27   ;;  %s5252_s15 = sphi %s7160_s15, %s7162_s15  }
 0x4a0   : >> { %3628 = vst [vmem:[%s5252_s15] sm:$0xff] %v3627_v36  ;;  %3630 = vst [vmem:[%s5252_s15 + $0x8] sm:$0xff] %v3629_v28  ;;  %v3633_v48 = vld [vmem:[%s5256_s27 + $0x18] sm:$0xff]  ;;  %v3635_v3 = vld [vmem:[%s5256_s27 + $0x20] sm:$0xff]  ;;  %p3672_p11 = scmp.ge.s32.totalorder %s3671_s30, %s7057_s20  ;;  %p3620_p12 = scmp.ge.s32.totalorder %s3621_s29, %s7057_s20 }
 0x4a1   : >> { %3632 = vst [vmem:[%s5252_s15 + $0x10] sm:$0xff] %v3631_v45  ;;  %v3637_v44 = vld [vmem:[%s5256_s27 + $0x28] sm:$0xff]  ;;  %3634 = vst [vmem:[%s5252_s15 + $0x18] sm:$0xff] %v3633_v48  ;;  %v3639_v58 = vld [vmem:[%s5256_s27 + $0x30] sm:$0xff] }
 0x4a2   : >> { %3636 = vst [vmem:[%s5252_s15 + $0x20] sm:$0xff] %v3635_v3  ;;  %3638 = vst [vmem:[%s5252_s15 + $0x28] sm:$0xff] %v3637_v44  ;;  %v3641_v43 = vld [vmem:[%s5256_s27 + $0x38] sm:$0xff]  ;;  %v3643_v54 = vld [vmem:[%s5256_s27 + $0x40] sm:$0xff]  ;;  %s7170_s30 = smov (%p3672_p11, %s3671_s30), 0 }
 0x4a3   : >> { %3640 = vst [vmem:[%s5252_s15 + $0x30] sm:$0xff] %v3639_v58  ;;  %3642 = vst [vmem:[%s5252_s15 + $0x38] sm:$0xff] %v3641_v43  ;;  %v3645_v10 = vld [vmem:[%s5256_s27 + $0x48] sm:$0xff]  ;;  %v3647_v20 = vld [vmem:[%s5256_s27 + $0x50] sm:$0xff]  ;;  %s3674_s4 = smul.u32 176, %s7170_s30  ;;  %s7163_s28 = smov %s7170_s30 }
 0x4a4   : >> { %3644 = vst [vmem:[%s5252_s15 + $0x40] sm:$0xff] %v3643_v54  ;;  %v3649_v11 = vld [vmem:[%s5256_s27 + $0x58] sm:$0xff]  ;;  %3646 = vst [vmem:[%s5252_s15 + $0x48] sm:$0xff] %v3645_v10  ;;  %v3651_v30 = vld [vmem:[%s5256_s27 + $0x60] sm:$0xff]  ;;  %3623 = sbr.rel (!%p3620_p12) target bundleno = 1183 (0x49f), region = 125 }
 0x4a5   : >> { %3648 = vst [vmem:[%s5252_s15 + $0x50] sm:$0xff] %v3647_v20  ;;  %3650 = vst [vmem:[%s5252_s15 + $0x58] sm:$0xff] %v3649_v11  ;;  %v3653_v26 = vld [vmem:[%s5256_s27 + $0x68] sm:$0xff]  ;;  %v3655_v24 = vld [vmem:[%s5256_s27 + $0x70] sm:$0xff]  ;;  %s3677_s5 = scalar_lea.vmem %s7051_s25, %s3674_s4  }
 0x4a6   : >> { %3652 = vst [vmem:[%s5252_s15 + $0x60] sm:$0xff] %v3651_v30  ;;  %3654 = vst [vmem:[%s5252_s15 + $0x68] sm:$0xff] %v3653_v26  ;;  %v3657_v38 = vld [vmem:[%s5256_s27 + $0x78] sm:$0xff]  ;;  %v3659_v31 = vld [vmem:[%s5256_s27 + $0x80] sm:$0xff] }
 0x4a7   : >> { %3656 = vst [vmem:[%s5252_s15 + $0x70] sm:$0xff] %v3655_v24  ;;  %v3661_v59 = vld [vmem:[%s5256_s27 + $0x88] sm:$0xff]  ;;  %3658 = vst [vmem:[%s5252_s15 + $0x78] sm:$0xff] %v3657_v38  ;;  %v3663_v57 = vld [vmem:[%s5256_s27 + $0x90] sm:$0xff] }
 0x4a8   : >> { %3660 = vst [vmem:[%s5252_s15 + $0x80] sm:$0xff] %v3659_v31  ;;  %3662 = vst [vmem:[%s5252_s15 + $0x88] sm:$0xff] %v3661_v59  ;;  %v3665_v50 = vld [vmem:[%s5256_s27 + $0x98] sm:$0xff]  ;;  %v3667_v49 = vld [vmem:[%s5256_s27 + $0xa0] sm:$0xff] }
 0x4a9   : >> { %3664 = vst [vmem:[%s5252_s15 + $0x90] sm:$0xff] %v3663_v57  ;;  %3666 = vst [vmem:[%s5252_s15 + $0x98] sm:$0xff] %v3665_v50  ;;  %v3669_v23 = vld [vmem:[%s5256_s27 + $0xa8] sm:$0xff]  ;;  %s3676_s27 = scalar_lea.vmem %s6959_s18, %s3674_s4 [#allocation2]  }
 0x4aa   : >> { %3668 = vst [vmem:[%s5252_s15 + $0xa0] sm:$0xff] %v3667_v49  ;;  %3670 = vst [vmem:[%s5252_s15 + $0xa8] sm:$0xff] %v3669_v23  ;;  %s7162_s15 = smov %s3677_s5 }
 0x4ab PF: > { %5192 = sdivrem.u32 %s7168_s12, 22 }
 0x4ac   : > { %s4026_s6 = smul.u32 176, %s7057_s20 }
 0x4ae   : > { %s3682_s8 = scalar_lea.vmem %s6959_s18, %s4026_s6 [#allocation2]   ;;  %s3684_s9 = scalar_lea.vmem %s7051_s25, %s4026_s6  }
 0x4b4   : > { %s5193_s10 = spop.drf %5192 }
 0x4b5   : > { %p4028_p13 = scmp.le.s32.totalorder %s5193_s10, 0 }
 0x4b6   : > { %s5266_s11 = smov (!%p4028_p13), %s3684_s9   ;;  %s5270_s14 = smov (!%p4028_p13), %s3682_s8  }
 0x4b7   : > { %3781 = sbr.rel (%p4028_p13) target bundleno = 1224 (0x4c8), region = 130  ;;  %s5274_s17 = smov (!%p4028_p13), 0  }
 0x4b8   : > { %s5278_s21 = smov (!%p4028_p13), 0  }
 0x4be LB: >> { %v3694_v41 = vld [vmem:[%s5272_s14] sm:$0xff]  ;;  %s3696_s7 = sadd.s32 1, %s5276_s17  ;;  %s3688_s21 = sadd.s32 1, %s5280_s21   ;;  %s5280_s21 = sphi %s5278_s21, %s3688_s21   ;;  %s5276_s17 = sphi %s5274_s17, %s5275_s17   ;;  %s5272_s14 = sphi %s5270_s14, %s3701_s14   ;;  %s5268_s11 = sphi %s5266_s11, %s3702_s11  }
 0x4bf   : >> { %3695 = vst [vmem:[%s5268_s11] sm:$0xff] %v3694_v41  ;;  %p3697_p0 = scmp.ge.s32.totalorder %s3696_s7, %s5193_s10  ;;  %p3687_p1 = scmp.ge.s32.totalorder %s3688_s21, %s5193_s10 }
 0x4c1   : >> { %s7172_s7 = smov (%p3697_p0, %s3696_s7), 0  ;;  %3690 = sbr.rel (!%p3687_p1) target bundleno = 1214 (0x4be), region = 136 }
 0x4c2   : >> { %s4029_s18 = sshll.u32 %s7172_s7, 3  ;;  %s5275_s17 = smov %s7172_s7  }
 0x4c3   : >> { %s3701_s14 = scalar_lea.vmem %s3682_s8, %s4029_s18 [#allocation2]   ;;  %s3702_s11 = scalar_lea.vmem %s3684_s9, %s4029_s18  }
 0x4c8 PF: > { %p10_p2 = scmp.ge.s32.totalorder %s5321_s16, 4   ;;  %s7164_s12 = smov %s5244_s13 }
 0x4c9   : > { %s7165_s13 = smov %s5329_s19  ;;  %s7166_s14 = smov %s5321_s16 }
 0x4ca   :  { %12 = sbr.rel (!%p10_p2) target bundleno = 2 (0x2), region = 147 }

</bundles_post_ra>
